<compile_context>
chip_gen: v7x
topology: tpu7x:2x2x1
jax: 0.10.0
libtpu: 0.0.40
codegen_flags: <defaults>
</compile_context>

<pallas_src>
import functools

import jax
import jax.numpy as jnp
import numpy as np
from jax.experimental import pallas as pl
from jax.experimental.pallas import tpu as pltpu

CONV_PLANES = [16, 32, 64, 128, 256, 256, 256]
KERNEL_SIZES = [7, 5, 3, 3, 3, 3, 3]


def _round_up(x, m):
    return (x + m - 1) // m * m


def _vmem_limit_bytes():
    try:
        cap = int(pltpu.get_tpu_info().vmem_capacity_bytes)
        return min(cap * 3 // 4, 96 * 1024 * 1024)
    except Exception:  # attribute / query differences -> fall back to defaults
        return None


def _compiler_params(dims):
    kwargs = dict(dimension_semantics=dims)
    v = _vmem_limit_bytes()
    if v is not None:
        kwargs["vmem_limit_bytes"] = v
    return pltpu.CompilerParams(**kwargs)


# ---------------------------------------------------------------------------
# Per-layer stride-2 conv + ReLU kernel (paired-layout input, padded output)
# ---------------------------------------------------------------------------
def _conv_relu_kernel(x_ref, w_ref, b_ref, o_ref, *, k, Ho, Wo, p_next):
    """One stride-2 conv + bias + ReLU for one batch element.

    x_ref : (1, Hh, 2, Wd, 2*Cin)  paired layout of the zero-padded input:
            x_ref[0, r, a, c, s*Cin + ch] == padded_in[2r + a, 2c + s, ch]
    w_ref : (k, 2*Cin, (p+1)*Cout) with
            w_ref[ky, s*Cin+ch, j*Cout+co] == w[ky, 2j+s, ch, co] (0 if 2j+s >= k)
    b_ref : (1, Cout) f32
    o_ref : (1, 2*Hh', 2*Wd', Cout) -- output written zero-padded in the PLAIN
            layout the next layer wants; its paired view is a free bitcast.
    """
    p = (k - 1) // 2
    cout = b_ref.shape[1]
    bias = b_ref[...]
    # zero once: everything outside the interior is the next layer's padding
    o_ref[...] = jnp.zeros(o_ref.shape, o_ref.dtype)

    def compute_row(h):
        acc = None
        for ky in range(k):
            lhs = x_ref[0, ky // 2 + h, ky % 2, :, :]          # (Wd, 2*Cin) unit-stride
            con = jnp.dot(lhs, w_ref[ky], preferred_element_type=jnp.float32)
            acc = con if acc is None else acc + con            # (Wd, (p+1)*Cout) f32
        out = acc[0:Wo, 0:cout]
        for j in range(1, p + 1):
            out = out + acc[j:j + Wo, j * cout:(j + 1) * cout]
        out = jnp.maximum(out + bias, 0.0)
        o_ref[0, p_next + h, pl.ds(p_next, Wo), :] = out.astype(o_ref.dtype)

    if Ho <= 16:
        for h in range(Ho):
            compute_row(h)
    else:
        # TODO(synk): block several rows per iteration / add a row-tile grid axis
        def body(h, carry):
            compute_row(h)
            return carry

        jax.lax.fori_loop(0, Ho, body, 0)


def conv_stride2_relu(x_paired, w_hat, b, *, k, Ho, Wo, p_next, Hh_next, Wd_next):
    """One SfMLearner conv block; output is zero-padded for the next layer."""
    N, Hh, _, Wd, cin2 = x_paired.shape
    cout = b.shape[1]
    out_h, out_w = 2 * Hh_next, 2 * Wd_next
    kern = functools.partial(_conv_relu_kernel, k=k, Ho=Ho, Wo=Wo, p_next=p_next)
    return pl.pallas_call(
        kern,
        out_shape=jax.ShapeDtypeStruct((N, out_h, out_w, cout), jnp.bfloat16),
        grid=(N,),
        in_specs=[
            pl.BlockSpec((1, Hh, 2, Wd, cin2), lambda n: (n, 0, 0, 0, 0)),
            pl.BlockSpec(w_hat.shape, lambda n: (0, 0, 0)),
            pl.BlockSpec(b.shape, lambda n: (0, 0)),
        ],
        out_specs=pl.BlockSpec((1, out_h, out_w, cout), lambda n: (n, 0, 0, 0)),
        compiler_params=_compiler_params(("parallel",)),
    )(x_paired, w_hat, b)


# ---------------------------------------------------------------------------
# Fused tail: all trailing convs with 1x1 spatial input + pose head
# ---------------------------------------------------------------------------
def _tail_kernel(*refs, n_tail, p_first, cin0):
    x_ref = refs[0]
    conv_w = refs[1:1 + n_tail]
    conv_b = refs[1 + n_tail:1 + 2 * n_tail]
    wp_ref = refs[1 + 2 * n_tail]
    bp_ref = refs[2 + 2 * n_tail]
    o_ref = refs[3 + 2 * n_tail]

    # the single valid pixel of a 1x1 input sits at padded position (p, p)
    r, a = p_first // 2, p_first % 2
    c, s = p_first // 2, p_first % 2
    v = x_ref[0, r, a, c:c + 1, s * cin0:(s + 1) * cin0]       # (1, cin0) bf16
    for w_ref, b_ref in zip(conv_w, conv_b):
        acc = jnp.dot(v, w_ref[...], preferred_element_type=jnp.float32) + b_ref[...]
        v = jnp.maximum(acc, 0.0).astype(jnp.bfloat16)
    # spatial mean is the identity at 1x1; rotate/translate scales are already
    # folded into wp/bp by pack_params.
    pose = jnp.dot(v, wp_ref[...], preferred_element_type=jnp.float32) + bp_ref[...]
    o_ref[0] = pose


def tail_fused(x_paired, conv_ws, conv_bs, wp, bp, *, p_first):
    N = x_paired.shape[0]
    cin0 = x_paired.shape[-1] // 2
    n_tail = len(conv_ws)
    kern = functools.partial(_tail_kernel, n_tail=n_tail, p_first=p_first, cin0=cin0)
    in_specs = [pl.BlockSpec((1,) + x_paired.shape[1:], lambda n: (n, 0, 0, 0, 0))]
    for w in conv_ws:
        in_specs.append(pl.BlockSpec(w.shape, lambda n: (0, 0)))
    for bb in conv_bs:
        in_specs.append(pl.BlockSpec(bb.shape, lambda n: (0, 0)))
    in_specs.append(pl.BlockSpec(wp.shape, lambda n: (0, 0)))
    in_specs.append(pl.BlockSpec(bp.shape, lambda n: (0, 0)))
    out = pl.pallas_call(
        kern,
        out_shape=jax.ShapeDtypeStruct((N, 1, 6), jnp.float32),
        grid=(N,),
        in_specs=in_specs,
        out_specs=pl.BlockSpec((1, 1, 6), lambda n: (n, 0, 0)),
        compiler_params=_compiler_params(("parallel",)),
    )(x_paired, *conv_ws, *conv_bs, wp, bp)
    return out.reshape(N, 6)


# ---------------------------------------------------------------------------
# Parameters (match torch xavier_uniform_ / zeros_ init) and packing
# ---------------------------------------------------------------------------
def xavier_uniform(key, k, cin, cout):
    fan_in = cin * k * k
    fan_out = cout * k * k
    bound = float(np.sqrt(6.0 / (fan_in + fan_out)))
    return jax.random.uniform(key, (k, k, cin, cout), jnp.float32, -bound, bound)


def init_params(key):
    keys = jax.random.split(key, len(CONV_PLANES) + 1)
    layers = []
    cin = 6
    for i, (cout, k) in enumerate(zip(CONV_PLANES, KERNEL_SIZES)):
        layers.append((xavier_uniform(keys[i], k, cin, cout),
                       jnp.zeros((cout,), jnp.float32)))
        cin = cout
    wp = xavier_uniform(keys[-1], 1, cin, 6).reshape(cin, 6)   # 1x1 pose_pred
    bp = jnp.zeros((6,), jnp.float32)
    return layers, (wp, bp)


def pack_params(layers, pose, scale_rotate, scale_translate):
    """K-pack column-parity taps, N-pack column offsets, fold pose scales."""
    packed = []
    for (w, b) in layers:
        k, _, cin, cout = w.shape
        p = (k - 1) // 2
        w_np = np.asarray(w, np.float32)
        w_hat = np.zeros((k, 2 * cin, (p + 1) * cout), np.float32)
        for ky in range(k):
            for j in range(p + 1):
                for s in range(2):
                    kx = 2 * j + s
                    if kx < k:
                        w_hat[ky, s * cin:(s + 1) * cin,
                              j * cout:(j + 1) * cout] = w_np[ky, kx]
        packed.append((jnp.asarray(w_hat, jnp.bfloat16),          # conv form
                       jnp.asarray(w_np[p, p], jnp.bfloat16),     # center tap (1x1 tail)
                       jnp.asarray(b, jnp.float32).reshape(1, cout)))
    wp, bp = pose
    scales = np.concatenate([np.full((3,), scale_rotate, np.float32),
                             np.full((3,), scale_translate, np.float32)])
    wp_s = np.asarray(wp, np.float32) * scales[None, :]
    bp_s = np.asarray(bp, np.float32) * scales
    return packed, (jnp.asarray(wp_s, jnp.bfloat16),
                    jnp.asarray(bp_s, jnp.float32).reshape(1, 6))


# ---------------------------------------------------------------------------
# Forward pass
# ---------------------------------------------------------------------------
def encoder_traj_forward(x_nchw, packed):
    conv_packed, (wp, bp) = packed
    N, cin, H, W = x_nchw.shape
    h_nhwc = jnp.transpose(x_nchw, (0, 2, 3, 1)).astype(jnp.bfloat16)

    ks = [w_hat.shape[0] for (w_hat, _, _) in conv_packed]
    # static spatial chain: spat[l] is layer l's input spatial size
    spat = [(H, W)]
    for k in ks:
        p = (k - 1) // 2
        hh, ww = spat[-1]
        spat.append(((hh + 2 * p - k) // 2 + 1, (ww + 2 * p - k) // 2 + 1))

    # first layer whose input is 1x1 -> start of the fused tail
    tail_start = None
    for l in range(len(ks)):
        if spat[l] == (1, 1):
            tail_start = l
            break
    if tail_start is None:
        # TODO(synk): pose-over-feature-map tail kernel for large images
        raise NotImplementedError("EncoderTraj Pallas path expects min(H, W) <= 64")

    def paired_dims(l):
        # paired-layout dims of layer l's input
        p = (ks[l] - 1) // 2
        ho, wo = spat[l + 1]
        return p, ho + p, _round_up(wo + p, 8)

    # layer-0 paired input: one zero-pad + a free (row-major) bitcast reshape
    p0, hh0, wd0 = paired_dims(0)
    xp = jnp.pad(h_nhwc, ((0, 0),
                          (p0, 2 * hh0 - H - p0),
                          (p0, 2 * wd0 - W - p0),
                          (0, 0)))
    cur = xp.reshape(N, hh0, 2, wd0, 2 * cin)

    for l in range(tail_start):
        w_hat, _, b = conv_packed[l]
        ho, wo = spat[l + 1]
        p_next, hh_next, wd_next = paired_dims(l + 1)
        out_plain = conv_stride2_relu(cur, w_hat, b, k=ks[l], Ho=ho, Wo=wo,
                                      p_next=p_next, Hh_next=hh_next, Wd_next=wd_next)
        cur = out_plain.reshape(N, hh_next, 2, wd_next, 2 * b.shape[1])   # bitcast

    tail_ws = [conv_packed[l][1] for l in range(tail_start, len(ks))]
    tail_bs = [conv_packed[l][2] for l in range(tail_start, len(ks))]
    p_first = (ks[tail_start] - 1) // 2
    return tail_fused(cur, tail_ws, tail_bs, wp, bp, p_first=p_first)


# ---------------------------------------------------------------------------
# Quantization-matched XLA reference (same bf16 cast points, f32 accumulation)
# ---------------------------------------------------------------------------
def reference_forward(x_nchw, layers, pose, scale_rotate, scale_translate):
    h = jnp.transpose(x_nchw, (0, 2, 3, 1)).astype(jnp.bfloat16)
    for (w, b) in layers:
        k = w.shape[0]
        p = (k - 1) // 2
        out = jax.lax.conv_general_dilated(
            h, w.astype(jnp.bfloat16), window_strides=(2, 2),
            padding=[(p, p), (p, p)],
            dimension_numbers=("NHWC", "HWIO", "NHWC"),
            preferred_element_type=jnp.float32,
            precision=jax.lax.Precision.HIGHEST)
        out = jnp.maximum(out + b.reshape(1, 1, 1, -1), 0.0)
        h = out.astype(jnp.bfloat16)
    wp, bp = pose
    scales = jnp.concatenate([jnp.full((3,), scale_rotate, jnp.float32),
                              jnp.full((3,), scale_translate, jnp.float32)])
    feat = h.astype(jnp.float32).mean(axis=(1, 2)).astype(jnp.bfloat16)    # (N, C)
    return jnp.dot(feat, (wp * scales[None, :]).astype(jnp.bfloat16),
                   preferred_element_type=jnp.float32) + (bp * scales).reshape(1, 6)


if __name__ == "__main__":
    key = jax.random.PRNGKey(0)
    k_param, k_x = jax.random.split(key)

    # (B, 6, H, W): two stacked RGB frames, small spatial size.
    B, H, W = 2, 16, 16
    x = jax.random.normal(k_x, (B, 6, H, W), jnp.float32)
    scale_rotate, scale_translate = 0.01, 0.1

    layers, pose = init_params(k_param)
    packed = pack_params(layers, pose, scale_rotate, scale_translate)

    pose_final = jax.block_until_ready(jax.jit(encoder_traj_forward)(x, packed))
    assert pose_final.shape == (B, 6)

    ref = jax.block_until_ready(
        jax.jit(lambda a, ls, ps: reference_forward(a, ls, ps,
                                                    scale_rotate, scale_translate))(
            x, layers, pose))
    np.testing.assert_allclose(np.asarray(pose_final, np.float32),
                               np.asarray(ref, np.float32),
                               rtol=1.5e-2, atol=2e-4)
    print("KERNEL_OK")
</pallas_src>

<mosaic_0001>
module attributes {stable_mosaic.version = 11 : i64} {
  func.func @_conv_relu_kernel(%arg0: i32, %arg1: memref<1x6x2x8x32xbf16, #tpu.memory_space<vmem>>, %arg2: memref<5x32x96xbf16, #tpu.memory_space<vmem>>, %arg3: memref<1x32xf32, #tpu.memory_space<vmem>>, %arg4: memref<1x6x16x32xbf16, #tpu.memory_space<vmem>>) attributes {dimension_semantics = [#tpu.dimension_semantics<parallel>], iteration_bounds = array<i64: 2>, scalar_prefetch = 0 : i64, scratch_operands = 0 : i64, tpu.core_type = #tpu.core_type<tc>, window_params = [{transform_indices = @transform_0, window_bounds = array<i64: 1, 6, 2, 8, 32>}, {pipeline_mode = #tpu.pipeline_mode<synchronous>, transform_indices = @transform_1, window_bounds = array<i64: 5, 32, 96>}, {pipeline_mode = #tpu.pipeline_mode<synchronous>, transform_indices = @transform_2, window_bounds = array<i64: 1, 32>}, {transform_indices = @transform_3, window_bounds = array<i64: 1, 6, 16, 32>}]} {
    %c0 = arith.constant 0 : index
    %c0_0 = arith.constant 0 : index
    %0 = vector.load %arg3[%c0, %c0_0] : memref<1x32xf32, #tpu.memory_space<vmem>>, vector<1x32xf32>
    %cst = arith.constant 0.000000e+00 : bf16
    %1 = vector.broadcast %cst : bf16 to vector<1x6x16x32xbf16>
    %c0_1 = arith.constant 0 : index
    %c0_2 = arith.constant 0 : index
    %c0_3 = arith.constant 0 : index
    %c0_4 = arith.constant 0 : index
    %2 = vector.load %arg4[%c0_1, %c0_2, %c0_3, %c0_4] : memref<1x6x16x32xbf16, #tpu.memory_space<vmem>>, vector<1x6x16x32xbf16>
    tpu.vector_store %arg4[%c0_1, %c0_2, %c0_3, %c0_4], %1 {strides = array<i32>} : memref<1x6x16x32xbf16, #tpu.memory_space<vmem>>, vector<1x6x16x32xbf16>,
    %c0_5 = arith.constant 0 : index
    %c0_6 = arith.constant 0 : index
    %c0_7 = arith.constant 0 : index
    %c0_8 = arith.constant 0 : index
    %c0_9 = arith.constant 0 : index
    %3 = vector.load %arg1[%c0_5, %c0_6, %c0_7, %c0_8, %c0_9] : memref<1x6x2x8x32xbf16, #tpu.memory_space<vmem>>, vector<1x1x1x8x32xbf16>
    %4 = vector.shape_cast %3 : vector<1x1x1x8x32xbf16> to vector<8x32xbf16>
    %c0_10 = arith.constant 0 : index
    %c0_11 = arith.constant 0 : index
    %c0_12 = arith.constant 0 : index
    %5 = vector.load %arg2[%c0_10, %c0_11, %c0_12] : memref<5x32x96xbf16, #tpu.memory_space<vmem>>, vector<1x32x96xbf16>
    %6 = vector.shape_cast %5 : vector<1x32x96xbf16> to vector<32x96xbf16>
    %cst_13 = arith.constant dense<0.000000e+00> : vector<8x96xf32>
    %7 = tpu.matmul %4, %6, %cst_13 {dimension_numbers = #tpu.dot_dimension_numbers<[1], [0], [0], [1], [0, 0, 1, 1], [], []>} : vector<8x32xbf16>, vector<32x96xbf16>, vector<8x96xf32> -> vector<8x96xf32>
    %c0_14 = arith.constant 0 : index
    %c0_15 = arith.constant 0 : index
    %c1 = arith.constant 1 : index
    %c0_16 = arith.constant 0 : index
    %c0_17 = arith.constant 0 : index
    %8 = vector.load %arg1[%c0_14, %c0_15, %c1, %c0_16, %c0_17] : memref<1x6x2x8x32xbf16, #tpu.memory_space<vmem>>, vector<1x1x1x8x32xbf16>
    %9 = vector.shape_cast %8 : vector<1x1x1x8x32xbf16> to vector<8x32xbf16>
    %c1_18 = arith.constant 1 : index
    %c0_19 = arith.constant 0 : index
    %c0_20 = arith.constant 0 : index
    %10 = vector.load %arg2[%c1_18, %c0_19, %c0_20] : memref<5x32x96xbf16, #tpu.memory_space<vmem>>, vector<1x32x96xbf16>
    %11 = vector.shape_cast %10 : vector<1x32x96xbf16> to vector<32x96xbf16>
    %cst_21 = arith.constant dense<0.000000e+00> : vector<8x96xf32>
    %12 = tpu.matmul %9, %11, %cst_21 {dimension_numbers = #tpu.dot_dimension_numbers<[1], [0], [0], [1], [0, 0, 1, 1], [], []>} : vector<8x32xbf16>, vector<32x96xbf16>, vector<8x96xf32> -> vector<8x96xf32>
    %13 = arith.addf %7, %12 : vector<8x96xf32>
    %c0_22 = arith.constant 0 : index
    %c1_23 = arith.constant 1 : index
    %c0_24 = arith.constant 0 : index
    %c0_25 = arith.constant 0 : index
    %c0_26 = arith.constant 0 : index
    %14 = vector.load %arg1[%c0_22, %c1_23, %c0_24, %c0_25, %c0_26] : memref<1x6x2x8x32xbf16, #tpu.memory_space<vmem>>, vector<1x1x1x8x32xbf16>
    %15 = vector.shape_cast %14 : vector<1x1x1x8x32xbf16> to vector<8x32xbf16>
    %c2 = arith.constant 2 : index
    %c0_27 = arith.constant 0 : index
    %c0_28 = arith.constant 0 : index
    %16 = vector.load %arg2[%c2, %c0_27, %c0_28] : memref<5x32x96xbf16, #tpu.memory_space<vmem>>, vector<1x32x96xbf16>
    %17 = vector.shape_cast %16 : vector<1x32x96xbf16> to vector<32x96xbf16>
    %cst_29 = arith.constant dense<0.000000e+00> : vector<8x96xf32>
    %18 = tpu.matmul %15, %17, %cst_29 {dimension_numbers = #tpu.dot_dimension_numbers<[1], [0], [0], [1], [0, 0, 1, 1], [], []>} : vector<8x32xbf16>, vector<32x96xbf16>, vector<8x96xf32> -> vector<8x96xf32>
    %19 = arith.addf %13, %18 : vector<8x96xf32>
    %c0_30 = arith.constant 0 : index
    %c1_31 = arith.constant 1 : index
    %c1_32 = arith.constant 1 : index
    %c0_33 = arith.constant 0 : index
    %c0_34 = arith.constant 0 : index
    %20 = vector.load %arg1[%c0_30, %c1_31, %c1_32, %c0_33, %c0_34] : memref<1x6x2x8x32xbf16, #tpu.memory_space<vmem>>, vector<1x1x1x8x32xbf16>
    %21 = vector.shape_cast %20 : vector<1x1x1x8x32xbf16> to vector<8x32xbf16>
    %c3 = arith.constant 3 : index
    %c0_35 = arith.constant 0 : index
    %c0_36 = arith.constant 0 : index
    %22 = vector.load %arg2[%c3, %c0_35, %c0_36] : memref<5x32x96xbf16, #tpu.memory_space<vmem>>, vector<1x32x96xbf16>
    %23 = vector.shape_cast %22 : vector<1x32x96xbf16> to vector<32x96xbf16>
    %cst_37 = arith.constant dense<0.000000e+00> : vector<8x96xf32>
    %24 = tpu.matmul %21, %23, %cst_37 {dimension_numbers = #tpu.dot_dimension_numbers<[1], [0], [0], [1], [0, 0, 1, 1], [], []>} : vector<8x32xbf16>, vector<32x96xbf16>, vector<8x96xf32> -> vector<8x96xf32>
    %25 = arith.addf %19, %24 : vector<8x96xf32>
    %c0_38 = arith.constant 0 : index
    %c2_39 = arith.constant 2 : index
    %c0_40 = arith.constant 0 : index
    %c0_41 = arith.constant 0 : index
    %c0_42 = arith.constant 0 : index
    %26 = vector.load %arg1[%c0_38, %c2_39, %c0_40, %c0_41, %c0_42] : memref<1x6x2x8x32xbf16, #tpu.memory_space<vmem>>, vector<1x1x1x8x32xbf16>
    %27 = vector.shape_cast %26 : vector<1x1x1x8x32xbf16> to vector<8x32xbf16>
    %c4 = arith.constant 4 : index
    %c0_43 = arith.constant 0 : index
    %c0_44 = arith.constant 0 : index
    %28 = vector.load %arg2[%c4, %c0_43, %c0_44] : memref<5x32x96xbf16, #tpu.memory_space<vmem>>, vector<1x32x96xbf16>
    %29 = vector.shape_cast %28 : vector<1x32x96xbf16> to vector<32x96xbf16>
    %cst_45 = arith.constant dense<0.000000e+00> : vector<8x96xf32>
    %30 = tpu.matmul %27, %29, %cst_45 {dimension_numbers = #tpu.dot_dimension_numbers<[1], [0], [0], [1], [0, 0, 1, 1], [], []>} : vector<8x32xbf16>, vector<32x96xbf16>, vector<8x96xf32> -> vector<8x96xf32>
    %31 = arith.addf %25, %30 : vector<8x96xf32>
    %32 = vector.extract_strided_slice %31 {offsets = [0, 0], sizes = [4, 32], strides = [1, 1]} : vector<8x96xf32> to vector<4x32xf32>
    %33 = vector.extract_strided_slice %31 {offsets = [1, 32], sizes = [4, 32], strides = [1, 1]} : vector<8x96xf32> to vector<4x32xf32>
    %34 = arith.addf %32, %33 : vector<4x32xf32>
    %35 = vector.extract_strided_slice %31 {offsets = [2, 64], sizes = [4, 32], strides = [1, 1]} : vector<8x96xf32> to vector<4x32xf32>
    %36 = arith.addf %34, %35 : vector<4x32xf32>
    %37 = vector.broadcast %0 : vector<1x32xf32> to vector<4x32xf32>
    %38 = arith.addf %36, %37 : vector<4x32xf32>
    %cst_46 = arith.constant 0.000000e+00 : f32
    %39 = vector.broadcast %cst_46 : f32 to vector<4x32xf32>
    %40 = arith.maximumf %38, %39 : vector<4x32xf32>
    %41 = arith.truncf %40 : vector<4x32xf32> to vector<4x32xbf16>
    %c0_47 = arith.constant 0 : index
    %c1_48 = arith.constant 1 : index
    %c1_49 = arith.constant 1 : index
    %c0_50 = arith.constant 0 : index
    %42 = vector.load %arg4[%c0_47, %c1_48, %c1_49, %c0_50] : memref<1x6x16x32xbf16, #tpu.memory_space<vmem>>, vector<1x1x4x32xbf16>
    %43 = vector.shape_cast %42 : vector<1x1x4x32xbf16> to vector<4x32xbf16>
    %44 = vector.shape_cast %41 : vector<4x32xbf16> to vector<1x1x4x32xbf16>
    tpu.vector_store %arg4[%c0_47, %c1_48, %c1_49, %c0_50], %44 {strides = array<i32>} : memref<1x6x16x32xbf16, #tpu.memory_space<vmem>>, vector<1x1x4x32xbf16>,
    %c0_51 = arith.constant 0 : index
    %c1_52 = arith.constant 1 : index
    %c0_53 = arith.constant 0 : index
    %c0_54 = arith.constant 0 : index
    %c0_55 = arith.constant 0 : index
    %45 = vector.load %arg1[%c0_51, %c1_52, %c0_53, %c0_54, %c0_55] : memref<1x6x2x8x32xbf16, #tpu.memory_space<vmem>>, vector<1x1x1x8x32xbf16>
    %46 = vector.shape_cast %45 : vector<1x1x1x8x32xbf16> to vector<8x32xbf16>
    %c0_56 = arith.constant 0 : index
    %c0_57 = arith.constant 0 : index
    %c0_58 = arith.constant 0 : index
    %47 = vector.load %arg2[%c0_56, %c0_57, %c0_58] : memref<5x32x96xbf16, #tpu.memory_space<vmem>>, vector<1x32x96xbf16>
    %48 = vector.shape_cast %47 : vector<1x32x96xbf16> to vector<32x96xbf16>
    %cst_59 = arith.constant dense<0.000000e+00> : vector<8x96xf32>
    %49 = tpu.matmul %46, %48, %cst_59 {dimension_numbers = #tpu.dot_dimension_numbers<[1], [0], [0], [1], [0, 0, 1, 1], [], []>} : vector<8x32xbf16>, vector<32x96xbf16>, vector<8x96xf32> -> vector<8x96xf32>
    %c0_60 = arith.constant 0 : index
    %c1_61 = arith.constant 1 : index
    %c1_62 = arith.constant 1 : index
    %c0_63 = arith.constant 0 : index
    %c0_64 = arith.constant 0 : index
    %50 = vector.load %arg1[%c0_60, %c1_61, %c1_62, %c0_63, %c0_64] : memref<1x6x2x8x32xbf16, #tpu.memory_space<vmem>>, vector<1x1x1x8x32xbf16>
    %51 = vector.shape_cast %50 : vector<1x1x1x8x32xbf16> to vector<8x32xbf16>
    %c1_65 = arith.constant 1 : index
    %c0_66 = arith.constant 0 : index
    %c0_67 = arith.constant 0 : index
    %52 = vector.load %arg2[%c1_65, %c0_66, %c0_67] : memref<5x32x96xbf16, #tpu.memory_space<vmem>>, vector<1x32x96xbf16>
    %53 = vector.shape_cast %52 : vector<1x32x96xbf16> to vector<32x96xbf16>
    %cst_68 = arith.constant dense<0.000000e+00> : vector<8x96xf32>
    %54 = tpu.matmul %51, %53, %cst_68 {dimension_numbers = #tpu.dot_dimension_numbers<[1], [0], [0], [1], [0, 0, 1, 1], [], []>} : vector<8x32xbf16>, vector<32x96xbf16>, vector<8x96xf32> -> vector<8x96xf32>
    %55 = arith.addf %49, %54 : vector<8x96xf32>
    %c0_69 = arith.constant 0 : index
    %c2_70 = arith.constant 2 : index
    %c0_71 = arith.constant 0 : index
    %c0_72 = arith.constant 0 : index
    %c0_73 = arith.constant 0 : index
    %56 = vector.load %arg1[%c0_69, %c2_70, %c0_71, %c0_72, %c0_73] : memref<1x6x2x8x32xbf16, #tpu.memory_space<vmem>>, vector<1x1x1x8x32xbf16>
    %57 = vector.shape_cast %56 : vector<1x1x1x8x32xbf16> to vector<8x32xbf16>
    %c2_74 = arith.constant 2 : index
    %c0_75 = arith.constant 0 : index
    %c0_76 = arith.constant 0 : index
    %58 = vector.load %arg2[%c2_74, %c0_75, %c0_76] : memref<5x32x96xbf16, #tpu.memory_space<vmem>>, vector<1x32x96xbf16>
    %59 = vector.shape_cast %58 : vector<1x32x96xbf16> to vector<32x96xbf16>
    %cst_77 = arith.constant dense<0.000000e+00> : vector<8x96xf32>
    %60 = tpu.matmul %57, %59, %cst_77 {dimension_numbers = #tpu.dot_dimension_numbers<[1], [0], [0], [1], [0, 0, 1, 1], [], []>} : vector<8x32xbf16>, vector<32x96xbf16>, vector<8x96xf32> -> vector<8x96xf32>
    %61 = arith.addf %55, %60 : vector<8x96xf32>
    %c0_78 = arith.constant 0 : index
    %c2_79 = arith.constant 2 : index
    %c1_80 = arith.constant 1 : index
    %c0_81 = arith.constant 0 : index
    %c0_82 = arith.constant 0 : index
    %62 = vector.load %arg1[%c0_78, %c2_79, %c1_80, %c0_81, %c0_82] : memref<1x6x2x8x32xbf16, #tpu.memory_space<vmem>>, vector<1x1x1x8x32xbf16>
    %63 = vector.shape_cast %62 : vector<1x1x1x8x32xbf16> to vector<8x32xbf16>
    %c3_83 = arith.constant 3 : index
    %c0_84 = arith.constant 0 : index
    %c0_85 = arith.constant 0 : index
    %64 = vector.load %arg2[%c3_83, %c0_84, %c0_85] : memref<5x32x96xbf16, #tpu.memory_space<vmem>>, vector<1x32x96xbf16>
    %65 = vector.shape_cast %64 : vector<1x32x96xbf16> to vector<32x96xbf16>
    %cst_86 = arith.constant dense<0.000000e+00> : vector<8x96xf32>
    %66 = tpu.matmul %63, %65, %cst_86 {dimension_numbers = #tpu.dot_dimension_numbers<[1], [0], [0], [1], [0, 0, 1, 1], [], []>} : vector<8x32xbf16>, vector<32x96xbf16>, vector<8x96xf32> -> vector<8x96xf32>
    %67 = arith.addf %61, %66 : vector<8x96xf32>
    %c0_87 = arith.constant 0 : index
    %c3_88 = arith.constant 3 : index
    %c0_89 = arith.constant 0 : index
    %c0_90 = arith.constant 0 : index
    %c0_91 = arith.constant 0 : index
    %68 = vector.load %arg1[%c0_87, %c3_88, %c0_89, %c0_90, %c0_91] : memref<1x6x2x8x32xbf16, #tpu.memory_space<vmem>>, vector<1x1x1x8x32xbf16>
    %69 = vector.shape_cast %68 : vector<1x1x1x8x32xbf16> to vector<8x32xbf16>
    %c4_92 = arith.constant 4 : index
    %c0_93 = arith.constant 0 : index
    %c0_94 = arith.constant 0 : index
    %70 = vector.load %arg2[%c4_92, %c0_93, %c0_94] : memref<5x32x96xbf16, #tpu.memory_space<vmem>>, vector<1x32x96xbf16>
    %71 = vector.shape_cast %70 : vector<1x32x96xbf16> to vector<32x96xbf16>
    %cst_95 = arith.constant dense<0.000000e+00> : vector<8x96xf32>
    %72 = tpu.matmul %69, %71, %cst_95 {dimension_numbers = #tpu.dot_dimension_numbers<[1], [0], [0], [1], [0, 0, 1, 1], [], []>} : vector<8x32xbf16>, vector<32x96xbf16>, vector<8x96xf32> -> vector<8x96xf32>
    %73 = arith.addf %67, %72 : vector<8x96xf32>
    %74 = vector.extract_strided_slice %73 {offsets = [0, 0], sizes = [4, 32], strides = [1, 1]} : vector<8x96xf32> to vector<4x32xf32>
    %75 = vector.extract_strided_slice %73 {offsets = [1, 32], sizes = [4, 32], strides = [1, 1]} : vector<8x96xf32> to vector<4x32xf32>
    %76 = arith.addf %74, %75 : vector<4x32xf32>
    %77 = vector.extract_strided_slice %73 {offsets = [2, 64], sizes = [4, 32], strides = [1, 1]} : vector<8x96xf32> to vector<4x32xf32>
    %78 = arith.addf %76, %77 : vector<4x32xf32>
    %79 = vector.broadcast %0 : vector<1x32xf32> to vector<4x32xf32>
    %80 = arith.addf %78, %79 : vector<4x32xf32>
    %cst_96 = arith.constant 0.000000e+00 : f32
    %81 = vector.broadcast %cst_96 : f32 to vector<4x32xf32>
    %82 = arith.maximumf %80, %81 : vector<4x32xf32>
    %83 = arith.truncf %82 : vector<4x32xf32> to vector<4x32xbf16>
    %c0_97 = arith.constant 0 : index
    %c2_98 = arith.constant 2 : index
    %c1_99 = arith.constant 1 : index
    %c0_100 = arith.constant 0 : index
    %84 = vector.load %arg4[%c0_97, %c2_98, %c1_99, %c0_100] : memref<1x6x16x32xbf16, #tpu.memory_space<vmem>>, vector<1x1x4x32xbf16>
    %85 = vector.shape_cast %84 : vector<1x1x4x32xbf16> to vector<4x32xbf16>
    %86 = vector.shape_cast %83 : vector<4x32xbf16> to vector<1x1x4x32xbf16>
    tpu.vector_store %arg4[%c0_97, %c2_98, %c1_99, %c0_100], %86 {strides = array<i32>} : memref<1x6x16x32xbf16, #tpu.memory_space<vmem>>, vector<1x1x4x32xbf16>,
    %c0_101 = arith.constant 0 : index
    %c2_102 = arith.constant 2 : index
    %c0_103 = arith.constant 0 : index
    %c0_104 = arith.constant 0 : index
    %c0_105 = arith.constant 0 : index
    %87 = vector.load %arg1[%c0_101, %c2_102, %c0_103, %c0_104, %c0_105] : memref<1x6x2x8x32xbf16, #tpu.memory_space<vmem>>, vector<1x1x1x8x32xbf16>
    %88 = vector.shape_cast %87 : vector<1x1x1x8x32xbf16> to vector<8x32xbf16>
    %c0_106 = arith.constant 0 : index
    %c0_107 = arith.constant 0 : index
    %c0_108 = arith.constant 0 : index
    %89 = vector.load %arg2[%c0_106, %c0_107, %c0_108] : memref<5x32x96xbf16, #tpu.memory_space<vmem>>, vector<1x32x96xbf16>
    %90 = vector.shape_cast %89 : vector<1x32x96xbf16> to vector<32x96xbf16>
    %cst_109 = arith.constant dense<0.000000e+00> : vector<8x96xf32>
    %91 = tpu.matmul %88, %90, %cst_109 {dimension_numbers = #tpu.dot_dimension_numbers<[1], [0], [0], [1], [0, 0, 1, 1], [], []>} : vector<8x32xbf16>, vector<32x96xbf16>, vector<8x96xf32> -> vector<8x96xf32>
    %c0_110 = arith.constant 0 : index
    %c2_111 = arith.constant 2 : index
    %c1_112 = arith.constant 1 : index
    %c0_113 = arith.constant 0 : index
    %c0_114 = arith.constant 0 : index
    %92 = vector.load %arg1[%c0_110, %c2_111, %c1_112, %c0_113, %c0_114] : memref<1x6x2x8x32xbf16, #tpu.memory_space<vmem>>, vector<1x1x1x8x32xbf16>
    %93 = vector.shape_cast %92 : vector<1x1x1x8x32xbf16> to vector<8x32xbf16>
    %c1_115 = arith.constant 1 : index
    %c0_116 = arith.constant 0 : index
    %c0_117 = arith.constant 0 : index
    %94 = vector.load %arg2[%c1_115, %c0_116, %c0_117] : memref<5x32x96xbf16, #tpu.memory_space<vmem>>, vector<1x32x96xbf16>
    %95 = vector.shape_cast %94 : vector<1x32x96xbf16> to vector<32x96xbf16>
    %cst_118 = arith.constant dense<0.000000e+00> : vector<8x96xf32>
    %96 = tpu.matmul %93, %95, %cst_118 {dimension_numbers = #tpu.dot_dimension_numbers<[1], [0], [0], [1], [0, 0, 1, 1], [], []>} : vector<8x32xbf16>, vector<32x96xbf16>, vector<8x96xf32> -> vector<8x96xf32>
    %97 = arith.addf %91, %96 : vector<8x96xf32>
    %c0_119 = arith.constant 0 : index
    %c3_120 = arith.constant 3 : index
    %c0_121 = arith.constant 0 : index
    %c0_122 = arith.constant 0 : index
    %c0_123 = arith.constant 0 : index
    %98 = vector.load %arg1[%c0_119, %c3_120, %c0_121, %c0_122, %c0_123] : memref<1x6x2x8x32xbf16, #tpu.memory_space<vmem>>, vector<1x1x1x8x32xbf16>
    %99 = vector.shape_cast %98 : vector<1x1x1x8x32xbf16> to vector<8x32xbf16>
    %c2_124 = arith.constant 2 : index
    %c0_125 = arith.constant 0 : index
    %c0_126 = arith.constant 0 : index
    %100 = vector.load %arg2[%c2_124, %c0_125, %c0_126] : memref<5x32x96xbf16, #tpu.memory_space<vmem>>, vector<1x32x96xbf16>
    %101 = vector.shape_cast %100 : vector<1x32x96xbf16> to vector<32x96xbf16>
    %cst_127 = arith.constant dense<0.000000e+00> : vector<8x96xf32>
    %102 = tpu.matmul %99, %101, %cst_127 {dimension_numbers = #tpu.dot_dimension_numbers<[1], [0], [0], [1], [0, 0, 1, 1], [], []>} : vector<8x32xbf16>, vector<32x96xbf16>, vector<8x96xf32> -> vector<8x96xf32>
    %103 = arith.addf %97, %102 : vector<8x96xf32>
    %c0_128 = arith.constant 0 : index
    %c3_129 = arith.constant 3 : index
    %c1_130 = arith.constant 1 : index
    %c0_131 = arith.constant 0 : index
    %c0_132 = arith.constant 0 : index
    %104 = vector.load %arg1[%c0_128, %c3_129, %c1_130, %c0_131, %c0_132] : memref<1x6x2x8x32xbf16, #tpu.memory_space<vmem>>, vector<1x1x1x8x32xbf16>
    %105 = vector.shape_cast %104 : vector<1x1x1x8x32xbf16> to vector<8x32xbf16>
    %c3_133 = arith.constant 3 : index
    %c0_134 = arith.constant 0 : index
    %c0_135 = arith.constant 0 : index
    %106 = vector.load %arg2[%c3_133, %c0_134, %c0_135] : memref<5x32x96xbf16, #tpu.memory_space<vmem>>, vector<1x32x96xbf16>
    %107 = vector.shape_cast %106 : vector<1x32x96xbf16> to vector<32x96xbf16>
    %cst_136 = arith.constant dense<0.000000e+00> : vector<8x96xf32>
    %108 = tpu.matmul %105, %107, %cst_136 {dimension_numbers = #tpu.dot_dimension_numbers<[1], [0], [0], [1], [0, 0, 1, 1], [], []>} : vector<8x32xbf16>, vector<32x96xbf16>, vector<8x96xf32> -> vector<8x96xf32>
    %109 = arith.addf %103, %108 : vector<8x96xf32>
    %c0_137 = arith.constant 0 : index
    %c4_138 = arith.constant 4 : index
    %c0_139 = arith.constant 0 : index
    %c0_140 = arith.constant 0 : index
    %c0_141 = arith.constant 0 : index
    %110 = vector.load %arg1[%c0_137, %c4_138, %c0_139, %c0_140, %c0_141] : memref<1x6x2x8x32xbf16, #tpu.memory_space<vmem>>, vector<1x1x1x8x32xbf16>
    %111 = vector.shape_cast %110 : vector<1x1x1x8x32xbf16> to vector<8x32xbf16>
    %c4_142 = arith.constant 4 : index
    %c0_143 = arith.constant 0 : index
    %c0_144 = arith.constant 0 : index
    %112 = vector.load %arg2[%c4_142, %c0_143, %c0_144] : memref<5x32x96xbf16, #tpu.memory_space<vmem>>, vector<1x32x96xbf16>
    %113 = vector.shape_cast %112 : vector<1x32x96xbf16> to vector<32x96xbf16>
    %cst_145 = arith.constant dense<0.000000e+00> : vector<8x96xf32>
    %114 = tpu.matmul %111, %113, %cst_145 {dimension_numbers = #tpu.dot_dimension_numbers<[1], [0], [0], [1], [0, 0, 1, 1], [], []>} : vector<8x32xbf16>, vector<32x96xbf16>, vector<8x96xf32> -> vector<8x96xf32>
    %115 = arith.addf %109, %114 : vector<8x96xf32>
    %116 = vector.extract_strided_slice %115 {offsets = [0, 0], sizes = [4, 32], strides = [1, 1]} : vector<8x96xf32> to vector<4x32xf32>
    %117 = vector.extract_strided_slice %115 {offsets = [1, 32], sizes = [4, 32], strides = [1, 1]} : vector<8x96xf32> to vector<4x32xf32>
    %118 = arith.addf %116, %117 : vector<4x32xf32>
    %119 = vector.extract_strided_slice %115 {offsets = [2, 64], sizes = [4, 32], strides = [1, 1]} : vector<8x96xf32> to vector<4x32xf32>
    %120 = arith.addf %118, %119 : vector<4x32xf32>
    %121 = vector.broadcast %0 : vector<1x32xf32> to vector<4x32xf32>
    %122 = arith.addf %120, %121 : vector<4x32xf32>
    %cst_146 = arith.constant 0.000000e+00 : f32
    %123 = vector.broadcast %cst_146 : f32 to vector<4x32xf32>
    %124 = arith.maximumf %122, %123 : vector<4x32xf32>
    %125 = arith.truncf %124 : vector<4x32xf32> to vector<4x32xbf16>
    %c0_147 = arith.constant 0 : index
    %c3_148 = arith.constant 3 : index
    %c1_149 = arith.constant 1 : index
    %c0_150 = arith.constant 0 : index
    %126 = vector.load %arg4[%c0_147, %c3_148, %c1_149, %c0_150] : memref<1x6x16x32xbf16, #tpu.memory_space<vmem>>, vector<1x1x4x32xbf16>
    %127 = vector.shape_cast %126 : vector<1x1x4x32xbf16> to vector<4x32xbf16>
    %128 = vector.shape_cast %125 : vector<4x32xbf16> to vector<1x1x4x32xbf16>
    tpu.vector_store %arg4[%c0_147, %c3_148, %c1_149, %c0_150], %128 {strides = array<i32>} : memref<1x6x16x32xbf16, #tpu.memory_space<vmem>>, vector<1x1x4x32xbf16>,
    %c0_151 = arith.constant 0 : index
    %c3_152 = arith.constant 3 : index
    %c0_153 = arith.constant 0 : index
    %c0_154 = arith.constant 0 : index
    %c0_155 = arith.constant 0 : index
    %129 = vector.load %arg1[%c0_151, %c3_152, %c0_153, %c0_154, %c0_155] : memref<1x6x2x8x32xbf16, #tpu.memory_space<vmem>>, vector<1x1x1x8x32xbf16>
    %130 = vector.shape_cast %129 : vector<1x1x1x8x32xbf16> to vector<8x32xbf16>
    %c0_156 = arith.constant 0 : index
    %c0_157 = arith.constant 0 : index
    %c0_158 = arith.constant 0 : index
    %131 = vector.load %arg2[%c0_156, %c0_157, %c0_158] : memref<5x32x96xbf16, #tpu.memory_space<vmem>>, vector<1x32x96xbf16>
    %132 = vector.shape_cast %131 : vector<1x32x96xbf16> to vector<32x96xbf16>
    %cst_159 = arith.constant dense<0.000000e+00> : vector<8x96xf32>
    %133 = tpu.matmul %130, %132, %cst_159 {dimension_numbers = #tpu.dot_dimension_numbers<[1], [0], [0], [1], [0, 0, 1, 1], [], []>} : vector<8x32xbf16>, vector<32x96xbf16>, vector<8x96xf32> -> vector<8x96xf32>
    %c0_160 = arith.constant 0 : index
    %c3_161 = arith.constant 3 : index
    %c1_162 = arith.constant 1 : index
    %c0_163 = arith.constant 0 : index
    %c0_164 = arith.constant 0 : index
    %134 = vector.load %arg1[%c0_160, %c3_161, %c1_162, %c0_163, %c0_164] : memref<1x6x2x8x32xbf16, #tpu.memory_space<vmem>>, vector<1x1x1x8x32xbf16>
    %135 = vector.shape_cast %134 : vector<1x1x1x8x32xbf16> to vector<8x32xbf16>
    %c1_165 = arith.constant 1 : index
    %c0_166 = arith.constant 0 : index
    %c0_167 = arith.constant 0 : index
    %136 = vector.load %arg2[%c1_165, %c0_166, %c0_167] : memref<5x32x96xbf16, #tpu.memory_space<vmem>>, vector<1x32x96xbf16>
    %137 = vector.shape_cast %136 : vector<1x32x96xbf16> to vector<32x96xbf16>
    %cst_168 = arith.constant dense<0.000000e+00> : vector<8x96xf32>
    %138 = tpu.matmul %135, %137, %cst_168 {dimension_numbers = #tpu.dot_dimension_numbers<[1], [0], [0], [1], [0, 0, 1, 1], [], []>} : vector<8x32xbf16>, vector<32x96xbf16>, vector<8x96xf32> -> vector<8x96xf32>
    %139 = arith.addf %133, %138 : vector<8x96xf32>
    %c0_169 = arith.constant 0 : index
    %c4_170 = arith.constant 4 : index
    %c0_171 = arith.constant 0 : index
    %c0_172 = arith.constant 0 : index
    %c0_173 = arith.constant 0 : index
    %140 = vector.load %arg1[%c0_169, %c4_170, %c0_171, %c0_172, %c0_173] : memref<1x6x2x8x32xbf16, #tpu.memory_space<vmem>>, vector<1x1x1x8x32xbf16>
    %141 = vector.shape_cast %140 : vector<1x1x1x8x32xbf16> to vector<8x32xbf16>
    %c2_174 = arith.constant 2 : index
    %c0_175 = arith.constant 0 : index
    %c0_176 = arith.constant 0 : index
    %142 = vector.load %arg2[%c2_174, %c0_175, %c0_176] : memref<5x32x96xbf16, #tpu.memory_space<vmem>>, vector<1x32x96xbf16>
    %143 = vector.shape_cast %142 : vector<1x32x96xbf16> to vector<32x96xbf16>
    %cst_177 = arith.constant dense<0.000000e+00> : vector<8x96xf32>
    %144 = tpu.matmul %141, %143, %cst_177 {dimension_numbers = #tpu.dot_dimension_numbers<[1], [0], [0], [1], [0, 0, 1, 1], [], []>} : vector<8x32xbf16>, vector<32x96xbf16>, vector<8x96xf32> -> vector<8x96xf32>
    %145 = arith.addf %139, %144 : vector<8x96xf32>
    %c0_178 = arith.constant 0 : index
    %c4_179 = arith.constant 4 : index
    %c1_180 = arith.constant 1 : index
    %c0_181 = arith.constant 0 : index
    %c0_182 = arith.constant 0 : index
    %146 = vector.load %arg1[%c0_178, %c4_179, %c1_180, %c0_181, %c0_182] : memref<1x6x2x8x32xbf16, #tpu.memory_space<vmem>>, vector<1x1x1x8x32xbf16>
    %147 = vector.shape_cast %146 : vector<1x1x1x8x32xbf16> to vector<8x32xbf16>
    %c3_183 = arith.constant 3 : index
    %c0_184 = arith.constant 0 : index
    %c0_185 = arith.constant 0 : index
    %148 = vector.load %arg2[%c3_183, %c0_184, %c0_185] : memref<5x32x96xbf16, #tpu.memory_space<vmem>>, vector<1x32x96xbf16>
    %149 = vector.shape_cast %148 : vector<1x32x96xbf16> to vector<32x96xbf16>
    %cst_186 = arith.constant dense<0.000000e+00> : vector<8x96xf32>
    %150 = tpu.matmul %147, %149, %cst_186 {dimension_numbers = #tpu.dot_dimension_numbers<[1], [0], [0], [1], [0, 0, 1, 1], [], []>} : vector<8x32xbf16>, vector<32x96xbf16>, vector<8x96xf32> -> vector<8x96xf32>
    %151 = arith.addf %145, %150 : vector<8x96xf32>
    %c0_187 = arith.constant 0 : index
    %c5 = arith.constant 5 : index
    %c0_188 = arith.constant 0 : index
    %c0_189 = arith.constant 0 : index
    %c0_190 = arith.constant 0 : index
    %152 = vector.load %arg1[%c0_187, %c5, %c0_188, %c0_189, %c0_190] : memref<1x6x2x8x32xbf16, #tpu.memory_space<vmem>>, vector<1x1x1x8x32xbf16>
    %153 = vector.shape_cast %152 : vector<1x1x1x8x32xbf16> to vector<8x32xbf16>
    %c4_191 = arith.constant 4 : index
    %c0_192 = arith.constant 0 : index
    %c0_193 = arith.constant 0 : index
    %154 = vector.load %arg2[%c4_191, %c0_192, %c0_193] : memref<5x32x96xbf16, #tpu.memory_space<vmem>>, vector<1x32x96xbf16>
    %155 = vector.shape_cast %154 : vector<1x32x96xbf16> to vector<32x96xbf16>
    %cst_194 = arith.constant dense<0.000000e+00> : vector<8x96xf32>
    %156 = tpu.matmul %153, %155, %cst_194 {dimension_numbers = #tpu.dot_dimension_numbers<[1], [0], [0], [1], [0, 0, 1, 1], [], []>} : vector<8x32xbf16>, vector<32x96xbf16>, vector<8x96xf32> -> vector<8x96xf32>
    %157 = arith.addf %151, %156 : vector<8x96xf32>
    %158 = vector.extract_strided_slice %157 {offsets = [0, 0], sizes = [4, 32], strides = [1, 1]} : vector<8x96xf32> to vector<4x32xf32>
    %159 = vector.extract_strided_slice %157 {offsets = [1, 32], sizes = [4, 32], strides = [1, 1]} : vector<8x96xf32> to vector<4x32xf32>
    %160 = arith.addf %158, %159 : vector<4x32xf32>
    %161 = vector.extract_strided_slice %157 {offsets = [2, 64], sizes = [4, 32], strides = [1, 1]} : vector<8x96xf32> to vector<4x32xf32>
    %162 = arith.addf %160, %161 : vector<4x32xf32>
    %163 = vector.broadcast %0 : vector<1x32xf32> to vector<4x32xf32>
    %164 = arith.addf %162, %163 : vector<4x32xf32>
    %cst_195 = arith.constant 0.000000e+00 : f32
    %165 = vector.broadcast %cst_195 : f32 to vector<4x32xf32>
    %166 = arith.maximumf %164, %165 : vector<4x32xf32>
    %167 = arith.truncf %166 : vector<4x32xf32> to vector<4x32xbf16>
    %c0_196 = arith.constant 0 : index
    %c4_197 = arith.constant 4 : index
    %c1_198 = arith.constant 1 : index
    %c0_199 = arith.constant 0 : index
    %168 = vector.load %arg4[%c0_196, %c4_197, %c1_198, %c0_199] : memref<1x6x16x32xbf16, #tpu.memory_space<vmem>>, vector<1x1x4x32xbf16>
    %169 = vector.shape_cast %168 : vector<1x1x4x32xbf16> to vector<4x32xbf16>
    %170 = vector.shape_cast %167 : vector<4x32xbf16> to vector<1x1x4x32xbf16>
    tpu.vector_store %arg4[%c0_196, %c4_197, %c1_198, %c0_199], %170 {strides = array<i32>} : memref<1x6x16x32xbf16, #tpu.memory_space<vmem>>, vector<1x1x4x32xbf16>,
    return
  }
  func.func @transform_0(%arg0: i32) -> (i32, i32, i32, i32, i32) {
    %c0_i32 = arith.constant 0 : i32
    %c0_i32_0 = arith.constant 0 : i32
    %c0_i32_1 = arith.constant 0 : i32
    %c0_i32_2 = arith.constant 0 : i32
    %c0_i32_3 = arith.constant 0 : i32
    return %arg0, %c0_i32, %c0_i32_0, %c0_i32_1, %c0_i32_2 : i32, i32, i32, i32, i32
  }
  func.func @transform_1(%arg0: i32) -> (i32, i32, i32) {
    %c0_i32 = arith.constant 0 : i32
    %c0_i32_0 = arith.constant 0 : i32
    %c0_i32_1 = arith.constant 0 : i32
    %c0_i32_2 = arith.constant 0 : i32
    return %c0_i32, %c0_i32_0, %c0_i32_1 : i32, i32, i32
  }
  func.func @transform_2(%arg0: i32) -> (i32, i32) {
    %c0_i32 = arith.constant 0 : i32
    %c0_i32_0 = arith.constant 0 : i32
    %c0_i32_1 = arith.constant 0 : i32
    return %c0_i32, %c0_i32_0 : i32, i32
  }
  func.func @transform_3(%arg0: i32) -> (i32, i32, i32, i32) {
    %c0_i32 = arith.constant 0 : i32
    %c0_i32_0 = arith.constant 0 : i32
    %c0_i32_1 = arith.constant 0 : i32
    %c0_i32_2 = arith.constant 0 : i32
    return %arg0, %c0_i32, %c0_i32_0, %c0_i32_1 : i32, i32, i32, i32
  }
}

module attributes {stable_mosaic.version = 11 : i64} {
  func.func @_conv_relu_kernel(%arg0: i32, %arg1: memref<1x11x2x16x12xbf16, #tpu.memory_space<vmem>>, %arg2: memref<7x12x64xbf16, #tpu.memory_space<vmem>>, %arg3: memref<1x16xf32, #tpu.memory_space<vmem>>, %arg4: memref<1x12x16x16xbf16, #tpu.memory_space<vmem>>) attributes {dimension_semantics = [#tpu.dimension_semantics<parallel>], iteration_bounds = array<i64: 2>, scalar_prefetch = 0 : i64, scratch_operands = 0 : i64, tpu.core_type = #tpu.core_type<tc>, window_params = [{transform_indices = @transform_0, window_bounds = array<i64: 1, 11, 2, 16, 12>}, {pipeline_mode = #tpu.pipeline_mode<synchronous>, transform_indices = @transform_1, window_bounds = array<i64: 7, 12, 64>}, {pipeline_mode = #tpu.pipeline_mode<synchronous>, transform_indices = @transform_2, window_bounds = array<i64: 1, 16>}, {transform_indices = @transform_3, window_bounds = array<i64: 1, 12, 16, 16>}]} {
    %c0 = arith.constant 0 : index
    %c0_0 = arith.constant 0 : index
    %0 = vector.load %arg3[%c0, %c0_0] : memref<1x16xf32, #tpu.memory_space<vmem>>, vector<1x16xf32>
    %cst = arith.constant 0.000000e+00 : bf16
    %1 = vector.broadcast %cst : bf16 to vector<1x12x16x16xbf16>
    %c0_1 = arith.constant 0 : index
    %c0_2 = arith.constant 0 : index
    %c0_3 = arith.constant 0 : index
    %c0_4 = arith.constant 0 : index
    %2 = vector.load %arg4[%c0_1, %c0_2, %c0_3, %c0_4] : memref<1x12x16x16xbf16, #tpu.memory_space<vmem>>, vector<1x12x16x16xbf16>
    tpu.vector_store %arg4[%c0_1, %c0_2, %c0_3, %c0_4], %1 {strides = array<i32>} : memref<1x12x16x16xbf16, #tpu.memory_space<vmem>>, vector<1x12x16x16xbf16>,
    %c0_5 = arith.constant 0 : index
    %c0_6 = arith.constant 0 : index
    %c0_7 = arith.constant 0 : index
    %c0_8 = arith.constant 0 : index
    %c0_9 = arith.constant 0 : index
    %3 = vector.load %arg1[%c0_5, %c0_6, %c0_7, %c0_8, %c0_9] : memref<1x11x2x16x12xbf16, #tpu.memory_space<vmem>>, vector<1x1x1x16x12xbf16>
    %4 = vector.shape_cast %3 : vector<1x1x1x16x12xbf16> to vector<16x12xbf16>
    %c0_10 = arith.constant 0 : index
    %c0_11 = arith.constant 0 : index
    %c0_12 = arith.constant 0 : index
    %5 = vector.load %arg2[%c0_10, %c0_11, %c0_12] : memref<7x12x64xbf16, #tpu.memory_space<vmem>>, vector<1x12x64xbf16>
    %6 = vector.shape_cast %5 : vector<1x12x64xbf16> to vector<12x64xbf16>
    %cst_13 = arith.constant dense<0.000000e+00> : vector<16x64xf32>
    %7 = tpu.matmul %4, %6, %cst_13 {dimension_numbers = #tpu.dot_dimension_numbers<[1], [0], [0], [1], [0, 0, 1, 1], [], []>} : vector<16x12xbf16>, vector<12x64xbf16>, vector<16x64xf32> -> vector<16x64xf32>
    %c0_14 = arith.constant 0 : index
    %c0_15 = arith.constant 0 : index
    %c1 = arith.constant 1 : index
    %c0_16 = arith.constant 0 : index
    %c0_17 = arith.constant 0 : index
    %8 = vector.load %arg1[%c0_14, %c0_15, %c1, %c0_16, %c0_17] : memref<1x11x2x16x12xbf16, #tpu.memory_space<vmem>>, vector<1x1x1x16x12xbf16>
    %9 = vector.shape_cast %8 : vector<1x1x1x16x12xbf16> to vector<16x12xbf16>
    %c1_18 = arith.constant 1 : index
    %c0_19 = arith.constant 0 : index
    %c0_20 = arith.constant 0 : index
    %10 = vector.load %arg2[%c1_18, %c0_19, %c0_20] : memref<7x12x64xbf16, #tpu.memory_space<vmem>>, vector<1x12x64xbf16>
    %11 = vector.shape_cast %10 : vector<1x12x64xbf16> to vector<12x64xbf16>
    %cst_21 = arith.constant dense<0.000000e+00> : vector<16x64xf32>
    %12 = tpu.matmul %9, %11, %cst_21 {dimension_numbers = #tpu.dot_dimension_numbers<[1], [0], [0], [1], [0, 0, 1, 1], [], []>} : vector<16x12xbf16>, vector<12x64xbf16>, vector<16x64xf32> -> vector<16x64xf32>
    %13 = arith.addf %7, %12 : vector<16x64xf32>
    %c0_22 = arith.constant 0 : index
    %c1_23 = arith.constant 1 : index
    %c0_24 = arith.constant 0 : index
    %c0_25 = arith.constant 0 : index
    %c0_26 = arith.constant 0 : index
    %14 = vector.load %arg1[%c0_22, %c1_23, %c0_24, %c0_25, %c0_26] : memref<1x11x2x16x12xbf16, #tpu.memory_space<vmem>>, vector<1x1x1x16x12xbf16>
    %15 = vector.shape_cast %14 : vector<1x1x1x16x12xbf16> to vector<16x12xbf16>
    %c2 = arith.constant 2 : index
    %c0_27 = arith.constant 0 : index
    %c0_28 = arith.constant 0 : index
    %16 = vector.load %arg2[%c2, %c0_27, %c0_28] : memref<7x12x64xbf16, #tpu.memory_space<vmem>>, vector<1x12x64xbf16>
    %17 = vector.shape_cast %16 : vector<1x12x64xbf16> to vector<12x64xbf16>
    %cst_29 = arith.constant dense<0.000000e+00> : vector<16x64xf32>
    %18 = tpu.matmul %15, %17, %cst_29 {dimension_numbers = #tpu.dot_dimension_numbers<[1], [0], [0], [1], [0, 0, 1, 1], [], []>} : vector<16x12xbf16>, vector<12x64xbf16>, vector<16x64xf32> -> vector<16x64xf32>
    %19 = arith.addf %13, %18 : vector<16x64xf32>
    %c0_30 = arith.constant 0 : index
    %c1_31 = arith.constant 1 : index
    %c1_32 = arith.constant 1 : index
    %c0_33 = arith.constant 0 : index
    %c0_34 = arith.constant 0 : index
    %20 = vector.load %arg1[%c0_30, %c1_31, %c1_32, %c0_33, %c0_34] : memref<1x11x2x16x12xbf16, #tpu.memory_space<vmem>>, vector<1x1x1x16x12xbf16>
    %21 = vector.shape_cast %20 : vector<1x1x1x16x12xbf16> to vector<16x12xbf16>
    %c3 = arith.constant 3 : index
    %c0_35 = arith.constant 0 : index
    %c0_36 = arith.constant 0 : index
    %22 = vector.load %arg2[%c3, %c0_35, %c0_36] : memref<7x12x64xbf16, #tpu.memory_space<vmem>>, vector<1x12x64xbf16>
    %23 = vector.shape_cast %22 : vector<1x12x64xbf16> to vector<12x64xbf16>
    %cst_37 = arith.constant dense<0.000000e+00> : vector<16x64xf32>
    %24 = tpu.matmul %21, %23, %cst_37 {dimension_numbers = #tpu.dot_dimension_numbers<[1], [0], [0], [1], [0, 0, 1, 1], [], []>} : vector<16x12xbf16>, vector<12x64xbf16>, vector<16x64xf32> -> vector<16x64xf32>
    %25 = arith.addf %19, %24 : vector<16x64xf32>
    %c0_38 = arith.constant 0 : index
    %c2_39 = arith.constant 2 : index
    %c0_40 = arith.constant 0 : index
    %c0_41 = arith.constant 0 : index
    %c0_42 = arith.constant 0 : index
    %26 = vector.load %arg1[%c0_38, %c2_39, %c0_40, %c0_41, %c0_42] : memref<1x11x2x16x12xbf16, #tpu.memory_space<vmem>>, vector<1x1x1x16x12xbf16>
    %27 = vector.shape_cast %26 : vector<1x1x1x16x12xbf16> to vector<16x12xbf16>
    %c4 = arith.constant 4 : index
    %c0_43 = arith.constant 0 : index
    %c0_44 = arith.constant 0 : index
    %28 = vector.load %arg2[%c4, %c0_43, %c0_44] : memref<7x12x64xbf16, #tpu.memory_space<vmem>>, vector<1x12x64xbf16>
    %29 = vector.shape_cast %28 : vector<1x12x64xbf16> to vector<12x64xbf16>
    %cst_45 = arith.constant dense<0.000000e+00> : vector<16x64xf32>
    %30 = tpu.matmul %27, %29, %cst_45 {dimension_numbers = #tpu.dot_dimension_numbers<[1], [0], [0], [1], [0, 0, 1, 1], [], []>} : vector<16x12xbf16>, vector<12x64xbf16>, vector<16x64xf32> -> vector<16x64xf32>
    %31 = arith.addf %25, %30 : vector<16x64xf32>
    %c0_46 = arith.constant 0 : index
    %c2_47 = arith.constant 2 : index
    %c1_48 = arith.constant 1 : index
    %c0_49 = arith.constant 0 : index
    %c0_50 = arith.constant 0 : index
    %32 = vector.load %arg1[%c0_46, %c2_47, %c1_48, %c0_49, %c0_50] : memref<1x11x2x16x12xbf16, #tpu.memory_space<vmem>>, vector<1x1x1x16x12xbf16>
    %33 = vector.shape_cast %32 : vector<1x1x1x16x12xbf16> to vector<16x12xbf16>
    %c5 = arith.constant 5 : index
    %c0_51 = arith.constant 0 : index
    %c0_52 = arith.constant 0 : index
    %34 = vector.load %arg2[%c5, %c0_51, %c0_52] : memref<7x12x64xbf16, #tpu.memory_space<vmem>>, vector<1x12x64xbf16>
    %35 = vector.shape_cast %34 : vector<1x12x64xbf16> to vector<12x64xbf16>
    %cst_53 = arith.constant dense<0.000000e+00> : vector<16x64xf32>
    %36 = tpu.matmul %33, %35, %cst_53 {dimension_numbers = #tpu.dot_dimension_numbers<[1], [0], [0], [1], [0, 0, 1, 1], [], []>} : vector<16x12xbf16>, vector<12x64xbf16>, vector<16x64xf32> -> vector<16x64xf32>
    %37 = arith.addf %31, %36 : vector<16x64xf32>
    %c0_54 = arith.constant 0 : index
    %c3_55 = arith.constant 3 : index
    %c0_56 = arith.constant 0 : index
    %c0_57 = arith.constant 0 : index
    %c0_58 = arith.constant 0 : index
    %38 = vector.load %arg1[%c0_54, %c3_55, %c0_56, %c0_57, %c0_58] : memref<1x11x2x16x12xbf16, #tpu.memory_space<vmem>>, vector<1x1x1x16x12xbf16>
    %39 = vector.shape_cast %38 : vector<1x1x1x16x12xbf16> to vector<16x12xbf16>
    %c6 = arith.constant 6 : index
    %c0_59 = arith.constant 0 : index
    %c0_60 = arith.constant 0 : index
    %40 = vector.load %arg2[%c6, %c0_59, %c0_60] : memref<7x12x64xbf16, #tpu.memory_space<vmem>>, vector<1x12x64xbf16>
    %41 = vector.shape_cast %40 : vector<1x12x64xbf16> to vector<12x64xbf16>
    %cst_61 = arith.constant dense<0.000000e+00> : vector<16x64xf32>
    %42 = tpu.matmul %39, %41, %cst_61 {dimension_numbers = #tpu.dot_dimension_numbers<[1], [0], [0], [1], [0, 0, 1, 1], [], []>} : vector<16x12xbf16>, vector<12x64xbf16>, vector<16x64xf32> -> vector<16x64xf32>
    %43 = arith.addf %37, %42 : vector<16x64xf32>
    %44 = vector.extract_strided_slice %43 {offsets = [0, 0], sizes = [8, 16], strides = [1, 1]} : vector<16x64xf32> to vector<8x16xf32>
    %45 = vector.extract_strided_slice %43 {offsets = [1, 16], sizes = [8, 16], strides = [1, 1]} : vector<16x64xf32> to vector<8x16xf32>
    %46 = arith.addf %44, %45 : vector<8x16xf32>
    %47 = vector.extract_strided_slice %43 {offsets = [2, 32], sizes = [8, 16], strides = [1, 1]} : vector<16x64xf32> to vector<8x16xf32>
    %48 = arith.addf %46, %47 : vector<8x16xf32>
    %49 = vector.extract_strided_slice %43 {offsets = [3, 48], sizes = [8, 16], strides = [1, 1]} : vector<16x64xf32> to vector<8x16xf32>
    %50 = arith.addf %48, %49 : vector<8x16xf32>
    %51 = vector.broadcast %0 : vector<1x16xf32> to vector<8x16xf32>
    %52 = arith.addf %50, %51 : vector<8x16xf32>
    %cst_62 = arith.constant 0.000000e+00 : f32
    %53 = vector.broadcast %cst_62 : f32 to vector<8x16xf32>
    %54 = arith.maximumf %52, %53 : vector<8x16xf32>
    %55 = arith.truncf %54 : vector<8x16xf32> to vector<8x16xbf16>
    %c0_63 = arith.constant 0 : index
    %c2_64 = arith.constant 2 : index
    %c2_65 = arith.constant 2 : index
    %c0_66 = arith.constant 0 : index
    %56 = vector.load %arg4[%c0_63, %c2_64, %c2_65, %c0_66] : memref<1x12x16x16xbf16, #tpu.memory_space<vmem>>, vector<1x1x8x16xbf16>
    %57 = vector.shape_cast %56 : vector<1x1x8x16xbf16> to vector<8x16xbf16>
    %58 = vector.shape_cast %55 : vector<8x16xbf16> to vector<1x1x8x16xbf16>
    tpu.vector_store %arg4[%c0_63, %c2_64, %c2_65, %c0_66], %58 {strides = array<i32>} : memref<1x12x16x16xbf16, #tpu.memory_space<vmem>>, vector<1x1x8x16xbf16>,
    %c0_67 = arith.constant 0 : index
    %c1_68 = arith.constant 1 : index
    %c0_69 = arith.constant 0 : index
    %c0_70 = arith.constant 0 : index
    %c0_71 = arith.constant 0 : index
    %59 = vector.load %arg1[%c0_67, %c1_68, %c0_69, %c0_70, %c0_71] : memref<1x11x2x16x12xbf16, #tpu.memory_space<vmem>>, vector<1x1x1x16x12xbf16>
    %60 = vector.shape_cast %59 : vector<1x1x1x16x12xbf16> to vector<16x12xbf16>
    %c0_72 = arith.constant 0 : index
    %c0_73 = arith.constant 0 : index
    %c0_74 = arith.constant 0 : index
    %61 = vector.load %arg2[%c0_72, %c0_73, %c0_74] : memref<7x12x64xbf16, #tpu.memory_space<vmem>>, vector<1x12x64xbf16>
    %62 = vector.shape_cast %61 : vector<1x12x64xbf16> to vector<12x64xbf16>
    %cst_75 = arith.constant dense<0.000000e+00> : vector<16x64xf32>
    %63 = tpu.matmul %60, %62, %cst_75 {dimension_numbers = #tpu.dot_dimension_numbers<[1], [0], [0], [1], [0, 0, 1, 1], [], []>} : vector<16x12xbf16>, vector<12x64xbf16>, vector<16x64xf32> -> vector<16x64xf32>
    %c0_76 = arith.constant 0 : index
    %c1_77 = arith.constant 1 : index
    %c1_78 = arith.constant 1 : index
    %c0_79 = arith.constant 0 : index
    %c0_80 = arith.constant 0 : index
    %64 = vector.load %arg1[%c0_76, %c1_77, %c1_78, %c0_79, %c0_80] : memref<1x11x2x16x12xbf16, #tpu.memory_space<vmem>>, vector<1x1x1x16x12xbf16>
    %65 = vector.shape_cast %64 : vector<1x1x1x16x12xbf16> to vector<16x12xbf16>
    %c1_81 = arith.constant 1 : index
    %c0_82 = arith.constant 0 : index
    %c0_83 = arith.constant 0 : index
    %66 = vector.load %arg2[%c1_81, %c0_82, %c0_83] : memref<7x12x64xbf16, #tpu.memory_space<vmem>>, vector<1x12x64xbf16>
    %67 = vector.shape_cast %66 : vector<1x12x64xbf16> to vector<12x64xbf16>
    %cst_84 = arith.constant dense<0.000000e+00> : vector<16x64xf32>
    %68 = tpu.matmul %65, %67, %cst_84 {dimension_numbers = #tpu.dot_dimension_numbers<[1], [0], [0], [1], [0, 0, 1, 1], [], []>} : vector<16x12xbf16>, vector<12x64xbf16>, vector<16x64xf32> -> vector<16x64xf32>
    %69 = arith.addf %63, %68 : vector<16x64xf32>
    %c0_85 = arith.constant 0 : index
    %c2_86 = arith.constant 2 : index
    %c0_87 = arith.constant 0 : index
    %c0_88 = arith.constant 0 : index
    %c0_89 = arith.constant 0 : index
    %70 = vector.load %arg1[%c0_85, %c2_86, %c0_87, %c0_88, %c0_89] : memref<1x11x2x16x12xbf16, #tpu.memory_space<vmem>>, vector<1x1x1x16x12xbf16>
    %71 = vector.shape_cast %70 : vector<1x1x1x16x12xbf16> to vector<16x12xbf16>
    %c2_90 = arith.constant 2 : index
    %c0_91 = arith.constant 0 : index
    %c0_92 = arith.constant 0 : index
    %72 = vector.load %arg2[%c2_90, %c0_91, %c0_92] : memref<7x12x64xbf16, #tpu.memory_space<vmem>>, vector<1x12x64xbf16>
    %73 = vector.shape_cast %72 : vector<1x12x64xbf16> to vector<12x64xbf16>
    %cst_93 = arith.constant dense<0.000000e+00> : vector<16x64xf32>
    %74 = tpu.matmul %71, %73, %cst_93 {dimension_numbers = #tpu.dot_dimension_numbers<[1], [0], [0], [1], [0, 0, 1, 1], [], []>} : vector<16x12xbf16>, vector<12x64xbf16>, vector<16x64xf32> -> vector<16x64xf32>
    %75 = arith.addf %69, %74 : vector<16x64xf32>
    %c0_94 = arith.constant 0 : index
    %c2_95 = arith.constant 2 : index
    %c1_96 = arith.constant 1 : index
    %c0_97 = arith.constant 0 : index
    %c0_98 = arith.constant 0 : index
    %76 = vector.load %arg1[%c0_94, %c2_95, %c1_96, %c0_97, %c0_98] : memref<1x11x2x16x12xbf16, #tpu.memory_space<vmem>>, vector<1x1x1x16x12xbf16>
    %77 = vector.shape_cast %76 : vector<1x1x1x16x12xbf16> to vector<16x12xbf16>
    %c3_99 = arith.constant 3 : index
    %c0_100 = arith.constant 0 : index
    %c0_101 = arith.constant 0 : index
    %78 = vector.load %arg2[%c3_99, %c0_100, %c0_101] : memref<7x12x64xbf16, #tpu.memory_space<vmem>>, vector<1x12x64xbf16>
    %79 = vector.shape_cast %78 : vector<1x12x64xbf16> to vector<12x64xbf16>
    %cst_102 = arith.constant dense<0.000000e+00> : vector<16x64xf32>
    %80 = tpu.matmul %77, %79, %cst_102 {dimension_numbers = #tpu.dot_dimension_numbers<[1], [0], [0], [1], [0, 0, 1, 1], [], []>} : vector<16x12xbf16>, vector<12x64xbf16>, vector<16x64xf32> -> vector<16x64xf32>
    %81 = arith.addf %75, %80 : vector<16x64xf32>
    %c0_103 = arith.constant 0 : index
    %c3_104 = arith.constant 3 : index
    %c0_105 = arith.constant 0 : index
    %c0_106 = arith.constant 0 : index
    %c0_107 = arith.constant 0 : index
    %82 = vector.load %arg1[%c0_103, %c3_104, %c0_105, %c0_106, %c0_107] : memref<1x11x2x16x12xbf16, #tpu.memory_space<vmem>>, vector<1x1x1x16x12xbf16>
    %83 = vector.shape_cast %82 : vector<1x1x1x16x12xbf16> to vector<16x12xbf16>
    %c4_108 = arith.constant 4 : index
    %c0_109 = arith.constant 0 : index
    %c0_110 = arith.constant 0 : index
    %84 = vector.load %arg2[%c4_108, %c0_109, %c0_110] : memref<7x12x64xbf16, #tpu.memory_space<vmem>>, vector<1x12x64xbf16>
    %85 = vector.shape_cast %84 : vector<1x12x64xbf16> to vector<12x64xbf16>
    %cst_111 = arith.constant dense<0.000000e+00> : vector<16x64xf32>
    %86 = tpu.matmul %83, %85, %cst_111 {dimension_numbers = #tpu.dot_dimension_numbers<[1], [0], [0], [1], [0, 0, 1, 1], [], []>} : vector<16x12xbf16>, vector<12x64xbf16>, vector<16x64xf32> -> vector<16x64xf32>
    %87 = arith.addf %81, %86 : vector<16x64xf32>
    %c0_112 = arith.constant 0 : index
    %c3_113 = arith.constant 3 : index
    %c1_114 = arith.constant 1 : index
    %c0_115 = arith.constant 0 : index
    %c0_116 = arith.constant 0 : index
    %88 = vector.load %arg1[%c0_112, %c3_113, %c1_114, %c0_115, %c0_116] : memref<1x11x2x16x12xbf16, #tpu.memory_space<vmem>>, vector<1x1x1x16x12xbf16>
    %89 = vector.shape_cast %88 : vector<1x1x1x16x12xbf16> to vector<16x12xbf16>
    %c5_117 = arith.constant 5 : index
    %c0_118 = arith.constant 0 : index
    %c0_119 = arith.constant 0 : index
    %90 = vector.load %arg2[%c5_117, %c0_118, %c0_119] : memref<7x12x64xbf16, #tpu.memory_space<vmem>>, vector<1x12x64xbf16>
    %91 = vector.shape_cast %90 : vector<1x12x64xbf16> to vector<12x64xbf16>
    %cst_120 = arith.constant dense<0.000000e+00> : vector<16x64xf32>
    %92 = tpu.matmul %89, %91, %cst_120 {dimension_numbers = #tpu.dot_dimension_numbers<[1], [0], [0], [1], [0, 0, 1, 1], [], []>} : vector<16x12xbf16>, vector<12x64xbf16>, vector<16x64xf32> -> vector<16x64xf32>
    %93 = arith.addf %87, %92 : vector<16x64xf32>
    %c0_121 = arith.constant 0 : index
    %c4_122 = arith.constant 4 : index
    %c0_123 = arith.constant 0 : index
    %c0_124 = arith.constant 0 : index
    %c0_125 = arith.constant 0 : index
    %94 = vector.load %arg1[%c0_121, %c4_122, %c0_123, %c0_124, %c0_125] : memref<1x11x2x16x12xbf16, #tpu.memory_space<vmem>>, vector<1x1x1x16x12xbf16>
    %95 = vector.shape_cast %94 : vector<1x1x1x16x12xbf16> to vector<16x12xbf16>
    %c6_126 = arith.constant 6 : index
    %c0_127 = arith.constant 0 : index
    %c0_128 = arith.constant 0 : index
    %96 = vector.load %arg2[%c6_126, %c0_127, %c0_128] : memref<7x12x64xbf16, #tpu.memory_space<vmem>>, vector<1x12x64xbf16>
    %97 = vector.shape_cast %96 : vector<1x12x64xbf16> to vector<12x64xbf16>
    %cst_129 = arith.constant dense<0.000000e+00> : vector<16x64xf32>
    %98 = tpu.matmul %95, %97, %cst_129 {dimension_numbers = #tpu.dot_dimension_numbers<[1], [0], [0], [1], [0, 0, 1, 1], [], []>} : vector<16x12xbf16>, vector<12x64xbf16>, vector<16x64xf32> -> vector<16x64xf32>
    %99 = arith.addf %93, %98 : vector<16x64xf32>
    %100 = vector.extract_strided_slice %99 {offsets = [0, 0], sizes = [8, 16], strides = [1, 1]} : vector<16x64xf32> to vector<8x16xf32>
    %101 = vector.extract_strided_slice %99 {offsets = [1, 16], sizes = [8, 16], strides = [1, 1]} : vector<16x64xf32> to vector<8x16xf32>
    %102 = arith.addf %100, %101 : vector<8x16xf32>
    %103 = vector.extract_strided_slice %99 {offsets = [2, 32], sizes = [8, 16], strides = [1, 1]} : vector<16x64xf32> to vector<8x16xf32>
    %104 = arith.addf %102, %103 : vector<8x16xf32>
    %105 = vector.extract_strided_slice %99 {offsets = [3, 48], sizes = [8, 16], strides = [1, 1]} : vector<16x64xf32> to vector<8x16xf32>
    %106 = arith.addf %104, %105 : vector<8x16xf32>
    %107 = vector.broadcast %0 : vector<1x16xf32> to vector<8x16xf32>
    %108 = arith.addf %106, %107 : vector<8x16xf32>
    %cst_130 = arith.constant 0.000000e+00 : f32
    %109 = vector.broadcast %cst_130 : f32 to vector<8x16xf32>
    %110 = arith.maximumf %108, %109 : vector<8x16xf32>
    %111 = arith.truncf %110 : vector<8x16xf32> to vector<8x16xbf16>
    %c0_131 = arith.constant 0 : index
    %c3_132 = arith.constant 3 : index
    %c2_133 = arith.constant 2 : index
    %c0_134 = arith.constant 0 : index
    %112 = vector.load %arg4[%c0_131, %c3_132, %c2_133, %c0_134] : memref<1x12x16x16xbf16, #tpu.memory_space<vmem>>, vector<1x1x8x16xbf16>
    %113 = vector.shape_cast %112 : vector<1x1x8x16xbf16> to vector<8x16xbf16>
    %114 = vector.shape_cast %111 : vector<8x16xbf16> to vector<1x1x8x16xbf16>
    tpu.vector_store %arg4[%c0_131, %c3_132, %c2_133, %c0_134], %114 {strides = array<i32>} : memref<1x12x16x16xbf16, #tpu.memory_space<vmem>>, vector<1x1x8x16xbf16>,
    %c0_135 = arith.constant 0 : index
    %c2_136 = arith.constant 2 : index
    %c0_137 = arith.constant 0 : index
    %c0_138 = arith.constant 0 : index
    %c0_139 = arith.constant 0 : index
    %115 = vector.load %arg1[%c0_135, %c2_136, %c0_137, %c0_138, %c0_139] : memref<1x11x2x16x12xbf16, #tpu.memory_space<vmem>>, vector<1x1x1x16x12xbf16>
    %116 = vector.shape_cast %115 : vector<1x1x1x16x12xbf16> to vector<16x12xbf16>
    %c0_140 = arith.constant 0 : index
    %c0_141 = arith.constant 0 : index
    %c0_142 = arith.constant 0 : index
    %117 = vector.load %arg2[%c0_140, %c0_141, %c0_142] : memref<7x12x64xbf16, #tpu.memory_space<vmem>>, vector<1x12x64xbf16>
    %118 = vector.shape_cast %117 : vector<1x12x64xbf16> to vector<12x64xbf16>
    %cst_143 = arith.constant dense<0.000000e+00> : vector<16x64xf32>
    %119 = tpu.matmul %116, %118, %cst_143 {dimension_numbers = #tpu.dot_dimension_numbers<[1], [0], [0], [1], [0, 0, 1, 1], [], []>} : vector<16x12xbf16>, vector<12x64xbf16>, vector<16x64xf32> -> vector<16x64xf32>
    %c0_144 = arith.constant 0 : index
    %c2_145 = arith.constant 2 : index
    %c1_146 = arith.constant 1 : index
    %c0_147 = arith.constant 0 : index
    %c0_148 = arith.constant 0 : index
    %120 = vector.load %arg1[%c0_144, %c2_145, %c1_146, %c0_147, %c0_148] : memref<1x11x2x16x12xbf16, #tpu.memory_space<vmem>>, vector<1x1x1x16x12xbf16>
    %121 = vector.shape_cast %120 : vector<1x1x1x16x12xbf16> to vector<16x12xbf16>
    %c1_149 = arith.constant 1 : index
    %c0_150 = arith.constant 0 : index
    %c0_151 = arith.constant 0 : index
    %122 = vector.load %arg2[%c1_149, %c0_150, %c0_151] : memref<7x12x64xbf16, #tpu.memory_space<vmem>>, vector<1x12x64xbf16>
    %123 = vector.shape_cast %122 : vector<1x12x64xbf16> to vector<12x64xbf16>
    %cst_152 = arith.constant dense<0.000000e+00> : vector<16x64xf32>
    %124 = tpu.matmul %121, %123, %cst_152 {dimension_numbers = #tpu.dot_dimension_numbers<[1], [0], [0], [1], [0, 0, 1, 1], [], []>} : vector<16x12xbf16>, vector<12x64xbf16>, vector<16x64xf32> -> vector<16x64xf32>
    %125 = arith.addf %119, %124 : vector<16x64xf32>
    %c0_153 = arith.constant 0 : index
    %c3_154 = arith.constant 3 : index
    %c0_155 = arith.constant 0 : index
    %c0_156 = arith.constant 0 : index
    %c0_157 = arith.constant 0 : index
    %126 = vector.load %arg1[%c0_153, %c3_154, %c0_155, %c0_156, %c0_157] : memref<1x11x2x16x12xbf16, #tpu.memory_space<vmem>>, vector<1x1x1x16x12xbf16>
    %127 = vector.shape_cast %126 : vector<1x1x1x16x12xbf16> to vector<16x12xbf16>
    %c2_158 = arith.constant 2 : index
    %c0_159 = arith.constant 0 : index
    %c0_160 = arith.constant 0 : index
    %128 = vector.load %arg2[%c2_158, %c0_159, %c0_160] : memref<7x12x64xbf16, #tpu.memory_space<vmem>>, vector<1x12x64xbf16>
    %129 = vector.shape_cast %128 : vector<1x12x64xbf16> to vector<12x64xbf16>
    %cst_161 = arith.constant dense<0.000000e+00> : vector<16x64xf32>
    %130 = tpu.matmul %127, %129, %cst_161 {dimension_numbers = #tpu.dot_dimension_numbers<[1], [0], [0], [1], [0, 0, 1, 1], [], []>} : vector<16x12xbf16>, vector<12x64xbf16>, vector<16x64xf32> -> vector<16x64xf32>
    %131 = arith.addf %125, %130 : vector<16x64xf32>
    %c0_162 = arith.constant 0 : index
    %c3_163 = arith.constant 3 : index
    %c1_164 = arith.constant 1 : index
    %c0_165 = arith.constant 0 : index
    %c0_166 = arith.constant 0 : index
    %132 = vector.load %arg1[%c0_162, %c3_163, %c1_164, %c0_165, %c0_166] : memref<1x11x2x16x12xbf16, #tpu.memory_space<vmem>>, vector<1x1x1x16x12xbf16>
    %133 = vector.shape_cast %132 : vector<1x1x1x16x12xbf16> to vector<16x12xbf16>
    %c3_167 = arith.constant 3 : index
    %c0_168 = arith.constant 0 : index
    %c0_169 = arith.constant 0 : index
    %134 = vector.load %arg2[%c3_167, %c0_168, %c0_169] : memref<7x12x64xbf16, #tpu.memory_space<vmem>>, vector<1x12x64xbf16>
    %135 = vector.shape_cast %134 : vector<1x12x64xbf16> to vector<12x64xbf16>
    %cst_170 = arith.constant dense<0.000000e+00> : vector<16x64xf32>
    %136 = tpu.matmul %133, %135, %cst_170 {dimension_numbers = #tpu.dot_dimension_numbers<[1], [0], [0], [1], [0, 0, 1, 1], [], []>} : vector<16x12xbf16>, vector<12x64xbf16>, vector<16x64xf32> -> vector<16x64xf32>
    %137 = arith.addf %131, %136 : vector<16x64xf32>
    %c0_171 = arith.constant 0 : index
    %c4_172 = arith.constant 4 : index
    %c0_173 = arith.constant 0 : index
    %c0_174 = arith.constant 0 : index
    %c0_175 = arith.constant 0 : index
    %138 = vector.load %arg1[%c0_171, %c4_172, %c0_173, %c0_174, %c0_175] : memref<1x11x2x16x12xbf16, #tpu.memory_space<vmem>>, vector<1x1x1x16x12xbf16>
    %139 = vector.shape_cast %138 : vector<1x1x1x16x12xbf16> to vector<16x12xbf16>
    %c4_176 = arith.constant 4 : index
    %c0_177 = arith.constant 0 : index
    %c0_178 = arith.constant 0 : index
    %140 = vector.load %arg2[%c4_176, %c0_177, %c0_178] : memref<7x12x64xbf16, #tpu.memory_space<vmem>>, vector<1x12x64xbf16>
    %141 = vector.shape_cast %140 : vector<1x12x64xbf16> to vector<12x64xbf16>
    %cst_179 = arith.constant dense<0.000000e+00> : vector<16x64xf32>
    %142 = tpu.matmul %139, %141, %cst_179 {dimension_numbers = #tpu.dot_dimension_numbers<[1], [0], [0], [1], [0, 0, 1, 1], [], []>} : vector<16x12xbf16>, vector<12x64xbf16>, vector<16x64xf32> -> vector<16x64xf32>
    %143 = arith.addf %137, %142 : vector<16x64xf32>
    %c0_180 = arith.constant 0 : index
    %c4_181 = arith.constant 4 : index
    %c1_182 = arith.constant 1 : index
    %c0_183 = arith.constant 0 : index
    %c0_184 = arith.constant 0 : index
    %144 = vector.load %arg1[%c0_180, %c4_181, %c1_182, %c0_183, %c0_184] : memref<1x11x2x16x12xbf16, #tpu.memory_space<vmem>>, vector<1x1x1x16x12xbf16>
    %145 = vector.shape_cast %144 : vector<1x1x1x16x12xbf16> to vector<16x12xbf16>
    %c5_185 = arith.constant 5 : index
    %c0_186 = arith.constant 0 : index
    %c0_187 = arith.constant 0 : index
    %146 = vector.load %arg2[%c5_185, %c0_186, %c0_187] : memref<7x12x64xbf16, #tpu.memory_space<vmem>>, vector<1x12x64xbf16>
    %147 = vector.shape_cast %146 : vector<1x12x64xbf16> to vector<12x64xbf16>
    %cst_188 = arith.constant dense<0.000000e+00> : vector<16x64xf32>
    %148 = tpu.matmul %145, %147, %cst_188 {dimension_numbers = #tpu.dot_dimension_numbers<[1], [0], [0], [1], [0, 0, 1, 1], [], []>} : vector<16x12xbf16>, vector<12x64xbf16>, vector<16x64xf32> -> vector<16x64xf32>
    %149 = arith.addf %143, %148 : vector<16x64xf32>
    %c0_189 = arith.constant 0 : index
    %c5_190 = arith.constant 5 : index
    %c0_191 = arith.constant 0 : index
    %c0_192 = arith.constant 0 : index
    %c0_193 = arith.constant 0 : index
    %150 = vector.load %arg1[%c0_189, %c5_190, %c0_191, %c0_192, %c0_193] : memref<1x11x2x16x12xbf16, #tpu.memory_space<vmem>>, vector<1x1x1x16x12xbf16>
    %151 = vector.shape_cast %150 : vector<1x1x1x16x12xbf16> to vector<16x12xbf16>
    %c6_194 = arith.constant 6 : index
    %c0_195 = arith.constant 0 : index
    %c0_196 = arith.constant 0 : index
    %152 = vector.load %arg2[%c6_194, %c0_195, %c0_196] : memref<7x12x64xbf16, #tpu.memory_space<vmem>>, vector<1x12x64xbf16>
    %153 = vector.shape_cast %152 : vector<1x12x64xbf16> to vector<12x64xbf16>
    %cst_197 = arith.constant dense<0.000000e+00> : vector<16x64xf32>
    %154 = tpu.matmul %151, %153, %cst_197 {dimension_numbers = #tpu.dot_dimension_numbers<[1], [0], [0], [1], [0, 0, 1, 1], [], []>} : vector<16x12xbf16>, vector<12x64xbf16>, vector<16x64xf32> -> vector<16x64xf32>
    %155 = arith.addf %149, %154 : vector<16x64xf32>
    %156 = vector.extract_strided_slice %155 {offsets = [0, 0], sizes = [8, 16], strides = [1, 1]} : vector<16x64xf32> to vector<8x16xf32>
    %157 = vector.extract_strided_slice %155 {offsets = [1, 16], sizes = [8, 16], strides = [1, 1]} : vector<16x64xf32> to vector<8x16xf32>
    %158 = arith.addf %156, %157 : vector<8x16xf32>
    %159 = vector.extract_strided_slice %155 {offsets = [2, 32], sizes = [8, 16], strides = [1, 1]} : vector<16x64xf32> to vector<8x16xf32>
    %160 = arith.addf %158, %159 : vector<8x16xf32>
    %161 = vector.extract_strided_slice %155 {offsets = [3, 48], sizes = [8, 16], strides = [1, 1]} : vector<16x64xf32> to vector<8x16xf32>
    %162 = arith.addf %160, %161 : vector<8x16xf32>
    %163 = vector.broadcast %0 : vector<1x16xf32> to vector<8x16xf32>
    %164 = arith.addf %162, %163 : vector<8x16xf32>
    %cst_198 = arith.constant 0.000000e+00 : f32
    %165 = vector.broadcast %cst_198 : f32 to vector<8x16xf32>
    %166 = arith.maximumf %164, %165 : vector<8x16xf32>
    %167 = arith.truncf %166 : vector<8x16xf32> to vector<8x16xbf16>
    %c0_199 = arith.constant 0 : index
    %c4_200 = arith.constant 4 : index
    %c2_201 = arith.constant 2 : index
    %c0_202 = arith.constant 0 : index
    %168 = vector.load %arg4[%c0_199, %c4_200, %c2_201, %c0_202] : memref<1x12x16x16xbf16, #tpu.memory_space<vmem>>, vector<1x1x8x16xbf16>
    %169 = vector.shape_cast %168 : vector<1x1x8x16xbf16> to vector<8x16xbf16>
    %170 = vector.shape_cast %167 : vector<8x16xbf16> to vector<1x1x8x16xbf16>
    tpu.vector_store %arg4[%c0_199, %c4_200, %c2_201, %c0_202], %170 {strides = array<i32>} : memref<1x12x16x16xbf16, #tpu.memory_space<vmem>>, vector<1x1x8x16xbf16>,
    %c0_203 = arith.constant 0 : index
    %c3_204 = arith.constant 3 : index
    %c0_205 = arith.constant 0 : index
    %c0_206 = arith.constant 0 : index
    %c0_207 = arith.constant 0 : index
    %171 = vector.load %arg1[%c0_203, %c3_204, %c0_205, %c0_206, %c0_207] : memref<1x11x2x16x12xbf16, #tpu.memory_space<vmem>>, vector<1x1x1x16x12xbf16>
    %172 = vector.shape_cast %171 : vector<1x1x1x16x12xbf16> to vector<16x12xbf16>
    %c0_208 = arith.constant 0 : index
    %c0_209 = arith.constant 0 : index
    %c0_210 = arith.constant 0 : index
    %173 = vector.load %arg2[%c0_208, %c0_209, %c0_210] : memref<7x12x64xbf16, #tpu.memory_space<vmem>>, vector<1x12x64xbf16>
    %174 = vector.shape_cast %173 : vector<1x12x64xbf16> to vector<12x64xbf16>
    %cst_211 = arith.constant dense<0.000000e+00> : vector<16x64xf32>
    %175 = tpu.matmul %172, %174, %cst_211 {dimension_numbers = #tpu.dot_dimension_numbers<[1], [0], [0], [1], [0, 0, 1, 1], [], []>} : vector<16x12xbf16>, vector<12x64xbf16>, vector<16x64xf32> -> vector<16x64xf32>
    %c0_212 = arith.constant 0 : index
    %c3_213 = arith.constant 3 : index
    %c1_214 = arith.constant 1 : index
    %c0_215 = arith.constant 0 : index
    %c0_216 = arith.constant 0 : index
    %176 = vector.load %arg1[%c0_212, %c3_213, %c1_214, %c0_215, %c0_216] : memref<1x11x2x16x12xbf16, #tpu.memory_space<vmem>>, vector<1x1x1x16x12xbf16>
    %177 = vector.shape_cast %176 : vector<1x1x1x16x12xbf16> to vector<16x12xbf16>
    %c1_217 = arith.constant 1 : index
    %c0_218 = arith.constant 0 : index
    %c0_219 = arith.constant 0 : index
    %178 = vector.load %arg2[%c1_217, %c0_218, %c0_219] : memref<7x12x64xbf16, #tpu.memory_space<vmem>>, vector<1x12x64xbf16>
    %179 = vector.shape_cast %178 : vector<1x12x64xbf16> to vector<12x64xbf16>
    %cst_220 = arith.constant dense<0.000000e+00> : vector<16x64xf32>
    %180 = tpu.matmul %177, %179, %cst_220 {dimension_numbers = #tpu.dot_dimension_numbers<[1], [0], [0], [1], [0, 0, 1, 1], [], []>} : vector<16x12xbf16>, vector<12x64xbf16>, vector<16x64xf32> -> vector<16x64xf32>
    %181 = arith.addf %175, %180 : vector<16x64xf32>
    %c0_221 = arith.constant 0 : index
    %c4_222 = arith.constant 4 : index
    %c0_223 = arith.constant 0 : index
    %c0_224 = arith.constant 0 : index
    %c0_225 = arith.constant 0 : index
    %182 = vector.load %arg1[%c0_221, %c4_222, %c0_223, %c0_224, %c0_225] : memref<1x11x2x16x12xbf16, #tpu.memory_space<vmem>>, vector<1x1x1x16x12xbf16>
    %183 = vector.shape_cast %182 : vector<1x1x1x16x12xbf16> to vector<16x12xbf16>
    %c2_226 = arith.constant 2 : index
    %c0_227 = arith.constant 0 : index
    %c0_228 = arith.constant 0 : index
    %184 = vector.load %arg2[%c2_226, %c0_227, %c0_228] : memref<7x12x64xbf16, #tpu.memory_space<vmem>>, vector<1x12x64xbf16>
    %185 = vector.shape_cast %184 : vector<1x12x64xbf16> to vector<12x64xbf16>
    %cst_229 = arith.constant dense<0.000000e+00> : vector<16x64xf32>
    %186 = tpu.matmul %183, %185, %cst_229 {dimension_numbers = #tpu.dot_dimension_numbers<[1], [0], [0], [1], [0, 0, 1, 1], [], []>} : vector<16x12xbf16>, vector<12x64xbf16>, vector<16x64xf32> -> vector<16x64xf32>
    %187 = arith.addf %181, %186 : vector<16x64xf32>
    %c0_230 = arith.constant 0 : index
    %c4_231 = arith.constant 4 : index
    %c1_232 = arith.constant 1 : index
    %c0_233 = arith.constant 0 : index
    %c0_234 = arith.constant 0 : index
    %188 = vector.load %arg1[%c0_230, %c4_231, %c1_232, %c0_233, %c0_234] : memref<1x11x2x16x12xbf16, #tpu.memory_space<vmem>>, vector<1x1x1x16x12xbf16>
    %189 = vector.shape_cast %188 : vector<1x1x1x16x12xbf16> to vector<16x12xbf16>
    %c3_235 = arith.constant 3 : index
    %c0_236 = arith.constant 0 : index
    %c0_237 = arith.constant 0 : index
    %190 = vector.load %arg2[%c3_235, %c0_236, %c0_237] : memref<7x12x64xbf16, #tpu.memory_space<vmem>>, vector<1x12x64xbf16>
    %191 = vector.shape_cast %190 : vector<1x12x64xbf16> to vector<12x64xbf16>
    %cst_238 = arith.constant dense<0.000000e+00> : vector<16x64xf32>
    %192 = tpu.matmul %189, %191, %cst_238 {dimension_numbers = #tpu.dot_dimension_numbers<[1], [0], [0], [1], [0, 0, 1, 1], [], []>} : vector<16x12xbf16>, vector<12x64xbf16>, vector<16x64xf32> -> vector<16x64xf32>
    %193 = arith.addf %187, %192 : vector<16x64xf32>
    %c0_239 = arith.constant 0 : index
    %c5_240 = arith.constant 5 : index
    %c0_241 = arith.constant 0 : index
    %c0_242 = arith.constant 0 : index
    %c0_243 = arith.constant 0 : index
    %194 = vector.load %arg1[%c0_239, %c5_240, %c0_241, %c0_242, %c0_243] : memref<1x11x2x16x12xbf16, #tpu.memory_space<vmem>>, vector<1x1x1x16x12xbf16>
    %195 = vector.shape_cast %194 : vector<1x1x1x16x12xbf16> to vector<16x12xbf16>
    %c4_244 = arith.constant 4 : index
    %c0_245 = arith.constant 0 : index
    %c0_246 = arith.constant 0 : index
    %196 = vector.load %arg2[%c4_244, %c0_245, %c0_246] : memref<7x12x64xbf16, #tpu.memory_space<vmem>>, vector<1x12x64xbf16>
    %197 = vector.shape_cast %196 : vector<1x12x64xbf16> to vector<12x64xbf16>
    %cst_247 = arith.constant dense<0.000000e+00> : vector<16x64xf32>
    %198 = tpu.matmul %195, %197, %cst_247 {dimension_numbers = #tpu.dot_dimension_numbers<[1], [0], [0], [1], [0, 0, 1, 1], [], []>} : vector<16x12xbf16>, vector<12x64xbf16>, vector<16x64xf32> -> vector<16x64xf32>
    %199 = arith.addf %193, %198 : vector<16x64xf32>
    %c0_248 = arith.constant 0 : index
    %c5_249 = arith.constant 5 : index
    %c1_250 = arith.constant 1 : index
    %c0_251 = arith.constant 0 : index
    %c0_252 = arith.constant 0 : index
    %200 = vector.load %arg1[%c0_248, %c5_249, %c1_250, %c0_251, %c0_252] : memref<1x11x2x16x12xbf16, #tpu.memory_space<vmem>>, vector<1x1x1x16x12xbf16>
    %201 = vector.shape_cast %200 : vector<1x1x1x16x12xbf16> to vector<16x12xbf16>
    %c5_253 = arith.constant 5 : index
    %c0_254 = arith.constant 0 : index
    %c0_255 = arith.constant 0 : index
    %202 = vector.load %arg2[%c5_253, %c0_254, %c0_255] : memref<7x12x64xbf16, #tpu.memory_space<vmem>>, vector<1x12x64xbf16>
    %203 = vector.shape_cast %202 : vector<1x12x64xbf16> to vector<12x64xbf16>
    %cst_256 = arith.constant dense<0.000000e+00> : vector<16x64xf32>
    %204 = tpu.matmul %201, %203, %cst_256 {dimension_numbers = #tpu.dot_dimension_numbers<[1], [0], [0], [1], [0, 0, 1, 1], [], []>} : vector<16x12xbf16>, vector<12x64xbf16>, vector<16x64xf32> -> vector<16x64xf32>
    %205 = arith.addf %199, %204 : vector<16x64xf32>
    %c0_257 = arith.constant 0 : index
    %c6_258 = arith.constant 6 : index
    %c0_259 = arith.constant 0 : index
    %c0_260 = arith.constant 0 : index
    %c0_261 = arith.constant 0 : index
    %206 = vector.load %arg1[%c0_257, %c6_258, %c0_259, %c0_260, %c0_261] : memref<1x11x2x16x12xbf16, #tpu.memory_space<vmem>>, vector<1x1x1x16x12xbf16>
    %207 = vector.shape_cast %206 : vector<1x1x1x16x12xbf16> to vector<16x12xbf16>
    %c6_262 = arith.constant 6 : index
    %c0_263 = arith.constant 0 : index
    %c0_264 = arith.constant 0 : index
    %208 = vector.load %arg2[%c6_262, %c0_263, %c0_264] : memref<7x12x64xbf16, #tpu.memory_space<vmem>>, vector<1x12x64xbf16>
    %209 = vector.shape_cast %208 : vector<1x12x64xbf16> to vector<12x64xbf16>
    %cst_265 = arith.constant dense<0.000000e+00> : vector<16x64xf32>
    %210 = tpu.matmul %207, %209, %cst_265 {dimension_numbers = #tpu.dot_dimension_numbers<[1], [0], [0], [1], [0, 0, 1, 1], [], []>} : vector<16x12xbf16>, vector<12x64xbf16>, vector<16x64xf32> -> vector<16x64xf32>
    %211 = arith.addf %205, %210 : vector<16x64xf32>
    %212 = vector.extract_strided_slice %211 {offsets = [0, 0], sizes = [8, 16], strides = [1, 1]} : vector<16x64xf32> to vector<8x16xf32>
    %213 = vector.extract_strided_slice %211 {offsets = [1, 16], sizes = [8, 16], strides = [1, 1]} : vector<16x64xf32> to vector<8x16xf32>
    %214 = arith.addf %212, %213 : vector<8x16xf32>
    %215 = vector.extract_strided_slice %211 {offsets = [2, 32], sizes = [8, 16], strides = [1, 1]} : vector<16x64xf32> to vector<8x16xf32>
    %216 = arith.addf %214, %215 : vector<8x16xf32>
    %217 = vector.extract_strided_slice %211 {offsets = [3, 48], sizes = [8, 16], strides = [1, 1]} : vector<16x64xf32> to vector<8x16xf32>
    %218 = arith.addf %216, %217 : vector<8x16xf32>
    %219 = vector.broadcast %0 : vector<1x16xf32> to vector<8x16xf32>
    %220 = arith.addf %218, %219 : vector<8x16xf32>
    %cst_266 = arith.constant 0.000000e+00 : f32
    %221 = vector.broadcast %cst_266 : f32 to vector<8x16xf32>
    %222 = arith.maximumf %220, %221 : vector<8x16xf32>
    %223 = arith.truncf %222 : vector<8x16xf32> to vector<8x16xbf16>
    %c0_267 = arith.constant 0 : index
    %c5_268 = arith.constant 5 : index
    %c2_269 = arith.constant 2 : index
    %c0_270 = arith.constant 0 : index
    %224 = vector.load %arg4[%c0_267, %c5_268, %c2_269, %c0_270] : memref<1x12x16x16xbf16, #tpu.memory_space<vmem>>, vector<1x1x8x16xbf16>
    %225 = vector.shape_cast %224 : vector<1x1x8x16xbf16> to vector<8x16xbf16>
    %226 = vector.shape_cast %223 : vector<8x16xbf16> to vector<1x1x8x16xbf16>
    tpu.vector_store %arg4[%c0_267, %c5_268, %c2_269, %c0_270], %226 {strides = array<i32>} : memref<1x12x16x16xbf16, #tpu.memory_space<vmem>>, vector<1x1x8x16xbf16>,
    %c0_271 = arith.constant 0 : index
    %c4_272 = arith.constant 4 : index
    %c0_273 = arith.constant 0 : index
    %c0_274 = arith.constant 0 : index
    %c0_275 = arith.constant 0 : index
    %227 = vector.load %arg1[%c0_271, %c4_272, %c0_273, %c0_274, %c0_275] : memref<1x11x2x16x12xbf16, #tpu.memory_space<vmem>>, vector<1x1x1x16x12xbf16>
    %228 = vector.shape_cast %227 : vector<1x1x1x16x12xbf16> to vector<16x12xbf16>
    %c0_276 = arith.constant 0 : index
    %c0_277 = arith.constant 0 : index
    %c0_278 = arith.constant 0 : index
    %229 = vector.load %arg2[%c0_276, %c0_277, %c0_278] : memref<7x12x64xbf16, #tpu.memory_space<vmem>>, vector<1x12x64xbf16>
    %230 = vector.shape_cast %229 : vector<1x12x64xbf16> to vector<12x64xbf16>
    %cst_279 = arith.constant dense<0.000000e+00> : vector<16x64xf32>
    %231 = tpu.matmul %228, %230, %cst_279 {dimension_numbers = #tpu.dot_dimension_numbers<[1], [0], [0], [1], [0, 0, 1, 1], [], []>} : vector<16x12xbf16>, vector<12x64xbf16>, vector<16x64xf32> -> vector<16x64xf32>
    %c0_280 = arith.constant 0 : index
    %c4_281 = arith.constant 4 : index
    %c1_282 = arith.constant 1 : index
    %c0_283 = arith.constant 0 : index
    %c0_284 = arith.constant 0 : index
    %232 = vector.load %arg1[%c0_280, %c4_281, %c1_282, %c0_283, %c0_284] : memref<1x11x2x16x12xbf16, #tpu.memory_space<vmem>>, vector<1x1x1x16x12xbf16>
    %233 = vector.shape_cast %232 : vector<1x1x1x16x12xbf16> to vector<16x12xbf16>
    %c1_285 = arith.constant 1 : index
    %c0_286 = arith.constant 0 : index
    %c0_287 = arith.constant 0 : index
    %234 = vector.load %arg2[%c1_285, %c0_286, %c0_287] : memref<7x12x64xbf16, #tpu.memory_space<vmem>>, vector<1x12x64xbf16>
    %235 = vector.shape_cast %234 : vector<1x12x64xbf16> to vector<12x64xbf16>
    %cst_288 = arith.constant dense<0.000000e+00> : vector<16x64xf32>
    %236 = tpu.matmul %233, %235, %cst_288 {dimension_numbers = #tpu.dot_dimension_numbers<[1], [0], [0], [1], [0, 0, 1, 1], [], []>} : vector<16x12xbf16>, vector<12x64xbf16>, vector<16x64xf32> -> vector<16x64xf32>
    %237 = arith.addf %231, %236 : vector<16x64xf32>
    %c0_289 = arith.constant 0 : index
    %c5_290 = arith.constant 5 : index
    %c0_291 = arith.constant 0 : index
    %c0_292 = arith.constant 0 : index
    %c0_293 = arith.constant 0 : index
    %238 = vector.load %arg1[%c0_289, %c5_290, %c0_291, %c0_292, %c0_293] : memref<1x11x2x16x12xbf16, #tpu.memory_space<vmem>>, vector<1x1x1x16x12xbf16>
    %239 = vector.shape_cast %238 : vector<1x1x1x16x12xbf16> to vector<16x12xbf16>
    %c2_294 = arith.constant 2 : index
    %c0_295 = arith.constant 0 : index
    %c0_296 = arith.constant 0 : index
    %240 = vector.load %arg2[%c2_294, %c0_295, %c0_296] : memref<7x12x64xbf16, #tpu.memory_space<vmem>>, vector<1x12x64xbf16>
    %241 = vector.shape_cast %240 : vector<1x12x64xbf16> to vector<12x64xbf16>
    %cst_297 = arith.constant dense<0.000000e+00> : vector<16x64xf32>
    %242 = tpu.matmul %239, %241, %cst_297 {dimension_numbers = #tpu.dot_dimension_numbers<[1], [0], [0], [1], [0, 0, 1, 1], [], []>} : vector<16x12xbf16>, vector<12x64xbf16>, vector<16x64xf32> -> vector<16x64xf32>
    %243 = arith.addf %237, %242 : vector<16x64xf32>
    %c0_298 = arith.constant 0 : index
    %c5_299 = arith.constant 5 : index
    %c1_300 = arith.constant 1 : index
    %c0_301 = arith.constant 0 : index
    %c0_302 = arith.constant 0 : index
    %244 = vector.load %arg1[%c0_298, %c5_299, %c1_300, %c0_301, %c0_302] : memref<1x11x2x16x12xbf16, #tpu.memory_space<vmem>>, vector<1x1x1x16x12xbf16>
    %245 = vector.shape_cast %244 : vector<1x1x1x16x12xbf16> to vector<16x12xbf16>
    %c3_303 = arith.constant 3 : index
    %c0_304 = arith.constant 0 : index
    %c0_305 = arith.constant 0 : index
    %246 = vector.load %arg2[%c3_303, %c0_304, %c0_305] : memref<7x12x64xbf16, #tpu.memory_space<vmem>>, vector<1x12x64xbf16>
    %247 = vector.shape_cast %246 : vector<1x12x64xbf16> to vector<12x64xbf16>
    %cst_306 = arith.constant dense<0.000000e+00> : vector<16x64xf32>
    %248 = tpu.matmul %245, %247, %cst_306 {dimension_numbers = #tpu.dot_dimension_numbers<[1], [0], [0], [1], [0, 0, 1, 1], [], []>} : vector<16x12xbf16>, vector<12x64xbf16>, vector<16x64xf32> -> vector<16x64xf32>
    %249 = arith.addf %243, %248 : vector<16x64xf32>
    %c0_307 = arith.constant 0 : index
    %c6_308 = arith.constant 6 : index
    %c0_309 = arith.constant 0 : index
    %c0_310 = arith.constant 0 : index
    %c0_311 = arith.constant 0 : index
    %250 = vector.load %arg1[%c0_307, %c6_308, %c0_309, %c0_310, %c0_311] : memref<1x11x2x16x12xbf16, #tpu.memory_space<vmem>>, vector<1x1x1x16x12xbf16>
    %251 = vector.shape_cast %250 : vector<1x1x1x16x12xbf16> to vector<16x12xbf16>
    %c4_312 = arith.constant 4 : index
    %c0_313 = arith.constant 0 : index
    %c0_314 = arith.constant 0 : index
    %252 = vector.load %arg2[%c4_312, %c0_313, %c0_314] : memref<7x12x64xbf16, #tpu.memory_space<vmem>>, vector<1x12x64xbf16>
    %253 = vector.shape_cast %252 : vector<1x12x64xbf16> to vector<12x64xbf16>
    %cst_315 = arith.constant dense<0.000000e+00> : vector<16x64xf32>
    %254 = tpu.matmul %251, %253, %cst_315 {dimension_numbers = #tpu.dot_dimension_numbers<[1], [0], [0], [1], [0, 0, 1, 1], [], []>} : vector<16x12xbf16>, vector<12x64xbf16>, vector<16x64xf32> -> vector<16x64xf32>
    %255 = arith.addf %249, %254 : vector<16x64xf32>
    %c0_316 = arith.constant 0 : index
    %c6_317 = arith.constant 6 : index
    %c1_318 = arith.constant 1 : index
    %c0_319 = arith.constant 0 : index
    %c0_320 = arith.constant 0 : index
    %256 = vector.load %arg1[%c0_316, %c6_317, %c1_318, %c0_319, %c0_320] : memref<1x11x2x16x12xbf16, #tpu.memory_space<vmem>>, vector<1x1x1x16x12xbf16>
    %257 = vector.shape_cast %256 : vector<1x1x1x16x12xbf16> to vector<16x12xbf16>
    %c5_321 = arith.constant 5 : index
    %c0_322 = arith.constant 0 : index
    %c0_323 = arith.constant 0 : index
    %258 = vector.load %arg2[%c5_321, %c0_322, %c0_323] : memref<7x12x64xbf16, #tpu.memory_space<vmem>>, vector<1x12x64xbf16>
    %259 = vector.shape_cast %258 : vector<1x12x64xbf16> to vector<12x64xbf16>
    %cst_324 = arith.constant dense<0.000000e+00> : vector<16x64xf32>
    %260 = tpu.matmul %257, %259, %cst_324 {dimension_numbers = #tpu.dot_dimension_numbers<[1], [0], [0], [1], [0, 0, 1, 1], [], []>} : vector<16x12xbf16>, vector<12x64xbf16>, vector<16x64xf32> -> vector<16x64xf32>
    %261 = arith.addf %255, %260 : vector<16x64xf32>
    %c0_325 = arith.constant 0 : index
    %c7 = arith.constant 7 : index
    %c0_326 = arith.constant 0 : index
    %c0_327 = arith.constant 0 : index
    %c0_328 = arith.constant 0 : index
    %262 = vector.load %arg1[%c0_325, %c7, %c0_326, %c0_327, %c0_328] : memref<1x11x2x16x12xbf16, #tpu.memory_space<vmem>>, vector<1x1x1x16x12xbf16>
    %263 = vector.shape_cast %262 : vector<1x1x1x16x12xbf16> to vector<16x12xbf16>
    %c6_329 = arith.constant 6 : index
    %c0_330 = arith.constant 0 : index
    %c0_331 = arith.constant 0 : index
    %264 = vector.load %arg2[%c6_329, %c0_330, %c0_331] : memref<7x12x64xbf16, #tpu.memory_space<vmem>>, vector<1x12x64xbf16>
    %265 = vector.shape_cast %264 : vector<1x12x64xbf16> to vector<12x64xbf16>
    %cst_332 = arith.constant dense<0.000000e+00> : vector<16x64xf32>
    %266 = tpu.matmul %263, %265, %cst_332 {dimension_numbers = #tpu.dot_dimension_numbers<[1], [0], [0], [1], [0, 0, 1, 1], [], []>} : vector<16x12xbf16>, vector<12x64xbf16>, vector<16x64xf32> -> vector<16x64xf32>
    %267 = arith.addf %261, %266 : vector<16x64xf32>
    %268 = vector.extract_strided_slice %267 {offsets = [0, 0], sizes = [8, 16], strides = [1, 1]} : vector<16x64xf32> to vector<8x16xf32>
    %269 = vector.extract_strided_slice %267 {offsets = [1, 16], sizes = [8, 16], strides = [1, 1]} : vector<16x64xf32> to vector<8x16xf32>
    %270 = arith.addf %268, %269 : vector<8x16xf32>
    %271 = vector.extract_strided_slice %267 {offsets = [2, 32], sizes = [8, 16], strides = [1, 1]} : vector<16x64xf32> to vector<8x16xf32>
    %272 = arith.addf %270, %271 : vector<8x16xf32>
    %273 = vector.extract_strided_slice %267 {offsets = [3, 48], sizes = [8, 16], strides = [1, 1]} : vector<16x64xf32> to vector<8x16xf32>
    %274 = arith.addf %272, %273 : vector<8x16xf32>
    %275 = vector.broadcast %0 : vector<1x16xf32> to vector<8x16xf32>
    %276 = arith.addf %274, %275 : vector<8x16xf32>
    %cst_333 = arith.constant 0.000000e+00 : f32
    %277 = vector.broadcast %cst_333 : f32 to vector<8x16xf32>
    %278 = arith.maximumf %276, %277 : vector<8x16xf32>
    %279 = arith.truncf %278 : vector<8x16xf32> to vector<8x16xbf16>
    %c0_334 = arith.constant 0 : index
    %c6_335 = arith.constant 6 : index
    %c2_336 = arith.constant 2 : index
    %c0_337 = arith.constant 0 : index
    %280 = vector.load %arg4[%c0_334, %c6_335, %c2_336, %c0_337] : memref<1x12x16x16xbf16, #tpu.memory_space<vmem>>, vector<1x1x8x16xbf16>
    %281 = vector.shape_cast %280 : vector<1x1x8x16xbf16> to vector<8x16xbf16>
    %282 = vector.shape_cast %279 : vector<8x16xbf16> to vector<1x1x8x16xbf16>
    tpu.vector_store %arg4[%c0_334, %c6_335, %c2_336, %c0_337], %282 {strides = array<i32>} : memref<1x12x16x16xbf16, #tpu.memory_space<vmem>>, vector<1x1x8x16xbf16>,
    %c0_338 = arith.constant 0 : index
    %c5_339 = arith.constant 5 : index
    %c0_340 = arith.constant 0 : index
    %c0_341 = arith.constant 0 : index
    %c0_342 = arith.constant 0 : index
    %283 = vector.load %arg1[%c0_338, %c5_339, %c0_340, %c0_341, %c0_342] : memref<1x11x2x16x12xbf16, #tpu.memory_space<vmem>>, vector<1x1x1x16x12xbf16>
    %284 = vector.shape_cast %283 : vector<1x1x1x16x12xbf16> to vector<16x12xbf16>
    %c0_343 = arith.constant 0 : index
    %c0_344 = arith.constant 0 : index
    %c0_345 = arith.constant 0 : index
    %285 = vector.load %arg2[%c0_343, %c0_344, %c0_345] : memref<7x12x64xbf16, #tpu.memory_space<vmem>>, vector<1x12x64xbf16>
    %286 = vector.shape_cast %285 : vector<1x12x64xbf16> to vector<12x64xbf16>
    %cst_346 = arith.constant dense<0.000000e+00> : vector<16x64xf32>
    %287 = tpu.matmul %284, %286, %cst_346 {dimension_numbers = #tpu.dot_dimension_numbers<[1], [0], [0], [1], [0, 0, 1, 1], [], []>} : vector<16x12xbf16>, vector<12x64xbf16>, vector<16x64xf32> -> vector<16x64xf32>
    %c0_347 = arith.constant 0 : index
    %c5_348 = arith.constant 5 : index
    %c1_349 = arith.constant 1 : index
    %c0_350 = arith.constant 0 : index
    %c0_351 = arith.constant 0 : index
    %288 = vector.load %arg1[%c0_347, %c5_348, %c1_349, %c0_350, %c0_351] : memref<1x11x2x16x12xbf16, #tpu.memory_space<vmem>>, vector<1x1x1x16x12xbf16>
    %289 = vector.shape_cast %288 : vector<1x1x1x16x12xbf16> to vector<16x12xbf16>
    %c1_352 = arith.constant 1 : index
    %c0_353 = arith.constant 0 : index
    %c0_354 = arith.constant 0 : index
    %290 = vector.load %arg2[%c1_352, %c0_353, %c0_354] : memref<7x12x64xbf16, #tpu.memory_space<vmem>>, vector<1x12x64xbf16>
    %291 = vector.shape_cast %290 : vector<1x12x64xbf16> to vector<12x64xbf16>
    %cst_355 = arith.constant dense<0.000000e+00> : vector<16x64xf32>
    %292 = tpu.matmul %289, %291, %cst_355 {dimension_numbers = #tpu.dot_dimension_numbers<[1], [0], [0], [1], [0, 0, 1, 1], [], []>} : vector<16x12xbf16>, vector<12x64xbf16>, vector<16x64xf32> -> vector<16x64xf32>
    %293 = arith.addf %287, %292 : vector<16x64xf32>
    %c0_356 = arith.constant 0 : index
    %c6_357 = arith.constant 6 : index
    %c0_358 = arith.constant 0 : index
    %c0_359 = arith.constant 0 : index
    %c0_360 = arith.constant 0 : index
    %294 = vector.load %arg1[%c0_356, %c6_357, %c0_358, %c0_359, %c0_360] : memref<1x11x2x16x12xbf16, #tpu.memory_space<vmem>>, vector<1x1x1x16x12xbf16>
    %295 = vector.shape_cast %294 : vector<1x1x1x16x12xbf16> to vector<16x12xbf16>
    %c2_361 = arith.constant 2 : index
    %c0_362 = arith.constant 0 : index
    %c0_363 = arith.constant 0 : index
    %296 = vector.load %arg2[%c2_361, %c0_362, %c0_363] : memref<7x12x64xbf16, #tpu.memory_space<vmem>>, vector<1x12x64xbf16>
    %297 = vector.shape_cast %296 : vector<1x12x64xbf16> to vector<12x64xbf16>
    %cst_364 = arith.constant dense<0.000000e+00> : vector<16x64xf32>
    %298 = tpu.matmul %295, %297, %cst_364 {dimension_numbers = #tpu.dot_dimension_numbers<[1], [0], [0], [1], [0, 0, 1, 1], [], []>} : vector<16x12xbf16>, vector<12x64xbf16>, vector<16x64xf32> -> vector<16x64xf32>
    %299 = arith.addf %293, %298 : vector<16x64xf32>
    %c0_365 = arith.constant 0 : index
    %c6_366 = arith.constant 6 : index
    %c1_367 = arith.constant 1 : index
    %c0_368 = arith.constant 0 : index
    %c0_369 = arith.constant 0 : index
    %300 = vector.load %arg1[%c0_365, %c6_366, %c1_367, %c0_368, %c0_369] : memref<1x11x2x16x12xbf16, #tpu.memory_space<vmem>>, vector<1x1x1x16x12xbf16>
    %301 = vector.shape_cast %300 : vector<1x1x1x16x12xbf16> to vector<16x12xbf16>
    %c3_370 = arith.constant 3 : index
    %c0_371 = arith.constant 0 : index
    %c0_372 = arith.constant 0 : index
    %302 = vector.load %arg2[%c3_370, %c0_371, %c0_372] : memref<7x12x64xbf16, #tpu.memory_space<vmem>>, vector<1x12x64xbf16>
    %303 = vector.shape_cast %302 : vector<1x12x64xbf16> to vector<12x64xbf16>
    %cst_373 = arith.constant dense<0.000000e+00> : vector<16x64xf32>
    %304 = tpu.matmul %301, %303, %cst_373 {dimension_numbers = #tpu.dot_dimension_numbers<[1], [0], [0], [1], [0, 0, 1, 1], [], []>} : vector<16x12xbf16>, vector<12x64xbf16>, vector<16x64xf32> -> vector<16x64xf32>
    %305 = arith.addf %299, %304 : vector<16x64xf32>
    %c0_374 = arith.constant 0 : index
    %c7_375 = arith.constant 7 : index
    %c0_376 = arith.constant 0 : index
    %c0_377 = arith.constant 0 : index
    %c0_378 = arith.constant 0 : index
    %306 = vector.load %arg1[%c0_374, %c7_375, %c0_376, %c0_377, %c0_378] : memref<1x11x2x16x12xbf16, #tpu.memory_space<vmem>>, vector<1x1x1x16x12xbf16>
    %307 = vector.shape_cast %306 : vector<1x1x1x16x12xbf16> to vector<16x12xbf16>
    %c4_379 = arith.constant 4 : index
    %c0_380 = arith.constant 0 : index
    %c0_381 = arith.constant 0 : index
    %308 = vector.load %arg2[%c4_379, %c0_380, %c0_381] : memref<7x12x64xbf16, #tpu.memory_space<vmem>>, vector<1x12x64xbf16>
    %309 = vector.shape_cast %308 : vector<1x12x64xbf16> to vector<12x64xbf16>
    %cst_382 = arith.constant dense<0.000000e+00> : vector<16x64xf32>
    %310 = tpu.matmul %307, %309, %cst_382 {dimension_numbers = #tpu.dot_dimension_numbers<[1], [0], [0], [1], [0, 0, 1, 1], [], []>} : vector<16x12xbf16>, vector<12x64xbf16>, vector<16x64xf32> -> vector<16x64xf32>
    %311 = arith.addf %305, %310 : vector<16x64xf32>
    %c0_383 = arith.constant 0 : index
    %c7_384 = arith.constant 7 : index
    %c1_385 = arith.constant 1 : index
    %c0_386 = arith.constant 0 : index
    %c0_387 = arith.constant 0 : index
    %312 = vector.load %arg1[%c0_383, %c7_384, %c1_385, %c0_386, %c0_387] : memref<1x11x2x16x12xbf16, #tpu.memory_space<vmem>>, vector<1x1x1x16x12xbf16>
    %313 = vector.shape_cast %312 : vector<1x1x1x16x12xbf16> to vector<16x12xbf16>
    %c5_388 = arith.constant 5 : index
    %c0_389 = arith.constant 0 : index
    %c0_390 = arith.constant 0 : index
    %314 = vector.load %arg2[%c5_388, %c0_389, %c0_390] : memref<7x12x64xbf16, #tpu.memory_space<vmem>>, vector<1x12x64xbf16>
    %315 = vector.shape_cast %314 : vector<1x12x64xbf16> to vector<12x64xbf16>
    %cst_391 = arith.constant dense<0.000000e+00> : vector<16x64xf32>
    %316 = tpu.matmul %313, %315, %cst_391 {dimension_numbers = #tpu.dot_dimension_numbers<[1], [0], [0], [1], [0, 0, 1, 1], [], []>} : vector<16x12xbf16>, vector<12x64xbf16>, vector<16x64xf32> -> vector<16x64xf32>
    %317 = arith.addf %311, %316 : vector<16x64xf32>
    %c0_392 = arith.constant 0 : index
    %c8 = arith.constant 8 : index
    %c0_393 = arith.constant 0 : index
    %c0_394 = arith.constant 0 : index
    %c0_395 = arith.constant 0 : index
    %318 = vector.load %arg1[%c0_392, %c8, %c0_393, %c0_394, %c0_395] : memref<1x11x2x16x12xbf16, #tpu.memory_space<vmem>>, vector<1x1x1x16x12xbf16>
    %319 = vector.shape_cast %318 : vector<1x1x1x16x12xbf16> to vector<16x12xbf16>
    %c6_396 = arith.constant 6 : index
    %c0_397 = arith.constant 0 : index
    %c0_398 = arith.constant 0 : index
    %320 = vector.load %arg2[%c6_396, %c0_397, %c0_398] : memref<7x12x64xbf16, #tpu.memory_space<vmem>>, vector<1x12x64xbf16>
    %321 = vector.shape_cast %320 : vector<1x12x64xbf16> to vector<12x64xbf16>
    %cst_399 = arith.constant dense<0.000000e+00> : vector<16x64xf32>
    %322 = tpu.matmul %319, %321, %cst_399 {dimension_numbers = #tpu.dot_dimension_numbers<[1], [0], [0], [1], [0, 0, 1, 1], [], []>} : vector<16x12xbf16>, vector<12x64xbf16>, vector<16x64xf32> -> vector<16x64xf32>
    %323 = arith.addf %317, %322 : vector<16x64xf32>
    %324 = vector.extract_strided_slice %323 {offsets = [0, 0], sizes = [8, 16], strides = [1, 1]} : vector<16x64xf32> to vector<8x16xf32>
    %325 = vector.extract_strided_slice %323 {offsets = [1, 16], sizes = [8, 16], strides = [1, 1]} : vector<16x64xf32> to vector<8x16xf32>
    %326 = arith.addf %324, %325 : vector<8x16xf32>
    %327 = vector.extract_strided_slice %323 {offsets = [2, 32], sizes = [8, 16], strides = [1, 1]} : vector<16x64xf32> to vector<8x16xf32>
    %328 = arith.addf %326, %327 : vector<8x16xf32>
    %329 = vector.extract_strided_slice %323 {offsets = [3, 48], sizes = [8, 16], strides = [1, 1]} : vector<16x64xf32> to vector<8x16xf32>
    %330 = arith.addf %328, %329 : vector<8x16xf32>
    %331 = vector.broadcast %0 : vector<1x16xf32> to vector<8x16xf32>
    %332 = arith.addf %330, %331 : vector<8x16xf32>
    %cst_400 = arith.constant 0.000000e+00 : f32
    %333 = vector.broadcast %cst_400 : f32 to vector<8x16xf32>
    %334 = arith.maximumf %332, %333 : vector<8x16xf32>
    %335 = arith.truncf %334 : vector<8x16xf32> to vector<8x16xbf16>
    %c0_401 = arith.constant 0 : index
    %c7_402 = arith.constant 7 : index
    %c2_403 = arith.constant 2 : index
    %c0_404 = arith.constant 0 : index
    %336 = vector.load %arg4[%c0_401, %c7_402, %c2_403, %c0_404] : memref<1x12x16x16xbf16, #tpu.memory_space<vmem>>, vector<1x1x8x16xbf16>
    %337 = vector.shape_cast %336 : vector<1x1x8x16xbf16> to vector<8x16xbf16>
    %338 = vector.shape_cast %335 : vector<8x16xbf16> to vector<1x1x8x16xbf16>
    tpu.vector_store %arg4[%c0_401, %c7_402, %c2_403, %c0_404], %338 {strides = array<i32>} : memref<1x12x16x16xbf16, #tpu.memory_space<vmem>>, vector<1x1x8x16xbf16>,
    %c0_405 = arith.constant 0 : index
    %c6_406 = arith.constant 6 : index
    %c0_407 = arith.constant 0 : index
    %c0_408 = arith.constant 0 : index
    %c0_409 = arith.constant 0 : index
    %339 = vector.load %arg1[%c0_405, %c6_406, %c0_407, %c0_408, %c0_409] : memref<1x11x2x16x12xbf16, #tpu.memory_space<vmem>>, vector<1x1x1x16x12xbf16>
    %340 = vector.shape_cast %339 : vector<1x1x1x16x12xbf16> to vector<16x12xbf16>
    %c0_410 = arith.constant 0 : index
    %c0_411 = arith.constant 0 : index
    %c0_412 = arith.constant 0 : index
    %341 = vector.load %arg2[%c0_410, %c0_411, %c0_412] : memref<7x12x64xbf16, #tpu.memory_space<vmem>>, vector<1x12x64xbf16>
    %342 = vector.shape_cast %341 : vector<1x12x64xbf16> to vector<12x64xbf16>
    %cst_413 = arith.constant dense<0.000000e+00> : vector<16x64xf32>
    %343 = tpu.matmul %340, %342, %cst_413 {dimension_numbers = #tpu.dot_dimension_numbers<[1], [0], [0], [1], [0, 0, 1, 1], [], []>} : vector<16x12xbf16>, vector<12x64xbf16>, vector<16x64xf32> -> vector<16x64xf32>
    %c0_414 = arith.constant 0 : index
    %c6_415 = arith.constant 6 : index
    %c1_416 = arith.constant 1 : index
    %c0_417 = arith.constant 0 : index
    %c0_418 = arith.constant 0 : index
    %344 = vector.load %arg1[%c0_414, %c6_415, %c1_416, %c0_417, %c0_418] : memref<1x11x2x16x12xbf16, #tpu.memory_space<vmem>>, vector<1x1x1x16x12xbf16>
    %345 = vector.shape_cast %344 : vector<1x1x1x16x12xbf16> to vector<16x12xbf16>
    %c1_419 = arith.constant 1 : index
    %c0_420 = arith.constant 0 : index
    %c0_421 = arith.constant 0 : index
    %346 = vector.load %arg2[%c1_419, %c0_420, %c0_421] : memref<7x12x64xbf16, #tpu.memory_space<vmem>>, vector<1x12x64xbf16>
    %347 = vector.shape_cast %346 : vector<1x12x64xbf16> to vector<12x64xbf16>
    %cst_422 = arith.constant dense<0.000000e+00> : vector<16x64xf32>
    %348 = tpu.matmul %345, %347, %cst_422 {dimension_numbers = #tpu.dot_dimension_numbers<[1], [0], [0], [1], [0, 0, 1, 1], [], []>} : vector<16x12xbf16>, vector<12x64xbf16>, vector<16x64xf32> -> vector<16x64xf32>
    %349 = arith.addf %343, %348 : vector<16x64xf32>
    %c0_423 = arith.constant 0 : index
    %c7_424 = arith.constant 7 : index
    %c0_425 = arith.constant 0 : index
    %c0_426 = arith.constant 0 : index
    %c0_427 = arith.constant 0 : index
    %350 = vector.load %arg1[%c0_423, %c7_424, %c0_425, %c0_426, %c0_427] : memref<1x11x2x16x12xbf16, #tpu.memory_space<vmem>>, vector<1x1x1x16x12xbf16>
    %351 = vector.shape_cast %350 : vector<1x1x1x16x12xbf16> to vector<16x12xbf16>
    %c2_428 = arith.constant 2 : index
    %c0_429 = arith.constant 0 : index
    %c0_430 = arith.constant 0 : index
    %352 = vector.load %arg2[%c2_428, %c0_429, %c0_430] : memref<7x12x64xbf16, #tpu.memory_space<vmem>>, vector<1x12x64xbf16>
    %353 = vector.shape_cast %352 : vector<1x12x64xbf16> to vector<12x64xbf16>
    %cst_431 = arith.constant dense<0.000000e+00> : vector<16x64xf32>
    %354 = tpu.matmul %351, %353, %cst_431 {dimension_numbers = #tpu.dot_dimension_numbers<[1], [0], [0], [1], [0, 0, 1, 1], [], []>} : vector<16x12xbf16>, vector<12x64xbf16>, vector<16x64xf32> -> vector<16x64xf32>
    %355 = arith.addf %349, %354 : vector<16x64xf32>
    %c0_432 = arith.constant 0 : index
    %c7_433 = arith.constant 7 : index
    %c1_434 = arith.constant 1 : index
    %c0_435 = arith.constant 0 : index
    %c0_436 = arith.constant 0 : index
    %356 = vector.load %arg1[%c0_432, %c7_433, %c1_434, %c0_435, %c0_436] : memref<1x11x2x16x12xbf16, #tpu.memory_space<vmem>>, vector<1x1x1x16x12xbf16>
    %357 = vector.shape_cast %356 : vector<1x1x1x16x12xbf16> to vector<16x12xbf16>
    %c3_437 = arith.constant 3 : index
    %c0_438 = arith.constant 0 : index
    %c0_439 = arith.constant 0 : index
    %358 = vector.load %arg2[%c3_437, %c0_438, %c0_439] : memref<7x12x64xbf16, #tpu.memory_space<vmem>>, vector<1x12x64xbf16>
    %359 = vector.shape_cast %358 : vector<1x12x64xbf16> to vector<12x64xbf16>
    %cst_440 = arith.constant dense<0.000000e+00> : vector<16x64xf32>
    %360 = tpu.matmul %357, %359, %cst_440 {dimension_numbers = #tpu.dot_dimension_numbers<[1], [0], [0], [1], [0, 0, 1, 1], [], []>} : vector<16x12xbf16>, vector<12x64xbf16>, vector<16x64xf32> -> vector<16x64xf32>
    %361 = arith.addf %355, %360 : vector<16x64xf32>
    %c0_441 = arith.constant 0 : index
    %c8_442 = arith.constant 8 : index
    %c0_443 = arith.constant 0 : index
    %c0_444 = arith.constant 0 : index
    %c0_445 = arith.constant 0 : index
    %362 = vector.load %arg1[%c0_441, %c8_442, %c0_443, %c0_444, %c0_445] : memref<1x11x2x16x12xbf16, #tpu.memory_space<vmem>>, vector<1x1x1x16x12xbf16>
    %363 = vector.shape_cast %362 : vector<1x1x1x16x12xbf16> to vector<16x12xbf16>
    %c4_446 = arith.constant 4 : index
    %c0_447 = arith.constant 0 : index
    %c0_448 = arith.constant 0 : index
    %364 = vector.load %arg2[%c4_446, %c0_447, %c0_448] : memref<7x12x64xbf16, #tpu.memory_space<vmem>>, vector<1x12x64xbf16>
    %365 = vector.shape_cast %364 : vector<1x12x64xbf16> to vector<12x64xbf16>
    %cst_449 = arith.constant dense<0.000000e+00> : vector<16x64xf32>
    %366 = tpu.matmul %363, %365, %cst_449 {dimension_numbers = #tpu.dot_dimension_numbers<[1], [0], [0], [1], [0, 0, 1, 1], [], []>} : vector<16x12xbf16>, vector<12x64xbf16>, vector<16x64xf32> -> vector<16x64xf32>
    %367 = arith.addf %361, %366 : vector<16x64xf32>
    %c0_450 = arith.constant 0 : index
    %c8_451 = arith.constant 8 : index
    %c1_452 = arith.constant 1 : index
    %c0_453 = arith.constant 0 : index
    %c0_454 = arith.constant 0 : index
    %368 = vector.load %arg1[%c0_450, %c8_451, %c1_452, %c0_453, %c0_454] : memref<1x11x2x16x12xbf16, #tpu.memory_space<vmem>>, vector<1x1x1x16x12xbf16>
    %369 = vector.shape_cast %368 : vector<1x1x1x16x12xbf16> to vector<16x12xbf16>
    %c5_455 = arith.constant 5 : index
    %c0_456 = arith.constant 0 : index
    %c0_457 = arith.constant 0 : index
    %370 = vector.load %arg2[%c5_455, %c0_456, %c0_457] : memref<7x12x64xbf16, #tpu.memory_space<vmem>>, vector<1x12x64xbf16>
    %371 = vector.shape_cast %370 : vector<1x12x64xbf16> to vector<12x64xbf16>
    %cst_458 = arith.constant dense<0.000000e+00> : vector<16x64xf32>
    %372 = tpu.matmul %369, %371, %cst_458 {dimension_numbers = #tpu.dot_dimension_numbers<[1], [0], [0], [1], [0, 0, 1, 1], [], []>} : vector<16x12xbf16>, vector<12x64xbf16>, vector<16x64xf32> -> vector<16x64xf32>
    %373 = arith.addf %367, %372 : vector<16x64xf32>
    %c0_459 = arith.constant 0 : index
    %c9 = arith.constant 9 : index
    %c0_460 = arith.constant 0 : index
    %c0_461 = arith.constant 0 : index
    %c0_462 = arith.constant 0 : index
    %374 = vector.load %arg1[%c0_459, %c9, %c0_460, %c0_461, %c0_462] : memref<1x11x2x16x12xbf16, #tpu.memory_space<vmem>>, vector<1x1x1x16x12xbf16>
    %375 = vector.shape_cast %374 : vector<1x1x1x16x12xbf16> to vector<16x12xbf16>
    %c6_463 = arith.constant 6 : index
    %c0_464 = arith.constant 0 : index
    %c0_465 = arith.constant 0 : index
    %376 = vector.load %arg2[%c6_463, %c0_464, %c0_465] : memref<7x12x64xbf16, #tpu.memory_space<vmem>>, vector<1x12x64xbf16>
    %377 = vector.shape_cast %376 : vector<1x12x64xbf16> to vector<12x64xbf16>
    %cst_466 = arith.constant dense<0.000000e+00> : vector<16x64xf32>
    %378 = tpu.matmul %375, %377, %cst_466 {dimension_numbers = #tpu.dot_dimension_numbers<[1], [0], [0], [1], [0, 0, 1, 1], [], []>} : vector<16x12xbf16>, vector<12x64xbf16>, vector<16x64xf32> -> vector<16x64xf32>
    %379 = arith.addf %373, %378 : vector<16x64xf32>
    %380 = vector.extract_strided_slice %379 {offsets = [0, 0], sizes = [8, 16], strides = [1, 1]} : vector<16x64xf32> to vector<8x16xf32>
    %381 = vector.extract_strided_slice %379 {offsets = [1, 16], sizes = [8, 16], strides = [1, 1]} : vector<16x64xf32> to vector<8x16xf32>
    %382 = arith.addf %380, %381 : vector<8x16xf32>
    %383 = vector.extract_strided_slice %379 {offsets = [2, 32], sizes = [8, 16], strides = [1, 1]} : vector<16x64xf32> to vector<8x16xf32>
    %384 = arith.addf %382, %383 : vector<8x16xf32>
    %385 = vector.extract_strided_slice %379 {offsets = [3, 48], sizes = [8, 16], strides = [1, 1]} : vector<16x64xf32> to vector<8x16xf32>
    %386 = arith.addf %384, %385 : vector<8x16xf32>
    %387 = vector.broadcast %0 : vector<1x16xf32> to vector<8x16xf32>
    %388 = arith.addf %386, %387 : vector<8x16xf32>
    %cst_467 = arith.constant 0.000000e+00 : f32
    %389 = vector.broadcast %cst_467 : f32 to vector<8x16xf32>
    %390 = arith.maximumf %388, %389 : vector<8x16xf32>
    %391 = arith.truncf %390 : vector<8x16xf32> to vector<8x16xbf16>
    %c0_468 = arith.constant 0 : index
    %c8_469 = arith.constant 8 : index
    %c2_470 = arith.constant 2 : index
    %c0_471 = arith.constant 0 : index
    %392 = vector.load %arg4[%c0_468, %c8_469, %c2_470, %c0_471] : memref<1x12x16x16xbf16, #tpu.memory_space<vmem>>, vector<1x1x8x16xbf16>
    %393 = vector.shape_cast %392 : vector<1x1x8x16xbf16> to vector<8x16xbf16>
    %394 = vector.shape_cast %391 : vector<8x16xbf16> to vector<1x1x8x16xbf16>
    tpu.vector_store %arg4[%c0_468, %c8_469, %c2_470, %c0_471], %394 {strides = array<i32>} : memref<1x12x16x16xbf16, #tpu.memory_space<vmem>>, vector<1x1x8x16xbf16>,
    %c0_472 = arith.constant 0 : index
    %c7_473 = arith.constant 7 : index
    %c0_474 = arith.constant 0 : index
    %c0_475 = arith.constant 0 : index
    %c0_476 = arith.constant 0 : index
    %395 = vector.load %arg1[%c0_472, %c7_473, %c0_474, %c0_475, %c0_476] : memref<1x11x2x16x12xbf16, #tpu.memory_space<vmem>>, vector<1x1x1x16x12xbf16>
    %396 = vector.shape_cast %395 : vector<1x1x1x16x12xbf16> to vector<16x12xbf16>
    %c0_477 = arith.constant 0 : index
    %c0_478 = arith.constant 0 : index
    %c0_479 = arith.constant 0 : index
    %397 = vector.load %arg2[%c0_477, %c0_478, %c0_479] : memref<7x12x64xbf16, #tpu.memory_space<vmem>>, vector<1x12x64xbf16>
    %398 = vector.shape_cast %397 : vector<1x12x64xbf16> to vector<12x64xbf16>
    %cst_480 = arith.constant dense<0.000000e+00> : vector<16x64xf32>
    %399 = tpu.matmul %396, %398, %cst_480 {dimension_numbers = #tpu.dot_dimension_numbers<[1], [0], [0], [1], [0, 0, 1, 1], [], []>} : vector<16x12xbf16>, vector<12x64xbf16>, vector<16x64xf32> -> vector<16x64xf32>
    %c0_481 = arith.constant 0 : index
    %c7_482 = arith.constant 7 : index
    %c1_483 = arith.constant 1 : index
    %c0_484 = arith.constant 0 : index
    %c0_485 = arith.constant 0 : index
    %400 = vector.load %arg1[%c0_481, %c7_482, %c1_483, %c0_484, %c0_485] : memref<1x11x2x16x12xbf16, #tpu.memory_space<vmem>>, vector<1x1x1x16x12xbf16>
    %401 = vector.shape_cast %400 : vector<1x1x1x16x12xbf16> to vector<16x12xbf16>
    %c1_486 = arith.constant 1 : index
    %c0_487 = arith.constant 0 : index
    %c0_488 = arith.constant 0 : index
    %402 = vector.load %arg2[%c1_486, %c0_487, %c0_488] : memref<7x12x64xbf16, #tpu.memory_space<vmem>>, vector<1x12x64xbf16>
    %403 = vector.shape_cast %402 : vector<1x12x64xbf16> to vector<12x64xbf16>
    %cst_489 = arith.constant dense<0.000000e+00> : vector<16x64xf32>
    %404 = tpu.matmul %401, %403, %cst_489 {dimension_numbers = #tpu.dot_dimension_numbers<[1], [0], [0], [1], [0, 0, 1, 1], [], []>} : vector<16x12xbf16>, vector<12x64xbf16>, vector<16x64xf32> -> vector<16x64xf32>
    %405 = arith.addf %399, %404 : vector<16x64xf32>
    %c0_490 = arith.constant 0 : index
    %c8_491 = arith.constant 8 : index
    %c0_492 = arith.constant 0 : index
    %c0_493 = arith.constant 0 : index
    %c0_494 = arith.constant 0 : index
    %406 = vector.load %arg1[%c0_490, %c8_491, %c0_492, %c0_493, %c0_494] : memref<1x11x2x16x12xbf16, #tpu.memory_space<vmem>>, vector<1x1x1x16x12xbf16>
    %407 = vector.shape_cast %406 : vector<1x1x1x16x12xbf16> to vector<16x12xbf16>
    %c2_495 = arith.constant 2 : index
    %c0_496 = arith.constant 0 : index
    %c0_497 = arith.constant 0 : index
    %408 = vector.load %arg2[%c2_495, %c0_496, %c0_497] : memref<7x12x64xbf16, #tpu.memory_space<vmem>>, vector<1x12x64xbf16>
    %409 = vector.shape_cast %408 : vector<1x12x64xbf16> to vector<12x64xbf16>
    %cst_498 = arith.constant dense<0.000000e+00> : vector<16x64xf32>
    %410 = tpu.matmul %407, %409, %cst_498 {dimension_numbers = #tpu.dot_dimension_numbers<[1], [0], [0], [1], [0, 0, 1, 1], [], []>} : vector<16x12xbf16>, vector<12x64xbf16>, vector<16x64xf32> -> vector<16x64xf32>
    %411 = arith.addf %405, %410 : vector<16x64xf32>
    %c0_499 = arith.constant 0 : index
    %c8_500 = arith.constant 8 : index
    %c1_501 = arith.constant 1 : index
    %c0_502 = arith.constant 0 : index
    %c0_503 = arith.constant 0 : index
    %412 = vector.load %arg1[%c0_499, %c8_500, %c1_501, %c0_502, %c0_503] : memref<1x11x2x16x12xbf16, #tpu.memory_space<vmem>>, vector<1x1x1x16x12xbf16>
    %413 = vector.shape_cast %412 : vector<1x1x1x16x12xbf16> to vector<16x12xbf16>
    %c3_504 = arith.constant 3 : index
    %c0_505 = arith.constant 0 : index
    %c0_506 = arith.constant 0 : index
    %414 = vector.load %arg2[%c3_504, %c0_505, %c0_506] : memref<7x12x64xbf16, #tpu.memory_space<vmem>>, vector<1x12x64xbf16>
    %415 = vector.shape_cast %414 : vector<1x12x64xbf16> to vector<12x64xbf16>
    %cst_507 = arith.constant dense<0.000000e+00> : vector<16x64xf32>
    %416 = tpu.matmul %413, %415, %cst_507 {dimension_numbers = #tpu.dot_dimension_numbers<[1], [0], [0], [1], [0, 0, 1, 1], [], []>} : vector<16x12xbf16>, vector<12x64xbf16>, vector<16x64xf32> -> vector<16x64xf32>
    %417 = arith.addf %411, %416 : vector<16x64xf32>
    %c0_508 = arith.constant 0 : index
    %c9_509 = arith.constant 9 : index
    %c0_510 = arith.constant 0 : index
    %c0_511 = arith.constant 0 : index
    %c0_512 = arith.constant 0 : index
    %418 = vector.load %arg1[%c0_508, %c9_509, %c0_510, %c0_511, %c0_512] : memref<1x11x2x16x12xbf16, #tpu.memory_space<vmem>>, vector<1x1x1x16x12xbf16>
    %419 = vector.shape_cast %418 : vector<1x1x1x16x12xbf16> to vector<16x12xbf16>
    %c4_513 = arith.constant 4 : index
    %c0_514 = arith.constant 0 : index
    %c0_515 = arith.constant 0 : index
    %420 = vector.load %arg2[%c4_513, %c0_514, %c0_515] : memref<7x12x64xbf16, #tpu.memory_space<vmem>>, vector<1x12x64xbf16>
    %421 = vector.shape_cast %420 : vector<1x12x64xbf16> to vector<12x64xbf16>
    %cst_516 = arith.constant dense<0.000000e+00> : vector<16x64xf32>
    %422 = tpu.matmul %419, %421, %cst_516 {dimension_numbers = #tpu.dot_dimension_numbers<[1], [0], [0], [1], [0, 0, 1, 1], [], []>} : vector<16x12xbf16>, vector<12x64xbf16>, vector<16x64xf32> -> vector<16x64xf32>
    %423 = arith.addf %417, %422 : vector<16x64xf32>
    %c0_517 = arith.constant 0 : index
    %c9_518 = arith.constant 9 : index
    %c1_519 = arith.constant 1 : index
    %c0_520 = arith.constant 0 : index
    %c0_521 = arith.constant 0 : index
    %424 = vector.load %arg1[%c0_517, %c9_518, %c1_519, %c0_520, %c0_521] : memref<1x11x2x16x12xbf16, #tpu.memory_space<vmem>>, vector<1x1x1x16x12xbf16>
    %425 = vector.shape_cast %424 : vector<1x1x1x16x12xbf16> to vector<16x12xbf16>
    %c5_522 = arith.constant 5 : index
    %c0_523 = arith.constant 0 : index
    %c0_524 = arith.constant 0 : index
    %426 = vector.load %arg2[%c5_522, %c0_523, %c0_524] : memref<7x12x64xbf16, #tpu.memory_space<vmem>>, vector<1x12x64xbf16>
    %427 = vector.shape_cast %426 : vector<1x12x64xbf16> to vector<12x64xbf16>
    %cst_525 = arith.constant dense<0.000000e+00> : vector<16x64xf32>
    %428 = tpu.matmul %425, %427, %cst_525 {dimension_numbers = #tpu.dot_dimension_numbers<[1], [0], [0], [1], [0, 0, 1, 1], [], []>} : vector<16x12xbf16>, vector<12x64xbf16>, vector<16x64xf32> -> vector<16x64xf32>
    %429 = arith.addf %423, %428 : vector<16x64xf32>
    %c0_526 = arith.constant 0 : index
    %c10 = arith.constant 10 : index
    %c0_527 = arith.constant 0 : index
    %c0_528 = arith.constant 0 : index
    %c0_529 = arith.constant 0 : index
    %430 = vector.load %arg1[%c0_526, %c10, %c0_527, %c0_528, %c0_529] : memref<1x11x2x16x12xbf16, #tpu.memory_space<vmem>>, vector<1x1x1x16x12xbf16>
    %431 = vector.shape_cast %430 : vector<1x1x1x16x12xbf16> to vector<16x12xbf16>
    %c6_530 = arith.constant 6 : index
    %c0_531 = arith.constant 0 : index
    %c0_532 = arith.constant 0 : index
    %432 = vector.load %arg2[%c6_530, %c0_531, %c0_532] : memref<7x12x64xbf16, #tpu.memory_space<vmem>>, vector<1x12x64xbf16>
    %433 = vector.shape_cast %432 : vector<1x12x64xbf16> to vector<12x64xbf16>
    %cst_533 = arith.constant dense<0.000000e+00> : vector<16x64xf32>
    %434 = tpu.matmul %431, %433, %cst_533 {dimension_numbers = #tpu.dot_dimension_numbers<[1], [0], [0], [1], [0, 0, 1, 1], [], []>} : vector<16x12xbf16>, vector<12x64xbf16>, vector<16x64xf32> -> vector<16x64xf32>
    %435 = arith.addf %429, %434 : vector<16x64xf32>
    %436 = vector.extract_strided_slice %435 {offsets = [0, 0], sizes = [8, 16], strides = [1, 1]} : vector<16x64xf32> to vector<8x16xf32>
    %437 = vector.extract_strided_slice %435 {offsets = [1, 16], sizes = [8, 16], strides = [1, 1]} : vector<16x64xf32> to vector<8x16xf32>
    %438 = arith.addf %436, %437 : vector<8x16xf32>
    %439 = vector.extract_strided_slice %435 {offsets = [2, 32], sizes = [8, 16], strides = [1, 1]} : vector<16x64xf32> to vector<8x16xf32>
    %440 = arith.addf %438, %439 : vector<8x16xf32>
    %441 = vector.extract_strided_slice %435 {offsets = [3, 48], sizes = [8, 16], strides = [1, 1]} : vector<16x64xf32> to vector<8x16xf32>
    %442 = arith.addf %440, %441 : vector<8x16xf32>
    %443 = vector.broadcast %0 : vector<1x16xf32> to vector<8x16xf32>
    %444 = arith.addf %442, %443 : vector<8x16xf32>
    %cst_534 = arith.constant 0.000000e+00 : f32
    %445 = vector.broadcast %cst_534 : f32 to vector<8x16xf32>
    %446 = arith.maximumf %444, %445 : vector<8x16xf32>
    %447 = arith.truncf %446 : vector<8x16xf32> to vector<8x16xbf16>
    %c0_535 = arith.constant 0 : index
    %c9_536 = arith.constant 9 : index
    %c2_537 = arith.constant 2 : index
    %c0_538 = arith.constant 0 : index
    %448 = vector.load %arg4[%c0_535, %c9_536, %c2_537, %c0_538] : memref<1x12x16x16xbf16, #tpu.memory_space<vmem>>, vector<1x1x8x16xbf16>
    %449 = vector.shape_cast %448 : vector<1x1x8x16xbf16> to vector<8x16xbf16>
    %450 = vector.shape_cast %447 : vector<8x16xbf16> to vector<1x1x8x16xbf16>
    tpu.vector_store %arg4[%c0_535, %c9_536, %c2_537, %c0_538], %450 {strides = array<i32>} : memref<1x12x16x16xbf16, #tpu.memory_space<vmem>>, vector<1x1x8x16xbf16>,
    return
  }
  func.func @transform_0(%arg0: i32) -> (i32, i32, i32, i32, i32) {
    %c0_i32 = arith.constant 0 : i32
    %c0_i32_0 = arith.constant 0 : i32
    %c0_i32_1 = arith.constant 0 : i32
    %c0_i32_2 = arith.constant 0 : i32
    %c0_i32_3 = arith.constant 0 : i32
    return %arg0, %c0_i32, %c0_i32_0, %c0_i32_1, %c0_i32_2 : i32, i32, i32, i32, i32
  }
  func.func @transform_1(%arg0: i32) -> (i32, i32, i32) {
    %c0_i32 = arith.constant 0 : i32
    %c0_i32_0 = arith.constant 0 : i32
    %c0_i32_1 = arith.constant 0 : i32
    %c0_i32_2 = arith.constant 0 : i32
    return %c0_i32, %c0_i32_0, %c0_i32_1 : i32, i32, i32
  }
  func.func @transform_2(%arg0: i32) -> (i32, i32) {
    %c0_i32 = arith.constant 0 : i32
    %c0_i32_0 = arith.constant 0 : i32
    %c0_i32_1 = arith.constant 0 : i32
    return %c0_i32, %c0_i32_0 : i32, i32
  }
  func.func @transform_3(%arg0: i32) -> (i32, i32, i32, i32) {
    %c0_i32 = arith.constant 0 : i32
    %c0_i32_0 = arith.constant 0 : i32
    %c0_i32_1 = arith.constant 0 : i32
    %c0_i32_2 = arith.constant 0 : i32
    return %arg0, %c0_i32, %c0_i32_0, %c0_i32_1 : i32, i32, i32, i32
  }
}

module attributes {stable_mosaic.version = 11 : i64} {
  func.func @_conv_relu_kernel(%arg0: i32, %arg1: memref<1x2x2x8x128xbf16, #tpu.memory_space<vmem>>, %arg2: memref<3x128x256xbf16, #tpu.memory_space<vmem>>, %arg3: memref<1x128xf32, #tpu.memory_space<vmem>>, %arg4: memref<1x4x16x128xbf16, #tpu.memory_space<vmem>>) attributes {dimension_semantics = [#tpu.dimension_semantics<parallel>], iteration_bounds = array<i64: 2>, scalar_prefetch = 0 : i64, scratch_operands = 0 : i64, tpu.core_type = #tpu.core_type<tc>, window_params = [{transform_indices = @transform_0, window_bounds = array<i64: 1, 2, 2, 8, 128>}, {pipeline_mode = #tpu.pipeline_mode<synchronous>, transform_indices = @transform_1, window_bounds = array<i64: 3, 128, 256>}, {pipeline_mode = #tpu.pipeline_mode<synchronous>, transform_indices = @transform_2, window_bounds = array<i64: 1, 128>}, {transform_indices = @transform_3, window_bounds = array<i64: 1, 4, 16, 128>}]} {
    %c0 = arith.constant 0 : index
    %c0_0 = arith.constant 0 : index
    %0 = vector.load %arg3[%c0, %c0_0] : memref<1x128xf32, #tpu.memory_space<vmem>>, vector<1x128xf32>
    %cst = arith.constant 0.000000e+00 : bf16
    %1 = vector.broadcast %cst : bf16 to vector<1x4x16x128xbf16>
    %c0_1 = arith.constant 0 : index
    %c0_2 = arith.constant 0 : index
    %c0_3 = arith.constant 0 : index
    %c0_4 = arith.constant 0 : index
    %2 = vector.load %arg4[%c0_1, %c0_2, %c0_3, %c0_4] : memref<1x4x16x128xbf16, #tpu.memory_space<vmem>>, vector<1x4x16x128xbf16>
    tpu.vector_store %arg4[%c0_1, %c0_2, %c0_3, %c0_4], %1 {strides = array<i32>} : memref<1x4x16x128xbf16, #tpu.memory_space<vmem>>, vector<1x4x16x128xbf16>,
    %c0_5 = arith.constant 0 : index
    %c0_6 = arith.constant 0 : index
    %c0_7 = arith.constant 0 : index
    %c0_8 = arith.constant 0 : index
    %c0_9 = arith.constant 0 : index
    %3 = vector.load %arg1[%c0_5, %c0_6, %c0_7, %c0_8, %c0_9] : memref<1x2x2x8x128xbf16, #tpu.memory_space<vmem>>, vector<1x1x1x8x128xbf16>
    %4 = vector.shape_cast %3 : vector<1x1x1x8x128xbf16> to vector<8x128xbf16>
    %c0_10 = arith.constant 0 : index
    %c0_11 = arith.constant 0 : index
    %c0_12 = arith.constant 0 : index
    %5 = vector.load %arg2[%c0_10, %c0_11, %c0_12] : memref<3x128x256xbf16, #tpu.memory_space<vmem>>, vector<1x128x256xbf16>
    %6 = vector.shape_cast %5 : vector<1x128x256xbf16> to vector<128x256xbf16>
    %cst_13 = arith.constant dense<0.000000e+00> : vector<8x256xf32>
    %7 = tpu.matmul %4, %6, %cst_13 {dimension_numbers = #tpu.dot_dimension_numbers<[1], [0], [0], [1], [0, 0, 1, 1], [], []>} : vector<8x128xbf16>, vector<128x256xbf16>, vector<8x256xf32> -> vector<8x256xf32>
    %c0_14 = arith.constant 0 : index
    %c0_15 = arith.constant 0 : index
    %c1 = arith.constant 1 : index
    %c0_16 = arith.constant 0 : index
    %c0_17 = arith.constant 0 : index
    %8 = vector.load %arg1[%c0_14, %c0_15, %c1, %c0_16, %c0_17] : memref<1x2x2x8x128xbf16, #tpu.memory_space<vmem>>, vector<1x1x1x8x128xbf16>
    %9 = vector.shape_cast %8 : vector<1x1x1x8x128xbf16> to vector<8x128xbf16>
    %c1_18 = arith.constant 1 : index
    %c0_19 = arith.constant 0 : index
    %c0_20 = arith.constant 0 : index
    %10 = vector.load %arg2[%c1_18, %c0_19, %c0_20] : memref<3x128x256xbf16, #tpu.memory_space<vmem>>, vector<1x128x256xbf16>
    %11 = vector.shape_cast %10 : vector<1x128x256xbf16> to vector<128x256xbf16>
    %cst_21 = arith.constant dense<0.000000e+00> : vector<8x256xf32>
    %12 = tpu.matmul %9, %11, %cst_21 {dimension_numbers = #tpu.dot_dimension_numbers<[1], [0], [0], [1], [0, 0, 1, 1], [], []>} : vector<8x128xbf16>, vector<128x256xbf16>, vector<8x256xf32> -> vector<8x256xf32>
    %13 = arith.addf %7, %12 : vector<8x256xf32>
    %c0_22 = arith.constant 0 : index
    %c1_23 = arith.constant 1 : index
    %c0_24 = arith.constant 0 : index
    %c0_25 = arith.constant 0 : index
    %c0_26 = arith.constant 0 : index
    %14 = vector.load %arg1[%c0_22, %c1_23, %c0_24, %c0_25, %c0_26] : memref<1x2x2x8x128xbf16, #tpu.memory_space<vmem>>, vector<1x1x1x8x128xbf16>
    %15 = vector.shape_cast %14 : vector<1x1x1x8x128xbf16> to vector<8x128xbf16>
    %c2 = arith.constant 2 : index
    %c0_27 = arith.constant 0 : index
    %c0_28 = arith.constant 0 : index
    %16 = vector.load %arg2[%c2, %c0_27, %c0_28] : memref<3x128x256xbf16, #tpu.memory_space<vmem>>, vector<1x128x256xbf16>
    %17 = vector.shape_cast %16 : vector<1x128x256xbf16> to vector<128x256xbf16>
    %cst_29 = arith.constant dense<0.000000e+00> : vector<8x256xf32>
    %18 = tpu.matmul %15, %17, %cst_29 {dimension_numbers = #tpu.dot_dimension_numbers<[1], [0], [0], [1], [0, 0, 1, 1], [], []>} : vector<8x128xbf16>, vector<128x256xbf16>, vector<8x256xf32> -> vector<8x256xf32>
    %19 = arith.addf %13, %18 : vector<8x256xf32>
    %20 = vector.extract_strided_slice %19 {offsets = [0, 0], sizes = [1, 128], strides = [1, 1]} : vector<8x256xf32> to vector<1x128xf32>
    %21 = vector.extract_strided_slice %19 {offsets = [1, 128], sizes = [1, 128], strides = [1, 1]} : vector<8x256xf32> to vector<1x128xf32>
    %22 = arith.addf %20, %21 : vector<1x128xf32>
    %23 = arith.addf %22, %0 : vector<1x128xf32>
    %cst_30 = arith.constant 0.000000e+00 : f32
    %24 = vector.broadcast %cst_30 : f32 to vector<1x128xf32>
    %25 = arith.maximumf %23, %24 : vector<1x128xf32>
    %26 = arith.truncf %25 : vector<1x128xf32> to vector<1x128xbf16>
    %c0_31 = arith.constant 0 : index
    %c1_32 = arith.constant 1 : index
    %c1_33 = arith.constant 1 : index
    %c0_34 = arith.constant 0 : index
    %27 = vector.load %arg4[%c0_31, %c1_32, %c1_33, %c0_34] : memref<1x4x16x128xbf16, #tpu.memory_space<vmem>>, vector<1x1x1x128xbf16>
    %28 = vector.shape_cast %27 : vector<1x1x1x128xbf16> to vector<1x128xbf16>
    %29 = vector.shape_cast %26 : vector<1x128xbf16> to vector<1x1x1x128xbf16>
    tpu.vector_store %arg4[%c0_31, %c1_32, %c1_33, %c0_34], %29 {strides = array<i32>} : memref<1x4x16x128xbf16, #tpu.memory_space<vmem>>, vector<1x1x1x128xbf16>,
    return
  }
  func.func @transform_0(%arg0: i32) -> (i32, i32, i32, i32, i32) {
    %c0_i32 = arith.constant 0 : i32
    %c0_i32_0 = arith.constant 0 : i32
    %c0_i32_1 = arith.constant 0 : i32
    %c0_i32_2 = arith.constant 0 : i32
    %c0_i32_3 = arith.constant 0 : i32
    return %arg0, %c0_i32, %c0_i32_0, %c0_i32_1, %c0_i32_2 : i32, i32, i32, i32, i32
  }
  func.func @transform_1(%arg0: i32) -> (i32, i32, i32) {
    %c0_i32 = arith.constant 0 : i32
    %c0_i32_0 = arith.constant 0 : i32
    %c0_i32_1 = arith.constant 0 : i32
    %c0_i32_2 = arith.constant 0 : i32
    return %c0_i32, %c0_i32_0, %c0_i32_1 : i32, i32, i32
  }
  func.func @transform_2(%arg0: i32) -> (i32, i32) {
    %c0_i32 = arith.constant 0 : i32
    %c0_i32_0 = arith.constant 0 : i32
    %c0_i32_1 = arith.constant 0 : i32
    return %c0_i32, %c0_i32_0 : i32, i32
  }
  func.func @transform_3(%arg0: i32) -> (i32, i32, i32, i32) {
    %c0_i32 = arith.constant 0 : i32
    %c0_i32_0 = arith.constant 0 : i32
    %c0_i32_1 = arith.constant 0 : i32
    %c0_i32_2 = arith.constant 0 : i32
    return %arg0, %c0_i32, %c0_i32_0, %c0_i32_1 : i32, i32, i32, i32
  }
}

module attributes {stable_mosaic.version = 11 : i64} {
  func.func @_conv_relu_kernel(%arg0: i32, %arg1: memref<1x3x2x8x64xbf16, #tpu.memory_space<vmem>>, %arg2: memref<3x64x128xbf16, #tpu.memory_space<vmem>>, %arg3: memref<1x64xf32, #tpu.memory_space<vmem>>, %arg4: memref<1x4x16x64xbf16, #tpu.memory_space<vmem>>) attributes {dimension_semantics = [#tpu.dimension_semantics<parallel>], iteration_bounds = array<i64: 2>, scalar_prefetch = 0 : i64, scratch_operands = 0 : i64, tpu.core_type = #tpu.core_type<tc>, window_params = [{transform_indices = @transform_0, window_bounds = array<i64: 1, 3, 2, 8, 64>}, {pipeline_mode = #tpu.pipeline_mode<synchronous>, transform_indices = @transform_1, window_bounds = array<i64: 3, 64, 128>}, {pipeline_mode = #tpu.pipeline_mode<synchronous>, transform_indices = @transform_2, window_bounds = array<i64: 1, 64>}, {transform_indices = @transform_3, window_bounds = array<i64: 1, 4, 16, 64>}]} {
    %c0 = arith.constant 0 : index
    %c0_0 = arith.constant 0 : index
    %0 = vector.load %arg3[%c0, %c0_0] : memref<1x64xf32, #tpu.memory_space<vmem>>, vector<1x64xf32>
    %cst = arith.constant 0.000000e+00 : bf16
    %1 = vector.broadcast %cst : bf16 to vector<1x4x16x64xbf16>
    %c0_1 = arith.constant 0 : index
    %c0_2 = arith.constant 0 : index
    %c0_3 = arith.constant 0 : index
    %c0_4 = arith.constant 0 : index
    %2 = vector.load %arg4[%c0_1, %c0_2, %c0_3, %c0_4] : memref<1x4x16x64xbf16, #tpu.memory_space<vmem>>, vector<1x4x16x64xbf16>
    tpu.vector_store %arg4[%c0_1, %c0_2, %c0_3, %c0_4], %1 {strides = array<i32>} : memref<1x4x16x64xbf16, #tpu.memory_space<vmem>>, vector<1x4x16x64xbf16>,
    %c0_5 = arith.constant 0 : index
    %c0_6 = arith.constant 0 : index
    %c0_7 = arith.constant 0 : index
    %c0_8 = arith.constant 0 : index
    %c0_9 = arith.constant 0 : index
    %3 = vector.load %arg1[%c0_5, %c0_6, %c0_7, %c0_8, %c0_9] : memref<1x3x2x8x64xbf16, #tpu.memory_space<vmem>>, vector<1x1x1x8x64xbf16>
    %4 = vector.shape_cast %3 : vector<1x1x1x8x64xbf16> to vector<8x64xbf16>
    %c0_10 = arith.constant 0 : index
    %c0_11 = arith.constant 0 : index
    %c0_12 = arith.constant 0 : index
    %5 = vector.load %arg2[%c0_10, %c0_11, %c0_12] : memref<3x64x128xbf16, #tpu.memory_space<vmem>>, vector<1x64x128xbf16>
    %6 = vector.shape_cast %5 : vector<1x64x128xbf16> to vector<64x128xbf16>
    %cst_13 = arith.constant dense<0.000000e+00> : vector<8x128xf32>
    %7 = tpu.matmul %4, %6, %cst_13 {dimension_numbers = #tpu.dot_dimension_numbers<[1], [0], [0], [1], [0, 0, 1, 1], [], []>} : vector<8x64xbf16>, vector<64x128xbf16>, vector<8x128xf32> -> vector<8x128xf32>
    %c0_14 = arith.constant 0 : index
    %c0_15 = arith.constant 0 : index
    %c1 = arith.constant 1 : index
    %c0_16 = arith.constant 0 : index
    %c0_17 = arith.constant 0 : index
    %8 = vector.load %arg1[%c0_14, %c0_15, %c1, %c0_16, %c0_17] : memref<1x3x2x8x64xbf16, #tpu.memory_space<vmem>>, vector<1x1x1x8x64xbf16>
    %9 = vector.shape_cast %8 : vector<1x1x1x8x64xbf16> to vector<8x64xbf16>
    %c1_18 = arith.constant 1 : index
    %c0_19 = arith.constant 0 : index
    %c0_20 = arith.constant 0 : index
    %10 = vector.load %arg2[%c1_18, %c0_19, %c0_20] : memref<3x64x128xbf16, #tpu.memory_space<vmem>>, vector<1x64x128xbf16>
    %11 = vector.shape_cast %10 : vector<1x64x128xbf16> to vector<64x128xbf16>
    %cst_21 = arith.constant dense<0.000000e+00> : vector<8x128xf32>
    %12 = tpu.matmul %9, %11, %cst_21 {dimension_numbers = #tpu.dot_dimension_numbers<[1], [0], [0], [1], [0, 0, 1, 1], [], []>} : vector<8x64xbf16>, vector<64x128xbf16>, vector<8x128xf32> -> vector<8x128xf32>
    %13 = arith.addf %7, %12 : vector<8x128xf32>
    %c0_22 = arith.constant 0 : index
    %c1_23 = arith.constant 1 : index
    %c0_24 = arith.constant 0 : index
    %c0_25 = arith.constant 0 : index
    %c0_26 = arith.constant 0 : index
    %14 = vector.load %arg1[%c0_22, %c1_23, %c0_24, %c0_25, %c0_26] : memref<1x3x2x8x64xbf16, #tpu.memory_space<vmem>>, vector<1x1x1x8x64xbf16>
    %15 = vector.shape_cast %14 : vector<1x1x1x8x64xbf16> to vector<8x64xbf16>
    %c2 = arith.constant 2 : index
    %c0_27 = arith.constant 0 : index
    %c0_28 = arith.constant 0 : index
    %16 = vector.load %arg2[%c2, %c0_27, %c0_28] : memref<3x64x128xbf16, #tpu.memory_space<vmem>>, vector<1x64x128xbf16>
    %17 = vector.shape_cast %16 : vector<1x64x128xbf16> to vector<64x128xbf16>
    %cst_29 = arith.constant dense<0.000000e+00> : vector<8x128xf32>
    %18 = tpu.matmul %15, %17, %cst_29 {dimension_numbers = #tpu.dot_dimension_numbers<[1], [0], [0], [1], [0, 0, 1, 1], [], []>} : vector<8x64xbf16>, vector<64x128xbf16>, vector<8x128xf32> -> vector<8x128xf32>
    %19 = arith.addf %13, %18 : vector<8x128xf32>
    %20 = vector.extract_strided_slice %19 {offsets = [0, 0], sizes = [2, 64], strides = [1, 1]} : vector<8x128xf32> to vector<2x64xf32>
    %21 = vector.extract_strided_slice %19 {offsets = [1, 64], sizes = [2, 64], strides = [1, 1]} : vector<8x128xf32> to vector<2x64xf32>
    %22 = arith.addf %20, %21 : vector<2x64xf32>
    %23 = vector.broadcast %0 : vector<1x64xf32> to vector<2x64xf32>
    %24 = arith.addf %22, %23 : vector<2x64xf32>
    %cst_30 = arith.constant 0.000000e+00 : f32
    %25 = vector.broadcast %cst_30 : f32 to vector<2x64xf32>
    %26 = arith.maximumf %24, %25 : vector<2x64xf32>
    %27 = arith.truncf %26 : vector<2x64xf32> to vector<2x64xbf16>
    %c0_31 = arith.constant 0 : index
    %c1_32 = arith.constant 1 : index
    %c1_33 = arith.constant 1 : index
    %c0_34 = arith.constant 0 : index
    %28 = vector.load %arg4[%c0_31, %c1_32, %c1_33, %c0_34] : memref<1x4x16x64xbf16, #tpu.memory_space<vmem>>, vector<1x1x2x64xbf16>
    %29 = vector.shape_cast %28 : vector<1x1x2x64xbf16> to vector<2x64xbf16>
    %30 = vector.shape_cast %27 : vector<2x64xbf16> to vector<1x1x2x64xbf16>
    tpu.vector_store %arg4[%c0_31, %c1_32, %c1_33, %c0_34], %30 {strides = array<i32>} : memref<1x4x16x64xbf16, #tpu.memory_space<vmem>>, vector<1x1x2x64xbf16>,
    %c0_35 = arith.constant 0 : index
    %c1_36 = arith.constant 1 : index
    %c0_37 = arith.constant 0 : index
    %c0_38 = arith.constant 0 : index
    %c0_39 = arith.constant 0 : index
    %31 = vector.load %arg1[%c0_35, %c1_36, %c0_37, %c0_38, %c0_39] : memref<1x3x2x8x64xbf16, #tpu.memory_space<vmem>>, vector<1x1x1x8x64xbf16>
    %32 = vector.shape_cast %31 : vector<1x1x1x8x64xbf16> to vector<8x64xbf16>
    %c0_40 = arith.constant 0 : index
    %c0_41 = arith.constant 0 : index
    %c0_42 = arith.constant 0 : index
    %33 = vector.load %arg2[%c0_40, %c0_41, %c0_42] : memref<3x64x128xbf16, #tpu.memory_space<vmem>>, vector<1x64x128xbf16>
    %34 = vector.shape_cast %33 : vector<1x64x128xbf16> to vector<64x128xbf16>
    %cst_43 = arith.constant dense<0.000000e+00> : vector<8x128xf32>
    %35 = tpu.matmul %32, %34, %cst_43 {dimension_numbers = #tpu.dot_dimension_numbers<[1], [0], [0], [1], [0, 0, 1, 1], [], []>} : vector<8x64xbf16>, vector<64x128xbf16>, vector<8x128xf32> -> vector<8x128xf32>
    %c0_44 = arith.constant 0 : index
    %c1_45 = arith.constant 1 : index
    %c1_46 = arith.constant 1 : index
    %c0_47 = arith.constant 0 : index
    %c0_48 = arith.constant 0 : index
    %36 = vector.load %arg1[%c0_44, %c1_45, %c1_46, %c0_47, %c0_48] : memref<1x3x2x8x64xbf16, #tpu.memory_space<vmem>>, vector<1x1x1x8x64xbf16>
    %37 = vector.shape_cast %36 : vector<1x1x1x8x64xbf16> to vector<8x64xbf16>
    %c1_49 = arith.constant 1 : index
    %c0_50 = arith.constant 0 : index
    %c0_51 = arith.constant 0 : index
    %38 = vector.load %arg2[%c1_49, %c0_50, %c0_51] : memref<3x64x128xbf16, #tpu.memory_space<vmem>>, vector<1x64x128xbf16>
    %39 = vector.shape_cast %38 : vector<1x64x128xbf16> to vector<64x128xbf16>
    %cst_52 = arith.constant dense<0.000000e+00> : vector<8x128xf32>
    %40 = tpu.matmul %37, %39, %cst_52 {dimension_numbers = #tpu.dot_dimension_numbers<[1], [0], [0], [1], [0, 0, 1, 1], [], []>} : vector<8x64xbf16>, vector<64x128xbf16>, vector<8x128xf32> -> vector<8x128xf32>
    %41 = arith.addf %35, %40 : vector<8x128xf32>
    %c0_53 = arith.constant 0 : index
    %c2_54 = arith.constant 2 : index
    %c0_55 = arith.constant 0 : index
    %c0_56 = arith.constant 0 : index
    %c0_57 = arith.constant 0 : index
    %42 = vector.load %arg1[%c0_53, %c2_54, %c0_55, %c0_56, %c0_57] : memref<1x3x2x8x64xbf16, #tpu.memory_space<vmem>>, vector<1x1x1x8x64xbf16>
    %43 = vector.shape_cast %42 : vector<1x1x1x8x64xbf16> to vector<8x64xbf16>
    %c2_58 = arith.constant 2 : index
    %c0_59 = arith.constant 0 : index
    %c0_60 = arith.constant 0 : index
    %44 = vector.load %arg2[%c2_58, %c0_59, %c0_60] : memref<3x64x128xbf16, #tpu.memory_space<vmem>>, vector<1x64x128xbf16>
    %45 = vector.shape_cast %44 : vector<1x64x128xbf16> to vector<64x128xbf16>
    %cst_61 = arith.constant dense<0.000000e+00> : vector<8x128xf32>
    %46 = tpu.matmul %43, %45, %cst_61 {dimension_numbers = #tpu.dot_dimension_numbers<[1], [0], [0], [1], [0, 0, 1, 1], [], []>} : vector<8x64xbf16>, vector<64x128xbf16>, vector<8x128xf32> -> vector<8x128xf32>
    %47 = arith.addf %41, %46 : vector<8x128xf32>
    %48 = vector.extract_strided_slice %47 {offsets = [0, 0], sizes = [2, 64], strides = [1, 1]} : vector<8x128xf32> to vector<2x64xf32>
    %49 = vector.extract_strided_slice %47 {offsets = [1, 64], sizes = [2, 64], strides = [1, 1]} : vector<8x128xf32> to vector<2x64xf32>
    %50 = arith.addf %48, %49 : vector<2x64xf32>
    %51 = vector.broadcast %0 : vector<1x64xf32> to vector<2x64xf32>
    %52 = arith.addf %50, %51 : vector<2x64xf32>
    %cst_62 = arith.constant 0.000000e+00 : f32
    %53 = vector.broadcast %cst_62 : f32 to vector<2x64xf32>
    %54 = arith.maximumf %52, %53 : vector<2x64xf32>
    %55 = arith.truncf %54 : vector<2x64xf32> to vector<2x64xbf16>
    %c0_63 = arith.constant 0 : index
    %c2_64 = arith.constant 2 : index
    %c1_65 = arith.constant 1 : index
    %c0_66 = arith.constant 0 : index
    %56 = vector.load %arg4[%c0_63, %c2_64, %c1_65, %c0_66] : memref<1x4x16x64xbf16, #tpu.memory_space<vmem>>, vector<1x1x2x64xbf16>
    %57 = vector.shape_cast %56 : vector<1x1x2x64xbf16> to vector<2x64xbf16>
    %58 = vector.shape_cast %55 : vector<2x64xbf16> to vector<1x1x2x64xbf16>
    tpu.vector_store %arg4[%c0_63, %c2_64, %c1_65, %c0_66], %58 {strides = array<i32>} : memref<1x4x16x64xbf16, #tpu.memory_space<vmem>>, vector<1x1x2x64xbf16>,
    return
  }
  func.func @transform_0(%arg0: i32) -> (i32, i32, i32, i32, i32) {
    %c0_i32 = arith.constant 0 : i32
    %c0_i32_0 = arith.constant 0 : i32
    %c0_i32_1 = arith.constant 0 : i32
    %c0_i32_2 = arith.constant 0 : i32
    %c0_i32_3 = arith.constant 0 : i32
    return %arg0, %c0_i32, %c0_i32_0, %c0_i32_1, %c0_i32_2 : i32, i32, i32, i32, i32
  }
  func.func @transform_1(%arg0: i32) -> (i32, i32, i32) {
    %c0_i32 = arith.constant 0 : i32
    %c0_i32_0 = arith.constant 0 : i32
    %c0_i32_1 = arith.constant 0 : i32
    %c0_i32_2 = arith.constant 0 : i32
    return %c0_i32, %c0_i32_0, %c0_i32_1 : i32, i32, i32
  }
  func.func @transform_2(%arg0: i32) -> (i32, i32) {
    %c0_i32 = arith.constant 0 : i32
    %c0_i32_0 = arith.constant 0 : i32
    %c0_i32_1 = arith.constant 0 : i32
    return %c0_i32, %c0_i32_0 : i32, i32
  }
  func.func @transform_3(%arg0: i32) -> (i32, i32, i32, i32) {
    %c0_i32 = arith.constant 0 : i32
    %c0_i32_0 = arith.constant 0 : i32
    %c0_i32_1 = arith.constant 0 : i32
    %c0_i32_2 = arith.constant 0 : i32
    return %arg0, %c0_i32, %c0_i32_0, %c0_i32_1 : i32, i32, i32, i32
  }
}

module attributes {stable_mosaic.version = 11 : i64} {
  func.func @_tail_kernel(%arg0: i32, %arg1: memref<1x2x2x8x256xbf16, #tpu.memory_space<vmem>>, %arg2: memref<128x256xbf16, #tpu.memory_space<vmem>>, %arg3: memref<256x256xbf16, #tpu.memory_space<vmem>>, %arg4: memref<256x256xbf16, #tpu.memory_space<vmem>>, %arg5: memref<1x256xf32, #tpu.memory_space<vmem>>, %arg6: memref<1x256xf32, #tpu.memory_space<vmem>>, %arg7: memref<1x256xf32, #tpu.memory_space<vmem>>, %arg8: memref<256x6xbf16, #tpu.memory_space<vmem>>, %arg9: memref<1x6xf32, #tpu.memory_space<vmem>>, %arg10: memref<1x1x6xf32, #tpu.memory_space<vmem>>) attributes {dimension_semantics = [#tpu.dimension_semantics<parallel>], iteration_bounds = array<i64: 2>, scalar_prefetch = 0 : i64, scratch_operands = 0 : i64, tpu.core_type = #tpu.core_type<tc>, window_params = [{transform_indices = @transform_0, window_bounds = array<i64: 1, 2, 2, 8, 256>}, {pipeline_mode = #tpu.pipeline_mode<synchronous>, transform_indices = @transform_1, window_bounds = array<i64: 128, 256>}, {pipeline_mode = #tpu.pipeline_mode<synchronous>, transform_indices = @transform_2, window_bounds = array<i64: 256, 256>}, {pipeline_mode = #tpu.pipeline_mode<synchronous>, transform_indices = @transform_3, window_bounds = array<i64: 256, 256>}, {pipeline_mode = #tpu.pipeline_mode<synchronous>, transform_indices = @transform_4, window_bounds = array<i64: 1, 256>}, {pipeline_mode = #tpu.pipeline_mode<synchronous>, transform_indices = @transform_5, window_bounds = array<i64: 1, 256>}, {pipeline_mode = #tpu.pipeline_mode<synchronous>, transform_indices = @transform_6, window_bounds = array<i64: 1, 256>}, {pipeline_mode = #tpu.pipeline_mode<synchronous>, transform_indices = @transform_7, window_bounds = array<i64: 256, 6>}, {pipeline_mode = #tpu.pipeline_mode<synchronous>, transform_indices = @transform_8, window_bounds = array<i64: 1, 6>}, {transform_indices = @transform_9, window_bounds = array<i64: 1, 1, 6>}]} {
    %c0 = arith.constant 0 : index
    %c0_0 = arith.constant 0 : index
    %c1 = arith.constant 1 : index
    %c0_1 = arith.constant 0 : index
    %c128 = arith.constant 128 : index
    %0 = vector.load %arg1[%c0, %c0_0, %c1, %c0_1, %c128] : memref<1x2x2x8x256xbf16, #tpu.memory_space<vmem>>, vector<1x1x1x1x128xbf16>
    %1 = vector.shape_cast %0 : vector<1x1x1x1x128xbf16> to vector<1x128xbf16>
    %c0_2 = arith.constant 0 : index
    %c0_3 = arith.constant 0 : index
    %2 = vector.load %arg2[%c0_2, %c0_3] : memref<128x256xbf16, #tpu.memory_space<vmem>>, vector<128x256xbf16>
    %cst = arith.constant dense<0.000000e+00> : vector<1x256xf32>
    %3 = tpu.matmul %1, %2, %cst {dimension_numbers = #tpu.dot_dimension_numbers<[1], [0], [0], [1], [0, 0, 1, 1], [], []>} : vector<1x128xbf16>, vector<128x256xbf16>, vector<1x256xf32> -> vector<1x256xf32>
    %c0_4 = arith.constant 0 : index
    %c0_5 = arith.constant 0 : index
    %4 = vector.load %arg5[%c0_4, %c0_5] : memref<1x256xf32, #tpu.memory_space<vmem>>, vector<1x256xf32>
    %5 = arith.addf %3, %4 : vector<1x256xf32>
    %cst_6 = arith.constant 0.000000e+00 : f32
    %6 = vector.broadcast %cst_6 : f32 to vector<1x256xf32>
    %7 = arith.maximumf %5, %6 : vector<1x256xf32>
    %8 = arith.truncf %7 : vector<1x256xf32> to vector<1x256xbf16>
    %c0_7 = arith.constant 0 : index
    %c0_8 = arith.constant 0 : index
    %9 = vector.load %arg3[%c0_7, %c0_8] : memref<256x256xbf16, #tpu.memory_space<vmem>>, vector<256x256xbf16>
    %cst_9 = arith.constant dense<0.000000e+00> : vector<1x256xf32>
    %10 = tpu.matmul %8, %9, %cst_9 {dimension_numbers = #tpu.dot_dimension_numbers<[1], [0], [0], [1], [0, 0, 1, 1], [], []>} : vector<1x256xbf16>, vector<256x256xbf16>, vector<1x256xf32> -> vector<1x256xf32>
    %c0_10 = arith.constant 0 : index
    %c0_11 = arith.constant 0 : index
    %11 = vector.load %arg6[%c0_10, %c0_11] : memref<1x256xf32, #tpu.memory_space<vmem>>, vector<1x256xf32>
    %12 = arith.addf %10, %11 : vector<1x256xf32>
    %cst_12 = arith.constant 0.000000e+00 : f32
    %13 = vector.broadcast %cst_12 : f32 to vector<1x256xf32>
    %14 = arith.maximumf %12, %13 : vector<1x256xf32>
    %15 = arith.truncf %14 : vector<1x256xf32> to vector<1x256xbf16>
    %c0_13 = arith.constant 0 : index
    %c0_14 = arith.constant 0 : index
    %16 = vector.load %arg4[%c0_13, %c0_14] : memref<256x256xbf16, #tpu.memory_space<vmem>>, vector<256x256xbf16>
    %cst_15 = arith.constant dense<0.000000e+00> : vector<1x256xf32>
    %17 = tpu.matmul %15, %16, %cst_15 {dimension_numbers = #tpu.dot_dimension_numbers<[1], [0], [0], [1], [0, 0, 1, 1], [], []>} : vector<1x256xbf16>, vector<256x256xbf16>, vector<1x256xf32> -> vector<1x256xf32>
    %c0_16 = arith.constant 0 : index
    %c0_17 = arith.constant 0 : index
    %18 = vector.load %arg7[%c0_16, %c0_17] : memref<1x256xf32, #tpu.memory_space<vmem>>, vector<1x256xf32>
    %19 = arith.addf %17, %18 : vector<1x256xf32>
    %cst_18 = arith.constant 0.000000e+00 : f32
    %20 = vector.broadcast %cst_18 : f32 to vector<1x256xf32>
    %21 = arith.maximumf %19, %20 : vector<1x256xf32>
    %22 = arith.truncf %21 : vector<1x256xf32> to vector<1x256xbf16>
    %c0_19 = arith.constant 0 : index
    %c0_20 = arith.constant 0 : index
    %23 = vector.load %arg8[%c0_19, %c0_20] : memref<256x6xbf16, #tpu.memory_space<vmem>>, vector<256x6xbf16>
    %cst_21 = arith.constant dense<0.000000e+00> : vector<1x6xf32>
    %24 = tpu.matmul %22, %23, %cst_21 {dimension_numbers = #tpu.dot_dimension_numbers<[1], [0], [0], [1], [0, 0, 1, 1], [], []>} : vector<1x256xbf16>, vector<256x6xbf16>, vector<1x6xf32> -> vector<1x6xf32>
    %c0_22 = arith.constant 0 : index
    %c0_23 = arith.constant 0 : index
    %25 = vector.load %arg9[%c0_22, %c0_23] : memref<1x6xf32, #tpu.memory_space<vmem>>, vector<1x6xf32>
    %26 = arith.addf %24, %25 : vector<1x6xf32>
    %c0_24 = arith.constant 0 : index
    %c0_25 = arith.constant 0 : index
    %c0_26 = arith.constant 0 : index
    %27 = vector.load %arg10[%c0_24, %c0_25, %c0_26] : memref<1x1x6xf32, #tpu.memory_space<vmem>>, vector<1x1x6xf32>
    %28 = vector.shape_cast %27 : vector<1x1x6xf32> to vector<1x6xf32>
    %29 = vector.shape_cast %26 : vector<1x6xf32> to vector<1x1x6xf32>
    tpu.vector_store %arg10[%c0_24, %c0_25, %c0_26], %29 {strides = array<i32>} : memref<1x1x6xf32, #tpu.memory_space<vmem>>, vector<1x1x6xf32>,
    return
  }
  func.func @transform_0(%arg0: i32) -> (i32, i32, i32, i32, i32) {
    %c0_i32 = arith.constant 0 : i32
    %c0_i32_0 = arith.constant 0 : i32
    %c0_i32_1 = arith.constant 0 : i32
    %c0_i32_2 = arith.constant 0 : i32
    %c0_i32_3 = arith.constant 0 : i32
    return %arg0, %c0_i32, %c0_i32_0, %c0_i32_1, %c0_i32_2 : i32, i32, i32, i32, i32
  }
  func.func @transform_1(%arg0: i32) -> (i32, i32) {
    %c0_i32 = arith.constant 0 : i32
    %c0_i32_0 = arith.constant 0 : i32
    %c0_i32_1 = arith.constant 0 : i32
    return %c0_i32, %c0_i32_0 : i32, i32
  }
  func.func @transform_2(%arg0: i32) -> (i32, i32) {
    %c0_i32 = arith.constant 0 : i32
    %c0_i32_0 = arith.constant 0 : i32
    %c0_i32_1 = arith.constant 0 : i32
    return %c0_i32, %c0_i32_0 : i32, i32
  }
  func.func @transform_3(%arg0: i32) -> (i32, i32) {
    %c0_i32 = arith.constant 0 : i32
    %c0_i32_0 = arith.constant 0 : i32
    %c0_i32_1 = arith.constant 0 : i32
    return %c0_i32, %c0_i32_0 : i32, i32
  }
  func.func @transform_4(%arg0: i32) -> (i32, i32) {
    %c0_i32 = arith.constant 0 : i32
    %c0_i32_0 = arith.constant 0 : i32
    %c0_i32_1 = arith.constant 0 : i32
    return %c0_i32, %c0_i32_0 : i32, i32
  }
  func.func @transform_5(%arg0: i32) -> (i32, i32) {
    %c0_i32 = arith.constant 0 : i32
    %c0_i32_0 = arith.constant 0 : i32
    %c0_i32_1 = arith.constant 0 : i32
    return %c0_i32, %c0_i32_0 : i32, i32
  }
  func.func @transform_6(%arg0: i32) -> (i32, i32) {
    %c0_i32 = arith.constant 0 : i32
    %c0_i32_0 = arith.constant 0 : i32
    %c0_i32_1 = arith.constant 0 : i32
    return %c0_i32, %c0_i32_0 : i32, i32
  }
  func.func @transform_7(%arg0: i32) -> (i32, i32) {
    %c0_i32 = arith.constant 0 : i32
    %c0_i32_0 = arith.constant 0 : i32
    %c0_i32_1 = arith.constant 0 : i32
    return %c0_i32, %c0_i32_0 : i32, i32
  }
  func.func @transform_8(%arg0: i32) -> (i32, i32) {
    %c0_i32 = arith.constant 0 : i32
    %c0_i32_0 = arith.constant 0 : i32
    %c0_i32_1 = arith.constant 0 : i32
    return %c0_i32, %c0_i32_0 : i32, i32
  }
  func.func @transform_9(%arg0: i32) -> (i32, i32, i32) {
    %c0_i32 = arith.constant 0 : i32
    %c0_i32_0 = arith.constant 0 : i32
    %c0_i32_1 = arith.constant 0 : i32
    return %arg0, %c0_i32, %c0_i32_0 : i32, i32, i32
  }
}

</mosaic_0001>

<bundles_post_ra>
// kernel: encoder_traj_forward.7
= control target key start
LH: loop header
LB: loop body
LE: loop exit
PB: predicated region body
PF: predicated region fallthrough
CT: control target
= control target key end

     0   :  { %s1033_s12 = smov 0   ;;  %s1193_s0 = inlined_call_operand.vmem [shape: bf16[2,3,2,8,64], index: 0, kind: input, shape index: {}]   ;;  %s1194_s1 = inlined_call_operand.vmem [shape: bf16[3,64,128], index: 1, kind: input, shape index: {}]   ;;  %s1195_s2 = inlined_call_operand.vmem [shape: f32[1,64], index: 2, kind: input, shape index: {}]   ;;  %s1196_s3 = inlined_call_operand.vmem [shape: bf16[2,4,16,64], index: 3, kind: output, shape index: {}]  }
   0x1 LB: > { %s759_s13 = sadd.s32 4294967295, %s1007_s12   ;;  %p763_p0 = scmp.ge.s32.totalorder %s1007_s12, 1  ;;  %s1007_s12 = sphi %s1033_s12, %s13_s12  }
   0x2   : > { %p137_p1 = scmp.lt.s32.totalorder %s1007_s12, 3 }
   0x4   : > { %p138_p2 = pnand %p763_p0, %p137_p1 }
   0x5   : > { %v977_v0 = vld [vmem:[%s1194_s1 + $0x20] sm:$0xff] (!%p138_p2)   ;;  %v1009_v1 = vmov (!%p138_p2), 0.0   ;;  %v979_v3 = vld [vmem:[%s1194_s1 + $0x28] sm:$0xff] (!%p138_p2)   ;;  %vm1010_vm0 = vmmov (!%p138_p2), 0   ;;  %p161_p3 = scmp.lt.s32.totalorder (!%p138_p2), %s759_s13, 1  ;;  %v981_v5 = vld [vmem:[%s1194_s1 + $0x30] sm:$0xff] (!%p138_p2)  }
   0x6   : > { %141 = sbr.rel (%p138_p2) target bundleno = 403 (0x193), region = 32  ;;  %876 = vmatprep.subr.bf16.mxu0 (!%p138_p2), %v1009_v1  ;;  %912 = vmatprep.subr.bf16.mxu1 (!%p138_p2), %v1009_v1  ;;  %v978_v2 = vld [vmem:[%s1194_s1 + $0x20] sm:$0xff] (!%p138_p2)   ;;  %v980_v4 = vld [vmem:[%s1194_s1 + $0x28] sm:$0xff] (!%p138_p2)   ;;  %v982_v6 = vld [vmem:[%s1194_s1 + $0x30] sm:$0xff] (!%p138_p2)   ;;  %vm226_vm1 = vcmask (!%p138_p2), 523264   ;;  %vm173_vm2 = vcmask (!%p138_p2), 519168  }
   0x7   : > { %877 = vmatpush3.bf16.msra.mxu0 (!%p138_p2), %v977_v0  ;;  %884 = vmatprep.mubr.msk.bf16.mxu0 (!%p138_p2), %vm1010_vm0, %v1009_v1  ;;  %v983_v7 = vld [vmem:[%s1194_s1 + $0x38] sm:$0xff] (!%p138_p2)   ;;  %v985_v9 = vld [vmem:[%s1194_s1] sm:$0xff] (!%p138_p2)   ;;  %v987_v13 = vld [vmem:[%s1194_s1 + $0x8] sm:$0xff] (!%p138_p2)   ;;  %v1011_v31 = vmov (!%p138_p2), 0   ;;  %vm443_vm3 = vcmask (!%p138_p2), 517120  }
   0x8   : > { %913 = vmatpush3.bf16.msra.mxu1 (!%p138_p2), %v978_v2  ;;  %878 = vmatprep.subr.bf16.mxu0 (!%p138_p2), %v1009_v1  ;;  %v984_v8 = vld [vmem:[%s1194_s1 + $0x38] sm:$0xff] (!%p138_p2)   ;;  %v986_v12 = vld [vmem:[%s1194_s1] sm:$0xff] (!%p138_p2)   ;;  %v988_v14 = vld [vmem:[%s1194_s1 + $0x8] sm:$0xff] (!%p138_p2)   ;;  %vm444_vm4 = vsmask.f32 (!%p138_p2), 1282 }
   0x9   : > { %914 = vmatprep.subr.bf16.mxu1 (!%p138_p2), %v1009_v1  ;;  %920 = vmatprep.mubr.msk.bf16.mxu1 (!%p138_p2), %vm1010_vm0, %v1009_v1  ;;  %v989_v15 = vld [vmem:[%s1194_s1 + $0x10] sm:$0xff] (!%p138_p2)   ;;  %v991_v17 = vld [vmem:[%s1194_s1 + $0x18] sm:$0xff] (!%p138_p2)   ;;  %v993_v20 = vld [vmem:[%s1194_s1 + $0x40] sm:$0xff] (!%p138_p2)  }
   0xa   : > { %v990_v16 = vld [vmem:[%s1194_s1 + $0x10] sm:$0xff] (!%p138_p2)   ;;  %v992_v18 = vld [vmem:[%s1194_s1 + $0x18] sm:$0xff] (!%p138_p2)   ;;  %v994_v22 = vld [vmem:[%s1194_s1 + $0x40] sm:$0xff] (!%p138_p2)  }
   0xb   : > { %879 = vmatpush3.bf16.msra.mxu0 (!%p138_p2), %v979_v3  ;;  %v995_v23 = vld [vmem:[%s1194_s1 + $0x48] sm:$0xff] (!%p138_p2)   ;;  %v997_v25 = vld [vmem:[%s1194_s1 + $0x50] sm:$0xff] (!%p138_p2)   ;;  %v999_v27 = vld [vmem:[%s1194_s1 + $0x58] sm:$0xff] (!%p138_p2)  }
   0xc   : > { %915 = vmatpush3.bf16.msra.mxu1 (!%p138_p2), %v980_v4  ;;  %880 = vmatprep.subr.bf16.mxu0 (!%p138_p2), %v1009_v1  ;;  %v996_v24 = vld [vmem:[%s1194_s1 + $0x48] sm:$0xff] (!%p138_p2)   ;;  %v998_v26 = vld [vmem:[%s1194_s1 + $0x50] sm:$0xff] (!%p138_p2)   ;;  %v1000_v28 = vld [vmem:[%s1194_s1 + $0x58] sm:$0xff] (!%p138_p2)  }
   0xd   : > { %s1198_s13 = smov (!%p161_p3, %s759_s13), 1  ;;  %916 = vmatprep.subr.bf16.mxu1 %v1009_v1  ;;  %v800_v42 = vld [vmem:[%s1195_s2] ss:$0 sm:$0xff]  ;;  %vm445_vm5 = vmand %vm443_vm3, %vm444_vm4 }
   0xe   : > { %s964_s24 = smul.u32 24, %s1198_s13  ;;  %s843_s17 = sshll.u32 %s1198_s13, 5 }
   0xf   : > { %881 = vmatpush3.bf16.msra.mxu0 %v981_v5  ;;  %s1173_s20 = scalar_lea.vmem %s1196_s3, %s843_s17  ;;  %s1012_s13 = smov 64  }
  0x10   : > { %s1078_s4 = scalar_lea.vmem %s1193_s0, %s964_s24  ;;  %917 = vmatpush3.bf16.msra.mxu1 %v982_v6  ;;  %882 = vmatprep.subr.bf16.mxu0 %v1009_v1  ;;  %174 = vst.msk [vmem:[%s1173_s20] sm:$0xf] %vm173_vm2, %v1011_v31  ;;  %175 = vst.msk [vmem:[%s1173_s20 + $0x4] sm:$0xf] %vm173_vm2, %v1011_v31 }
  0x11   : > { %918 = vmatprep.subr.bf16.mxu1 %v1009_v1  ;;  %v767_v10 = vld [vmem:[%s1078_s4 + $0x4] sm:$0xf]  ;;  %v805_v11 = vld [vmem:[%s1078_s4 + $0xc] sm:$0xf]  ;;  %v182_v19 = vld [vmem:[%s1078_s4] sm:$0xf] }
  0x12   : > { %v804_v21 = vld [vmem:[%s1078_s4 + $0x8] sm:$0xf]  ;;  %v824_v30 = vld [vmem:[%s1078_s4 + $0x10] sm:$0xf]  ;;  %176 = vst.msk [vmem:[%s1173_s20 + $0x8] sm:$0xf] %vm173_vm2, %v1011_v31 }
  0x13   : > { %883 = vmatpush3.bf16.msra.mxu0 %v983_v7  ;;  %v786_v29 = vld [vmem:[%s1078_s4 + $0x8] sm:$0xf]  ;;  %177 = vst.msk [vmem:[%s1173_s20 + $0xc] sm:$0xf] %vm173_vm2, %v1011_v31  ;;  %179 = vst.msk [vmem:[%s1173_s20 + $0x14] sm:$0xf] %vm173_vm2, %v1011_v31 }
  0x14   : > { %919 = vmatpush3.bf16.msra.mxu1 %v984_v8  ;;  %888 = vmatprep.subr.bf16.mxu0 %v1009_v1  ;;  %180 = vst.msk [vmem:[%s1173_s20 + $0x18] sm:$0xf] %vm173_vm2, %v1011_v31  ;;  %181 = vst.msk [vmem:[%s1173_s20 + $0x1c] sm:$0xf] %vm173_vm2, %v1011_v31 }
  0x15   : > { %924 = vmatprep.subr.bf16.mxu1 %v1009_v1  ;;  %178 = vst.msk [vmem:[%s1173_s20 + $0x10] sm:$0xf] %vm173_vm2, %v1011_v31 }
  0x16   : > { %885 = vmatmul.mubr.msk.bf16.vlgmr.msra.gmra.mrb[0].mxu0 %vm226_vm1, %v767_v10 }
  0x17   : > { %889 = vmatpush3.bf16.msra.mxu0 %v985_v9  ;;  %921 = vmatmul.mubr.msk.bf16.vlgmr.msra.gmra.mrb[0].mxu1 %vm226_vm1, %v805_v11 }
  0x18   : > { %925 = vmatpush3.bf16.msra.mxu1 %v986_v12  ;;  %890 = vmatprep.subr.bf16.mxu0 %v1009_v1 }
  0x19   : > { %926 = vmatprep.subr.bf16.mxu1 %v1009_v1  ;;  %896 = vmatprep.mubr.msk.bf16.mxu0 %vm1010_vm0, %v1009_v1  ;;  %v802_v56 = vld [vmem:[%s1173_s20 + $0x8] sm:$0x3] }
  0x1a   : > { %932 = vmatprep.mubr.msk.bf16.mxu1 %vm1010_vm0, %v1009_v1 }
  0x1b   : > { %891 = vmatpush3.bf16.msra.mxu0 %v987_v13 }
  0x1c   : > { %927 = vmatpush3.bf16.msra.mxu1 %v988_v14  ;;  %892 = vmatprep.subr.bf16.mxu0 %v1009_v1  ;;  %v839_v62 = vld [vmem:[%s1173_s20 + $0x10] sm:$0x3] }
  0x1d   : > { %928 = vmatprep.subr.bf16.mxu1 %v1009_v1 }
  0x1f   : > { %893 = vmatpush3.bf16.msra.mxu0 %v989_v15 }
  0x20   : > { %929 = vmatpush3.bf16.msra.mxu1 %v990_v16  ;;  %894 = vmatprep.subr.bf16.mxu0 %v1009_v1 }
  0x21   : > { %930 = vmatprep.subr.bf16.mxu1 %v1009_v1 }
  0x23   : > { %895 = vmatpush3.bf16.msra.mxu0 %v991_v17 }
  0x24   : > { %931 = vmatpush3.bf16.msra.mxu1 %v992_v18  ;;  %900 = vmatprep.subr.bf16.mxu0 %v1009_v1 }
  0x25   : > { %936 = vmatprep.subr.bf16.mxu1 %v1009_v1 }
  0x26   : > { %897 = vmatmul.mubr.msk.bf16.vlgmr.msra.gmra.mrb[0].mxu0 %vm226_vm1, %v182_v19 }
  0x27   : > { %901 = vmatpush3.bf16.msra.mxu0 %v993_v20  ;;  %933 = vmatmul.mubr.msk.bf16.vlgmr.msra.gmra.mrb[0].mxu1 %vm226_vm1, %v804_v21 }
  0x28   : > { %937 = vmatpush3.bf16.msra.mxu1 %v994_v22  ;;  %902 = vmatprep.subr.bf16.mxu0 %v1009_v1 }
  0x29   : > { %938 = vmatprep.subr.bf16.mxu1 %v1009_v1  ;;  %908 = vmatprep.mubr.msk.bf16.mxu0 %vm1010_vm0, %v1009_v1 }
  0x2a   : > { %944 = vmatprep.mubr.msk.bf16.mxu1 %vm1010_vm0, %v1009_v1 }
  0x2b   : > { %903 = vmatpush3.bf16.msra.mxu0 %v995_v23 }
  0x2c   : > { %939 = vmatpush3.bf16.msra.mxu1 %v996_v24  ;;  %904 = vmatprep.subr.bf16.mxu0 %v1009_v1 }
  0x2d   : > { %940 = vmatprep.subr.bf16.mxu1 %v1009_v1 }
  0x2f   : > { %905 = vmatpush3.bf16.msra.mxu0 %v997_v25 }
  0x30   : > { %941 = vmatpush3.bf16.msra.mxu1 %v998_v26  ;;  %906 = vmatprep.subr.bf16.mxu0 %v1009_v1 }
  0x31   : > { %942 = vmatprep.subr.bf16.mxu1 %v1009_v1 }
  0x33   : > { %907 = vmatpush3.bf16.msra.mxu0 %v999_v27 }
  0x34   : > { %943 = vmatpush3.bf16.msra.mxu1 %v1000_v28 }
  0x36   : > { %909 = vmatmul.mubr.msk.bf16.vlgmr.msra.gmra.mrb[0].mxu0 %vm226_vm1, %v786_v29 }
  0x37   : > { %945 = vmatmul.mubr.msk.bf16.vlgmr.msra.gmra.mrb[0].mxu1 %vm226_vm1, %v824_v30 }
 0x109   : > { %v409_v32 = vpop.f32.mrb[0].mxu0 }
 0x10a   : > { %v673_v33 = vpop.f32.mrb[0].mxu1  ;;  %v910_v34 = vpop.f32.mrb[1].mxu0  ;;  %v417_v35 = vrot.slane %v409_v32, 1 }
 0x10b   : > { %v946_v36 = vpop.f32.mrb[1].mxu1  ;;  %v412_v37 = vpop.f32.mrb[2].mxu0  ;;  %v681_v41 = vrot.slane %v673_v33, 1 }
 0x10c   : > { %v676_v38 = vpop.f32.mrb[2].mxu1  ;;  %418 = vrot.lane.b32.xlu0 %v417_v35, %s1012_s13  ;;  %v911_v39 = vpop.f32.mrb[3].mxu0 }
 0x10d   : > { %v947_v40 = vpop.f32.mrb[3].mxu1 }
 0x110   : > { %682 = vrot.lane.b32.xlu0 %v681_v41, %s1012_s13 }
 0x17e   : > { %v419_v43 = vpop.permute.xlu0 %418 }
 0x17f   : > { %v421_v44 = vadd.f32 %v419_v43, %v409_v32 }
 0x181   : > { %v428_v45 = vadd.f32 %v800_v42, %v421_v44 }
 0x182   : > { %v683_v46 = vpop.permute.xlu0 %682 }
 0x183   : > { %v429_v47 = vmax.f32 %v428_v45, 0.0  ;;  %v685_v48 = vadd.f32 %v683_v46, %v673_v33 }
 0x185   : > { %v844_v49 = vpack.c.bf16 %v429_v47, %v429_v47  ;;  %v686_v50 = vadd.f32 %v800_v42, %v685_v48 }
 0x187   : > { %v435_v51 = vshrl.u32 %v844_v49, 16  ;;  %v687_v52 = vmax.f32 %v686_v50, 0.0  ;;  %v438_v54 = vshll.u32 %v844_v49, 16 }
 0x189   : > { %v437_v53 = vrot.slane %v435_v51, 7  ;;  %v845_v55 = vpack.c.bf16 %v687_v52, %v687_v52 }
 0x18b   : > { %v440_v57 = vor.u32 %v438_v54, %v437_v53  ;;  %v693_v58 = vshrl.u32 %v845_v55, 16  ;;  %v696_v61 = vshll.u32 %v845_v55, 16 }
 0x18d   : > { %v447_v59 = vsel %vm445_vm5, %v440_v57, %v802_v56  ;;  %v695_v60 = vrot.slane %v693_v58, 7 }
 0x18e   : > { %803 = vst [vmem:[%s1173_s20 + $0x8] sm:$0x3] %v447_v59 }
 0x18f   : > { %v698_v63 = vor.u32 %v696_v61, %v695_v60 }
 0x191   : > { %v702_v0 = vsel %vm445_vm5, %v698_v63, %v839_v62 }
 0x192   : > { %840 = vst [vmem:[%s1173_s20 + $0x10] sm:$0x3] %v702_v0 }
 0x193 PF: > { %s13_s12 = sadd.s32 1, %s1007_s12  }
 0x194   : > { %p10_p4 = scmp.ge.s32.totalorder %s13_s12, 4  }
 0x196   :  { %12 = sbr.rel (!%p10_p4) target bundleno = 1 (0x1), region = 70 }

// kernel: encoder_traj_forward.8
= control target key start
LH: loop header
LB: loop body
LE: loop exit
PB: predicated region body
PF: predicated region fallthrough
CT: control target
= control target key end

     0   :  { %s886_s12 = smov 0   ;;  %s1082_s0 = inlined_call_operand.vmem [shape: bf16[2,2,2,8,128], index: 0, kind: input, shape index: {}]   ;;  %s1083_s1 = inlined_call_operand.vmem [shape: bf16[3,128,256], index: 1, kind: input, shape index: {}]   ;;  %s1084_s2 = inlined_call_operand.vmem [shape: f32[1,128], index: 2, kind: input, shape index: {}]   ;;  %s1085_s3 = inlined_call_operand.vmem [shape: bf16[2,4,16,128], index: 3, kind: output, shape index: {}]  }
   0x1 LB: > { %s677_s13 = sadd.s32 4294967295, %s863_s12   ;;  %p681_p0 = scmp.ge.s32.totalorder %s863_s12, 1  ;;  %s863_s12 = sphi %s886_s12, %s13_s12  }
   0x2   : > { %p137_p1 = scmp.lt.s32.totalorder %s863_s12, 3 }
   0x4   : > { %p138_p2 = pnand %p681_p0, %p137_p1 }
   0x5   : > { %v785_v0 = vld [vmem:[%s1083_s1 + $0x84] ss:$8 sps:$4 sm:$0xff] (!%p138_p2)   ;;  %p161_p3 = scmp.lt.s32.totalorder (!%p138_p2), %s677_s13, 1  ;;  %v865_v2 = vmov (!%p138_p2), 0   ;;  %v789_v3 = vld [vmem:[%s1083_s1 + $0x80] ss:$8 sps:$4 sm:$0xff] (!%p138_p2)  }
   0x6   : > { %141 = sbr.rel (%p138_p2) target bundleno = 300 (0x12c), region = 32  ;;  %v787_v1 = vld [vmem:[%s1083_s1 + $0x4] ss:$8 sps:$4 sm:$0xff] (!%p138_p2)   ;;  %329 = vmatprep.mubr.bf16.mxu0 (!%p138_p2), %v865_v2  ;;  %450 = vmatprep.mubr.bf16.mxu1 (!%p138_p2), %v865_v2  ;;  %v790_v4 = vld [vmem:[%s1083_s1] ss:$8 sps:$4 sm:$0xff] (!%p138_p2)   ;;  %vm616_vm0 = vcmask (!%p138_p2), 1040384  }
   0x7   : > { %297 = vmatprep.subr.bf16.mxu0 (!%p138_p2), %v785_v0  ;;  %418 = vmatprep.subr.bf16.mxu1 (!%p138_p2), %v787_v1  ;;  %v791_v5 = vld [vmem:[%s1083_s1 + $0x94] ss:$8 sps:$4 sm:$0xff] (!%p138_p2)   ;;  %v795_v7 = vld [vmem:[%s1083_s1 + $0x90] ss:$8 sps:$4 sm:$0xff] (!%p138_p2)   ;;  %v797_v9 = vld [vmem:[%s1083_s1 + $0xa4] ss:$8 sps:$4 sm:$0xff] (!%p138_p2)  }
   0x8   : > { %298 = vmatpush1.bf16.msra.mxu0 (!%p138_p2), %v789_v3  ;;  %419 = vmatpush1.bf16.msra.mxu1 (!%p138_p2), %v790_v4  ;;  %v793_v6 = vld [vmem:[%s1083_s1 + $0x14] ss:$8 sps:$4 sm:$0xff] (!%p138_p2)   ;;  %v796_v8 = vld [vmem:[%s1083_s1 + $0x10] ss:$8 sps:$4 sm:$0xff] (!%p138_p2)   ;;  %v799_v10 = vld [vmem:[%s1083_s1 + $0x24] ss:$8 sps:$4 sm:$0xff] (!%p138_p2)  }
   0x9   : > { %299 = vmatprep.subr.bf16.mxu0 (!%p138_p2), %v791_v5  ;;  %420 = vmatprep.subr.bf16.mxu1 (!%p138_p2), %v793_v6  ;;  %v801_v11 = vld [vmem:[%s1083_s1 + $0xa0] ss:$8 sps:$4 sm:$0xff] (!%p138_p2)   ;;  %v803_v13 = vld [vmem:[%s1083_s1 + $0xb4] ss:$8 sps:$4 sm:$0xff] (!%p138_p2)   ;;  %v807_v15 = vld [vmem:[%s1083_s1 + $0xb0] ss:$8 sps:$4 sm:$0xff] (!%p138_p2)  }
   0xa   : > { %v802_v12 = vld [vmem:[%s1083_s1 + $0x20] ss:$8 sps:$4 sm:$0xff] (!%p138_p2)   ;;  %v805_v14 = vld [vmem:[%s1083_s1 + $0x34] ss:$8 sps:$4 sm:$0xff] (!%p138_p2)   ;;  %v808_v16 = vld [vmem:[%s1083_s1 + $0x30] ss:$8 sps:$4 sm:$0xff] (!%p138_p2)  }
   0xb   : > { %v809_v17 = vld [vmem:[%s1083_s1 + $0xc4] ss:$8 sps:$4 sm:$0xff] (!%p138_p2)   ;;  %v813_v19 = vld [vmem:[%s1083_s1 + $0xc0] ss:$8 sps:$4 sm:$0xff] (!%p138_p2)   ;;  %v815_v21 = vld [vmem:[%s1083_s1 + $0xd4] ss:$8 sps:$4 sm:$0xff] (!%p138_p2)  }
   0xc   : > { %300 = vmatpush1.bf16.msra.mxu0 (!%p138_p2), %v795_v7  ;;  %421 = vmatpush1.bf16.msra.mxu1 (!%p138_p2), %v796_v8  ;;  %v811_v18 = vld [vmem:[%s1083_s1 + $0x44] ss:$8 sps:$4 sm:$0xff] (!%p138_p2)   ;;  %v814_v20 = vld [vmem:[%s1083_s1 + $0x40] ss:$8 sps:$4 sm:$0xff] (!%p138_p2)   ;;  %v817_v22 = vld [vmem:[%s1083_s1 + $0x54] ss:$8 sps:$4 sm:$0xff] (!%p138_p2)  }
   0xd   : > { %s1087_s13 = smov (!%p161_p3, %s677_s13), 1  ;;  %301 = vmatprep.subr.bf16.mxu0 %v797_v9  ;;  %422 = vmatprep.subr.bf16.mxu1 %v799_v10  ;;  %v819_v23 = vld [vmem:[%s1083_s1 + $0xd0] ss:$8 sps:$4 sm:$0xff]   ;;  %v821_v25 = vld [vmem:[%s1083_s1 + $0xe4] ss:$8 sps:$4 sm:$0xff]  }
   0xe   : > { %s774_s30 = sshll.u32 %s1087_s13, 5  ;;  %v820_v24 = vld [vmem:[%s1083_s1 + $0x50] ss:$8 sps:$4 sm:$0xff]   ;;  %v823_v26 = vld [vmem:[%s1083_s1 + $0x64] ss:$8 sps:$4 sm:$0xff]   ;;  %s773_s29 = sshll.u32 %s1087_s13, 4 }
   0xf   : > { %s929_s8 = scalar_lea.vmem %s1085_s3, %s774_s30  ;;  %v825_v27 = vld [vmem:[%s1083_s1 + $0xe0] ss:$8 sps:$4 sm:$0xff]   ;;  %v827_v29 = vld [vmem:[%s1083_s1 + $0xf4] ss:$8 sps:$4 sm:$0xff]   ;;  %v831_v31 = vld [vmem:[%s1083_s1 + $0xf0] ss:$8 sps:$4 sm:$0xff]   ;;  %s1020_s10 = scalar_lea.vmem %s1082_s0, %s773_s29 }
  0x10   : > { %173 = vst [vmem:[%s929_s8] sm:$0xf] %v865_v2  ;;  %174 = vst [vmem:[%s929_s8 + $0x4] sm:$0xf] %v865_v2  ;;  %302 = vmatpush1.bf16.msra.mxu0 %v801_v11  ;;  %423 = vmatpush1.bf16.msra.mxu1 %v802_v12  ;;  %v826_v28 = vld [vmem:[%s1083_s1 + $0x60] ss:$8 sps:$4 sm:$0xff]  }
  0x11   : > { %176 = vst [vmem:[%s929_s8 + $0xc] sm:$0xf] %v865_v2  ;;  %177 = vst [vmem:[%s929_s8 + $0x10] sm:$0xf] %v865_v2  ;;  %303 = vmatprep.subr.bf16.mxu0 %v803_v13  ;;  %424 = vmatprep.subr.bf16.mxu1 %v805_v14  ;;  %v829_v30 = vld [vmem:[%s1083_s1 + $0x74] ss:$8 sps:$4 sm:$0xff]  }
  0x12   : > { %178 = vst [vmem:[%s929_s8 + $0x14] sm:$0xf] %v865_v2  ;;  %179 = vst [vmem:[%s929_s8 + $0x18] sm:$0xf] %v865_v2  ;;  %v832_v32 = vld [vmem:[%s1083_s1 + $0x70] ss:$8 sps:$4 sm:$0xff]  }
  0x13   : > { %180 = vst [vmem:[%s929_s8 + $0x1c] sm:$0xf] %v865_v2  ;;  %175 = vst [vmem:[%s929_s8 + $0x8] sm:$0xf] %v865_v2  ;;  %v835_v33 = vld [vmem:[%s1083_s1 + $0x104] ss:$8 sps:$4 sm:$0xff]  }
  0x14   : > { %304 = vmatpush1.bf16.msra.mxu0 %v807_v15  ;;  %425 = vmatpush1.bf16.msra.mxu1 %v808_v16  ;;  %v686_v34 = vld [vmem:[%s1020_s10 + $0x4] sm:$0xf]  ;;  %v181_v35 = vld [vmem:[%s1020_s10] sm:$0xf]  ;;  %v838_v37 = vld [vmem:[%s1083_s1 + $0x114] ss:$8 sps:$4 sm:$0xff]  }
  0x15   : > { %305 = vmatprep.subr.bf16.mxu0 %v809_v17  ;;  %426 = vmatprep.subr.bf16.mxu1 %v811_v18  ;;  %v833_v36 = vld [vmem:[%s1083_s1 + $0x100] ss:$8 sps:$4 sm:$0xff]   ;;  %v836_v38 = vld [vmem:[%s1083_s1 + $0x110] ss:$8 sps:$4 sm:$0xff]   ;;  %v841_v39 = vld [vmem:[%s1083_s1 + $0x124] ss:$8 sps:$4 sm:$0xff]  }
  0x16   : > { %v839_v40 = vld [vmem:[%s1083_s1 + $0x120] ss:$8 sps:$4 sm:$0xff]   ;;  %v844_v41 = vld [vmem:[%s1083_s1 + $0x134] ss:$8 sps:$4 sm:$0xff]   ;;  %v842_v42 = vld [vmem:[%s1083_s1 + $0x130] ss:$8 sps:$4 sm:$0xff]  }
  0x17   : > { %v847_v43 = vld [vmem:[%s1083_s1 + $0x144] ss:$8 sps:$4 sm:$0xff]   ;;  %v845_v44 = vld [vmem:[%s1083_s1 + $0x140] ss:$8 sps:$4 sm:$0xff]   ;;  %v850_v45 = vld [vmem:[%s1083_s1 + $0x154] ss:$8 sps:$4 sm:$0xff]  }
  0x18   : > { %306 = vmatpush1.bf16.msra.mxu0 %v813_v19  ;;  %427 = vmatpush1.bf16.msra.mxu1 %v814_v20  ;;  %v848_v46 = vld [vmem:[%s1083_s1 + $0x150] ss:$8 sps:$4 sm:$0xff]   ;;  %v853_v47 = vld [vmem:[%s1083_s1 + $0x164] ss:$8 sps:$4 sm:$0xff]   ;;  %v851_v48 = vld [vmem:[%s1083_s1 + $0x160] ss:$8 sps:$4 sm:$0xff]  }
  0x19   : > { %307 = vmatprep.subr.bf16.mxu0 %v815_v21  ;;  %428 = vmatprep.subr.bf16.mxu1 %v817_v22  ;;  %v856_v49 = vld [vmem:[%s1083_s1 + $0x174] ss:$8 sps:$4 sm:$0xff]   ;;  %v854_v50 = vld [vmem:[%s1083_s1 + $0x170] ss:$8 sps:$4 sm:$0xff]   ;;  %v735_v51 = vld [vmem:[%s1020_s10 + $0x8] sm:$0xf] }
  0x1a   : > { %v172_v5 = vld [vmem:[%s1084_s2] sm:$0x1]  ;;  %vm617_vm1 = vsmask.f32 7938  ;;  %v769_v10 = vld [vmem:[%s929_s8 + $0x8] sm:$0x1] }
  0x1b   : > { %vm618_vm2 = vmand %vm616_vm0, %vm617_vm1 }
  0x1c   : > { %308 = vmatpush1.bf16.msra.mxu0 %v819_v23  ;;  %429 = vmatpush1.bf16.msra.mxu1 %v820_v24 }
  0x1d   : > { %309 = vmatprep.subr.bf16.mxu0 %v821_v25  ;;  %430 = vmatprep.subr.bf16.mxu1 %v823_v26 }
  0x20   : > { %310 = vmatpush1.bf16.msra.mxu0 %v825_v27  ;;  %431 = vmatpush1.bf16.msra.mxu1 %v826_v28 }
  0x21   : > { %311 = vmatprep.subr.bf16.mxu0 %v827_v29  ;;  %432 = vmatprep.subr.bf16.mxu1 %v829_v30 }
  0x24   : > { %312 = vmatpush1.bf16.msra.mxu0 %v831_v31  ;;  %433 = vmatpush1.bf16.msra.mxu1 %v832_v32 }
  0x25   : > { %558 = vmatprep.subr.bf16.mxu0 %v835_v33 }
  0x27   : > { %330 = vmatmul.mubr.bf16.vlgmr.msra.gmra.mrb[0].mxu0 %v686_v34  ;;  %451 = vmatmul.mubr.bf16.vlgmr.msra.gmra.mrb[0].mxu1 %v181_v35 }
  0x28   : > { %559 = vmatpush1.bf16.msra.mxu0 %v833_v36  ;;  %590 = vmatprep.mubr.bf16.mxu0 %v865_v2 }
  0x29   : > { %560 = vmatprep.subr.bf16.mxu0 %v838_v37 }
  0x2c   : > { %561 = vmatpush1.bf16.msra.mxu0 %v836_v38 }
  0x2d   : > { %562 = vmatprep.subr.bf16.mxu0 %v841_v39 }
  0x30   : > { %563 = vmatpush1.bf16.msra.mxu0 %v839_v40 }
  0x31   : > { %564 = vmatprep.subr.bf16.mxu0 %v844_v41 }
  0x34   : > { %565 = vmatpush1.bf16.msra.mxu0 %v842_v42 }
  0x35   : > { %566 = vmatprep.subr.bf16.mxu0 %v847_v43 }
  0x38   : > { %567 = vmatpush1.bf16.msra.mxu0 %v845_v44 }
  0x39   : > { %568 = vmatprep.subr.bf16.mxu0 %v850_v45 }
  0x3c   : > { %569 = vmatpush1.bf16.msra.mxu0 %v848_v46 }
  0x3d   : > { %570 = vmatprep.subr.bf16.mxu0 %v853_v47 }
  0x40   : > { %571 = vmatpush1.bf16.msra.mxu0 %v851_v48 }
  0x41   : > { %572 = vmatprep.subr.bf16.mxu0 %v856_v49 }
  0x44   : > { %573 = vmatpush1.bf16.msra.mxu0 %v854_v50 }
  0x47   : > { %591 = vmatmul.mubr.bf16.vlgmr.msra.gmra.mrb[4].mxu0 %v735_v51 }
  0xfa   : > { %v331_v52 = vpop.f32.mrb[0].mxu0  ;;  %v452_v53 = vpop.f32.mrb[0].mxu1 }
  0xfb   : > { %v453_v54 = vadd.f32 %v452_v53, %v331_v52  ;;  %v333_v55 = vpop.f32.mrb[1].mxu0  ;;  %v454_v56 = vpop.f32.mrb[1].mxu1 }
  0xfc   : > { %v455_v57 = vadd.f32 %v454_v56, %v333_v55  ;;  %v335_v58 = vpop.f32.mrb[2].mxu0  ;;  %v456_v59 = vpop.f32.mrb[2].mxu1 }
  0xfd   : > { %v336_v60 = vpop.f32.mrb[3].mxu0  ;;  %v457_v61 = vpop.f32.mrb[3].mxu1 }
 0x11a   : > { %v592_v62 = vpop.f32.mrb[4].mxu0 }
 0x11b   : > { %v599_v63 = vadd.f32 %v592_v62, %v453_v54  ;;  %v594_v0 = vpop.f32.mrb[5].mxu0 }
 0x11c   : > { %v600_v1 = vadd.f32 %v594_v0, %v455_v57  ;;  %v596_v2 = vpop.f32.mrb[6].mxu0 }
 0x11d   : > { %v597_v3 = vpop.f32.mrb[7].mxu0 }
 0x11e   : > { %v602_v4 = vrot.slane %v600_v1, 1 }
 0x120   : > { %v604_v6 = vadd.f32 %v602_v4, %v599_v63 }
 0x122   : > { %v605_v7 = vadd.f32 %v604_v6, %v172_v5 }
 0x124   : > { %v606_v8 = vmax.f32 %v605_v7, 0.0 }
 0x126   : > { %v775_v9 = vpack.c.bf16 %v606_v8, %v606_v8 }
 0x128   : > { %v612_v11 = vshll.u32 %v775_v9, 16 }
 0x12a   : > { %v620_v12 = vsel %vm618_vm2, %v612_v11, %v769_v10 }
 0x12b   : > { %770 = vst [vmem:[%s929_s8 + $0x8] sm:$0x1] %v620_v12 }
 0x12c PF: > { %s13_s12 = sadd.s32 1, %s863_s12  }
 0x12d   : > { %p10_p4 = scmp.ge.s32.totalorder %s13_s12, 4  }
 0x12f   :  { %12 = sbr.rel (!%p10_p4) target bundleno = 1 (0x1), region = 67 }

// kernel: encoder_traj_forward.6
= control target key start
LH: loop header
LB: loop body
LE: loop exit
PB: predicated region body
PF: predicated region fallthrough
CT: control target
= control target key end

     0   :  { %s2133_s12 = smov 0   ;;  %s2436_s0 = inlined_call_operand.vmem [shape: bf16[2,6,2,8,32], index: 0, kind: input, shape index: {}]   ;;  %s2437_s1 = inlined_call_operand.vmem [shape: bf16[5,32,96], index: 1, kind: input, shape index: {}]   ;;  %s2438_s2 = inlined_call_operand.vmem [shape: f32[1,32], index: 2, kind: input, shape index: {}]   ;;  %s2439_s3 = inlined_call_operand.vmem [shape: bf16[2,6,16,32], index: 3, kind: output, shape index: {}]  }
   0x1 LB: > { %s1593_s13 = sadd.s32 4294967295, %s2106_s12   ;;  %p1597_p0 = scmp.ge.s32.totalorder %s2106_s12, 1  ;;  %s2106_s12 = sphi %s2133_s12, %s13_s12  }
   0x2   : > { %p137_p1 = scmp.lt.s32.totalorder %s2106_s12, 3 }
   0x4   : > { %p138_p2 = pnand %p1597_p0, %p137_p1 }
   0x5   : > { %v2060_v0 = vld [vmem:[%s2437_s1 + $0x10] sm:$0xff] (!%p138_p2)   ;;  %v2108_v1 = vmov (!%p138_p2), 0.0   ;;  %v2062_v3 = vld [vmem:[%s2437_s1 + $0x18] sm:$0xff] (!%p138_p2)   ;;  %vm2109_vm0 = vmmov (!%p138_p2), 0   ;;  %p161_p3 = scmp.lt.s32.totalorder (!%p138_p2), %s1593_s13, 1  ;;  %v2064_v5 = vld [vmem:[%s2437_s1] sm:$0xff] (!%p138_p2)  }
   0x6   : > { %141 = sbr.rel (%p138_p2) target bundleno = 475 (0x1db), region = 32  ;;  %1822 = vmatprep.subr.bf16.mxu0 (!%p138_p2), %v2108_v1  ;;  %1862 = vmatprep.subr.bf16.mxu1 (!%p138_p2), %v2108_v1  ;;  %v2061_v2 = vld [vmem:[%s2437_s1 + $0x10] sm:$0xff] (!%p138_p2)   ;;  %v2063_v4 = vld [vmem:[%s2437_s1 + $0x18] sm:$0xff] (!%p138_p2)   ;;  %vm210_vm1 = vcmask (!%p138_p2), 261120   ;;  %v2065_v6 = vld [vmem:[%s2437_s1] sm:$0xff] (!%p138_p2)   ;;  %vm173_vm2 = vcmask (!%p138_p2), 257024  }
   0x7   : > { %1823 = vmatpush3.bf16.msra.mxu0 (!%p138_p2), %v2060_v0  ;;  %1826 = vmatprep.mubr.msk.bf16.mxu0 (!%p138_p2), %vm2109_vm0, %v2108_v1  ;;  %v2066_v9 = vld [vmem:[%s2437_s1 + $0x8] sm:$0xff] (!%p138_p2)   ;;  %v2068_v11 = vld [vmem:[%s2437_s1 + $0x20] sm:$0xff] (!%p138_p2)   ;;  %v2072_v19 = vld [vmem:[%s2437_s1 + $0x30] sm:$0xff] (!%p138_p2)   ;;  %v2110_v61 = vmov (!%p138_p2), 0   ;;  %vm530_vm3 = vcmask (!%p138_p2), 256000  }
   0x8   : > { %1863 = vmatpush3.bf16.msra.mxu1 (!%p138_p2), %v2061_v2  ;;  %1824 = vmatprep.subr.bf16.mxu0 (!%p138_p2), %v2108_v1  ;;  %v2067_v10 = vld [vmem:[%s2437_s1 + $0x8] sm:$0xff] (!%p138_p2)   ;;  %v2069_v14 = vld [vmem:[%s2437_s1 + $0x20] sm:$0xff] (!%p138_p2)   ;;  %v2073_v20 = vld [vmem:[%s2437_s1 + $0x30] sm:$0xff] (!%p138_p2)   ;;  %vm531_vm4 = vsmask.f32 (!%p138_p2), 2306 }
   0x9   : > { %1864 = vmatprep.subr.bf16.mxu1 (!%p138_p2), %v2108_v1  ;;  %1866 = vmatprep.mubr.msk.bf16.mxu1 (!%p138_p2), %vm2109_vm0, %v2108_v1  ;;  %v2070_v15 = vld [vmem:[%s2437_s1 + $0x28] sm:$0xff] (!%p138_p2)   ;;  %v2074_v21 = vld [vmem:[%s2437_s1 + $0x38] sm:$0xff] (!%p138_p2)   ;;  %v2076_v25 = vld [vmem:[%s2437_s1 + $0x40] sm:$0xff] (!%p138_p2)  }
   0xa   : > { %v2071_v16 = vld [vmem:[%s2437_s1 + $0x28] sm:$0xff] (!%p138_p2)   ;;  %v2075_v22 = vld [vmem:[%s2437_s1 + $0x38] sm:$0xff] (!%p138_p2)   ;;  %v2077_v26 = vld [vmem:[%s2437_s1 + $0x40] sm:$0xff] (!%p138_p2)  }
   0xb   : > { %1825 = vmatpush3.bf16.msra.mxu0 (!%p138_p2), %v2062_v3  ;;  %v2078_v27 = vld [vmem:[%s2437_s1 + $0x48] sm:$0xff] (!%p138_p2)   ;;  %v2080_v31 = vld [vmem:[%s2437_s1 + $0x10] sm:$0xff] (!%p138_p2)   ;;  %v2082_v33 = vld [vmem:[%s2437_s1 + $0x18] sm:$0xff] (!%p138_p2)  }
   0xc   : > { %1865 = vmatpush3.bf16.msra.mxu1 (!%p138_p2), %v2063_v4  ;;  %1830 = vmatprep.subr.bf16.mxu0 (!%p138_p2), %v2108_v1  ;;  %v2079_v28 = vld [vmem:[%s2437_s1 + $0x48] sm:$0xff] (!%p138_p2)   ;;  %v2081_v32 = vld [vmem:[%s2437_s1 + $0x10] sm:$0xff] (!%p138_p2)   ;;  %v2083_v34 = vld [vmem:[%s2437_s1 + $0x18] sm:$0xff] (!%p138_p2)  }
   0xd   : > { %s2443_s13 = smov (!%p161_p3, %s1593_s13), 1  ;;  %1870 = vmatprep.subr.bf16.mxu1 %v2108_v1  ;;  %v2084_v37 = vld [vmem:[%s2437_s1] sm:$0xff]   ;;  %v2086_v39 = vld [vmem:[%s2437_s1 + $0x8] sm:$0xff]   ;;  %v2092_v49 = vld [vmem:[%s2437_s1 + $0x30] sm:$0xff]  }
   0xe   : > { %s2046_s22 = smul.u32 48, %s2443_s13  ;;  %v2085_v38 = vld [vmem:[%s2437_s1] sm:$0xff]   ;;  %v2087_v40 = vld [vmem:[%s2437_s1 + $0x8] sm:$0xff]   ;;  %v2093_v50 = vld [vmem:[%s2437_s1 + $0x30] sm:$0xff]   ;;  %s2111_s13 = smov 64  }
   0xf   : > { %v2088_v43 = vld [vmem:[%s2437_s1 + $0x20] sm:$0xff]   ;;  %v2090_v45 = vld [vmem:[%s2437_s1 + $0x28] sm:$0xff]   ;;  %v2094_v51 = vld [vmem:[%s2437_s1 + $0x38] sm:$0xff]  }
  0x10   : > { %s2176_s29 = scalar_lea.vmem %s2436_s0, %s2046_s22  ;;  %v2089_v44 = vld [vmem:[%s2437_s1 + $0x20] sm:$0xff]   ;;  %v2091_v46 = vld [vmem:[%s2437_s1 + $0x28] sm:$0xff]   ;;  %v2095_v52 = vld [vmem:[%s2437_s1 + $0x38] sm:$0xff]   ;;  %s2396_s4 = scalar_lea.vmem %s2439_s3, %s2046_s22 }
  0x11   : > { %v1600_v7 = vld [vmem:[%s2176_s29 + $0x4] sm:$0xf]  ;;  %v1640_v8 = vld [vmem:[%s2176_s29 + $0xc] sm:$0xf]  ;;  %v186_v12 = vld [vmem:[%s2176_s29] sm:$0xf] }
  0x12   : > { %1827 = vmatmul.mubr.msk.bf16.vlgmr.msra.gmra.mrb[0].mxu0 %vm210_vm1, %v1600_v7  ;;  %1867 = vmatmul.mubr.msk.bf16.vlgmr.msra.gmra.mrb[0].mxu1 %vm210_vm1, %v1640_v8  ;;  %v1639_v13 = vld [vmem:[%s2176_s29 + $0x8] sm:$0xf]  ;;  %v1651_v18 = vld [vmem:[%s2176_s29 + $0x10] sm:$0xf]  ;;  %v1619_v23 = vld [vmem:[%s2176_s29 + $0xc] sm:$0xf] }
  0x13   : > { %1831 = vmatpush3.bf16.msra.mxu0 %v2064_v5  ;;  %1871 = vmatpush3.bf16.msra.mxu1 %v2065_v6  ;;  %v1611_v17 = vld [vmem:[%s2176_s29 + $0x8] sm:$0xf]  ;;  %v1659_v24 = vld [vmem:[%s2176_s29 + $0x14] sm:$0xf]  ;;  %v1627_v29 = vld [vmem:[%s2176_s29 + $0x10] sm:$0xf] }
  0x14   : > { %1832 = vmatprep.subr.bf16.mxu0 %v2108_v1  ;;  %1872 = vmatprep.subr.bf16.mxu1 %v2108_v1  ;;  %v1667_v30 = vld [vmem:[%s2176_s29 + $0x18] sm:$0xf]  ;;  %v1679_v35 = vld [vmem:[%s2176_s29 + $0x14] sm:$0xf]  ;;  %v1718_v36 = vld [vmem:[%s2176_s29 + $0x1c] sm:$0xf] }
  0x15   : > { %1834 = vmatprep.mubr.msk.bf16.mxu0 %vm2109_vm0, %v2108_v1  ;;  %1874 = vmatprep.mubr.msk.bf16.mxu1 %vm2109_vm0, %v2108_v1  ;;  %v1678_v41 = vld [vmem:[%s2176_s29 + $0x10] sm:$0xf]  ;;  %v1717_v42 = vld [vmem:[%s2176_s29 + $0x18] sm:$0xf]  ;;  %v1729_v48 = vld [vmem:[%s2176_s29 + $0x20] sm:$0xf] }
  0x16   : > { %v1690_v47 = vld [vmem:[%s2176_s29 + $0x18] sm:$0xf]  ;;  %v1698_v53 = vld [vmem:[%s2176_s29 + $0x1c] sm:$0xf]  ;;  %v1737_v54 = vld [vmem:[%s2176_s29 + $0x24] sm:$0xf] }
  0x17   : > { %1833 = vmatpush3.bf16.msra.mxu0 %v2066_v9  ;;  %1873 = vmatpush3.bf16.msra.mxu1 %v2067_v10  ;;  %v2096_v55 = vld [vmem:[%s2437_s1 + $0x40] sm:$0xff]   ;;  %v2098_v57 = vld [vmem:[%s2437_s1 + $0x48] sm:$0xff]   ;;  %174 = vst.msk [vmem:[%s2396_s4] sm:$0xf] %vm173_vm2, %v2110_v61  ;;  %175 = vst.msk [vmem:[%s2396_s4 + $0x4] sm:$0xf] %vm173_vm2, %v2110_v61 }
  0x18   : > { %1838 = vmatprep.subr.bf16.mxu0 %v2108_v1  ;;  %1878 = vmatprep.subr.bf16.mxu1 %v2108_v1  ;;  %v2097_v56 = vld [vmem:[%s2437_s1 + $0x40] sm:$0xff]   ;;  %v2099_v58 = vld [vmem:[%s2437_s1 + $0x48] sm:$0xff]   ;;  %177 = vst.msk [vmem:[%s2396_s4 + $0xc] sm:$0xf] %vm173_vm2, %v2110_v61  ;;  %178 = vst.msk [vmem:[%s2396_s4 + $0x10] sm:$0xf] %vm173_vm2, %v2110_v61 }
  0x19   : > { %v1706_v59 = vld [vmem:[%s2176_s29 + $0x20] sm:$0xf]  ;;  %v1745_v60 = vld [vmem:[%s2176_s29 + $0x28] sm:$0xf]  ;;  %179 = vst.msk [vmem:[%s2396_s4 + $0x14] sm:$0xf] %vm173_vm2, %v2110_v61  ;;  %vm2413_vm5 = vmand %vm530_vm3, %vm531_vm4 }
  0x1a   : > { %181 = vst.msk [vmem:[%s2396_s4 + $0x1c] sm:$0xf] %vm173_vm2, %v2110_v61  ;;  %183 = vst.msk [vmem:[%s2396_s4 + $0x24] sm:$0xf] %vm173_vm2, %v2110_v61  ;;  %s2112_s22 = smov 96  }
  0x1b   : > { %184 = vst.msk [vmem:[%s2396_s4 + $0x28] sm:$0xf] %vm173_vm2, %v2110_v61  ;;  %185 = vst.msk [vmem:[%s2396_s4 + $0x2c] sm:$0xf] %vm173_vm2, %v2110_v61 }
  0x1c   : > { %176 = vst.msk [vmem:[%s2396_s4 + $0x8] sm:$0xf] %vm173_vm2, %v2110_v61  ;;  %180 = vst.msk [vmem:[%s2396_s4 + $0x18] sm:$0xf] %vm173_vm2, %v2110_v61 }
  0x1d   : > { %182 = vst.msk [vmem:[%s2396_s4 + $0x20] sm:$0xf] %vm173_vm2, %v2110_v61 }
  0x1e   : > { %1835 = vmatmul.mubr.msk.bf16.vlgmr.msra.gmra.mrb[0].mxu0 %vm210_vm1, %v186_v12  ;;  %1875 = vmatmul.mubr.msk.bf16.vlgmr.msra.gmra.mrb[0].mxu1 %vm210_vm1, %v1639_v13 }
  0x1f   : > { %1839 = vmatpush3.bf16.msra.mxu0 %v2068_v11  ;;  %1879 = vmatpush3.bf16.msra.mxu1 %v2069_v14 }
  0x20   : > { %1840 = vmatprep.subr.bf16.mxu0 %v2108_v1  ;;  %1880 = vmatprep.subr.bf16.mxu1 %v2108_v1 }
  0x21   : > { %1842 = vmatprep.mubr.msk.bf16.mxu0 %vm2109_vm0, %v2108_v1  ;;  %1882 = vmatprep.mubr.msk.bf16.mxu1 %vm2109_vm0, %v2108_v1 }
  0x23   : > { %1841 = vmatpush3.bf16.msra.mxu0 %v2070_v15  ;;  %1881 = vmatpush3.bf16.msra.mxu1 %v2071_v16 }
  0x24   : > { %1846 = vmatprep.subr.bf16.mxu0 %v2108_v1  ;;  %1886 = vmatprep.subr.bf16.mxu1 %v2108_v1 }
  0x2a   : > { %1843 = vmatmul.mubr.msk.bf16.vlgmr.msra.gmra.mrb[0].mxu0 %vm210_vm1, %v1611_v17  ;;  %1883 = vmatmul.mubr.msk.bf16.vlgmr.msra.gmra.mrb[0].mxu1 %vm210_vm1, %v1651_v18 }
  0x2b   : > { %1847 = vmatpush3.bf16.msra.mxu0 %v2072_v19  ;;  %1887 = vmatpush3.bf16.msra.mxu1 %v2073_v20 }
  0x2c   : > { %1848 = vmatprep.subr.bf16.mxu0 %v2108_v1  ;;  %1888 = vmatprep.subr.bf16.mxu1 %v2108_v1 }
  0x2d   : > { %1850 = vmatprep.mubr.msk.bf16.mxu0 %vm2109_vm0, %v2108_v1  ;;  %1890 = vmatprep.mubr.msk.bf16.mxu1 %vm2109_vm0, %v2108_v1 }
  0x2f   : > { %1849 = vmatpush3.bf16.msra.mxu0 %v2074_v21  ;;  %1889 = vmatpush3.bf16.msra.mxu1 %v2075_v22 }
  0x30   : > { %1854 = vmatprep.subr.bf16.mxu0 %v2108_v1  ;;  %1894 = vmatprep.subr.bf16.mxu1 %v2108_v1 }
  0x36   : > { %1851 = vmatmul.mubr.msk.bf16.vlgmr.msra.gmra.mrb[0].mxu0 %vm210_vm1, %v1619_v23  ;;  %1891 = vmatmul.mubr.msk.bf16.vlgmr.msra.gmra.mrb[0].mxu1 %vm210_vm1, %v1659_v24 }
  0x37   : > { %1855 = vmatpush3.bf16.msra.mxu0 %v2076_v25  ;;  %1895 = vmatpush3.bf16.msra.mxu1 %v2077_v26  ;;  %v1635_v26 = vld [vmem:[%s2438_s2] ss:$0 sm:$0xff] }
  0x38   : > { %1856 = vmatprep.subr.bf16.mxu0 %v2108_v1  ;;  %1896 = vmatprep.subr.bf16.mxu1 %v2108_v1 }
  0x39   : > { %1858 = vmatprep.mubr.msk.bf16.mxu0 %vm2109_vm0, %v2108_v1  ;;  %1898 = vmatprep.mubr.msk.bf16.mxu1 %vm2109_vm0, %v2108_v1 }
  0x3b   : > { %1857 = vmatpush3.bf16.msra.mxu0 %v2078_v27  ;;  %1897 = vmatpush3.bf16.msra.mxu1 %v2079_v28 }
  0x3c   : > { %1902 = vmatprep.subr.bf16.mxu0 %v2108_v1  ;;  %1942 = vmatprep.subr.bf16.mxu1 %v2108_v1 }
  0x42   : > { %1859 = vmatmul.mubr.msk.bf16.vlgmr.msra.gmra.mrb[0].mxu0 %vm210_vm1, %v1627_v29  ;;  %1899 = vmatmul.mubr.msk.bf16.vlgmr.msra.gmra.mrb[0].mxu1 %vm210_vm1, %v1667_v30 }
  0x43   : > { %1903 = vmatpush3.bf16.msra.mxu0 %v2080_v31  ;;  %1943 = vmatpush3.bf16.msra.mxu1 %v2081_v32 }
  0x44   : > { %1904 = vmatprep.subr.bf16.mxu0 %v2108_v1  ;;  %1944 = vmatprep.subr.bf16.mxu1 %v2108_v1 }
  0x45   : > { %1906 = vmatprep.mubr.msk.bf16.mxu0 %vm2109_vm0, %v2108_v1  ;;  %1946 = vmatprep.mubr.msk.bf16.mxu1 %vm2109_vm0, %v2108_v1 }
  0x47   : > { %1905 = vmatpush3.bf16.msra.mxu0 %v2082_v33  ;;  %1945 = vmatpush3.bf16.msra.mxu1 %v2083_v34 }
  0x48   : > { %1910 = vmatprep.subr.bf16.mxu0 %v2108_v1  ;;  %1950 = vmatprep.subr.bf16.mxu1 %v2108_v1 }
  0x4a   : > { %1907 = vmatmul.mubr.msk.bf16.vlgmr.msra.gmra.mrb[4].mxu0 %vm210_vm1, %v1679_v35  ;;  %1947 = vmatmul.mubr.msk.bf16.vlgmr.msra.gmra.mrb[4].mxu1 %vm210_vm1, %v1718_v36 }
  0x4b   : > { %1911 = vmatpush3.bf16.msra.mxu0 %v2084_v37  ;;  %1951 = vmatpush3.bf16.msra.mxu1 %v2085_v38 }
  0x4c   : > { %1912 = vmatprep.subr.bf16.mxu0 %v2108_v1  ;;  %1952 = vmatprep.subr.bf16.mxu1 %v2108_v1 }
  0x4d   : > { %1914 = vmatprep.mubr.msk.bf16.mxu0 %vm2109_vm0, %v2108_v1  ;;  %1954 = vmatprep.mubr.msk.bf16.mxu1 %vm2109_vm0, %v2108_v1 }
  0x4f   : > { %1913 = vmatpush3.bf16.msra.mxu0 %v2086_v39  ;;  %1953 = vmatpush3.bf16.msra.mxu1 %v2087_v40 }
  0x50   : > { %1918 = vmatprep.subr.bf16.mxu0 %v2108_v1  ;;  %1958 = vmatprep.subr.bf16.mxu1 %v2108_v1 }
  0x56   : > { %1915 = vmatmul.mubr.msk.bf16.vlgmr.msra.gmra.mrb[4].mxu0 %vm210_vm1, %v1678_v41  ;;  %1955 = vmatmul.mubr.msk.bf16.vlgmr.msra.gmra.mrb[4].mxu1 %vm210_vm1, %v1717_v42  ;;  %v1676_v42 = vld [vmem:[%s2396_s4 + $0x10] sm:$0x7] }
  0x57   : > { %1919 = vmatpush3.bf16.msra.mxu0 %v2088_v43  ;;  %1959 = vmatpush3.bf16.msra.mxu1 %v2089_v44 }
  0x58   : > { %1920 = vmatprep.subr.bf16.mxu0 %v2108_v1  ;;  %1960 = vmatprep.subr.bf16.mxu1 %v2108_v1 }
  0x59   : > { %1922 = vmatprep.mubr.msk.bf16.mxu0 %vm2109_vm0, %v2108_v1  ;;  %1962 = vmatprep.mubr.msk.bf16.mxu1 %vm2109_vm0, %v2108_v1 }
  0x5b   : > { %1921 = vmatpush3.bf16.msra.mxu0 %v2090_v45  ;;  %1961 = vmatpush3.bf16.msra.mxu1 %v2091_v46  ;;  %v1637_v46 = vld [vmem:[%s2396_s4 + $0x8] sm:$0x7] }
  0x5c   : > { %1926 = vmatprep.subr.bf16.mxu0 %v2108_v1  ;;  %1966 = vmatprep.subr.bf16.mxu1 %v2108_v1 }
  0x62   : > { %1923 = vmatmul.mubr.msk.bf16.vlgmr.msra.gmra.mrb[4].mxu0 %vm210_vm1, %v1690_v47  ;;  %1963 = vmatmul.mubr.msk.bf16.vlgmr.msra.gmra.mrb[4].mxu1 %vm210_vm1, %v1729_v48 }
  0x63   : > { %1927 = vmatpush3.bf16.msra.mxu0 %v2092_v49  ;;  %1967 = vmatpush3.bf16.msra.mxu1 %v2093_v50 }
  0x64   : > { %1928 = vmatprep.subr.bf16.mxu0 %v2108_v1  ;;  %1968 = vmatprep.subr.bf16.mxu1 %v2108_v1 }
  0x65   : > { %1930 = vmatprep.mubr.msk.bf16.mxu0 %vm2109_vm0, %v2108_v1  ;;  %1970 = vmatprep.mubr.msk.bf16.mxu1 %vm2109_vm0, %v2108_v1 }
  0x67   : > { %1929 = vmatpush3.bf16.msra.mxu0 %v2094_v51  ;;  %1969 = vmatpush3.bf16.msra.mxu1 %v2095_v52 }
  0x68   : > { %1934 = vmatprep.subr.bf16.mxu0 %v2108_v1  ;;  %1974 = vmatprep.subr.bf16.mxu1 %v2108_v1 }
  0x6e   : > { %1931 = vmatmul.mubr.msk.bf16.vlgmr.msra.gmra.mrb[4].mxu0 %vm210_vm1, %v1698_v53  ;;  %1971 = vmatmul.mubr.msk.bf16.vlgmr.msra.gmra.mrb[4].mxu1 %vm210_vm1, %v1737_v54 }
  0x6f   : > { %1935 = vmatpush3.bf16.msra.mxu0 %v2096_v55  ;;  %1975 = vmatpush3.bf16.msra.mxu1 %v2097_v56 }
  0x70   : > { %1936 = vmatprep.subr.bf16.mxu0 %v2108_v1  ;;  %1976 = vmatprep.subr.bf16.mxu1 %v2108_v1 }
  0x71   : > { %1938 = vmatprep.mubr.msk.bf16.mxu0 %vm2109_vm0, %v2108_v1  ;;  %1978 = vmatprep.mubr.msk.bf16.mxu1 %vm2109_vm0, %v2108_v1 }
  0x73   : > { %1937 = vmatpush3.bf16.msra.mxu0 %v2098_v57  ;;  %1977 = vmatpush3.bf16.msra.mxu1 %v2099_v58 }
  0x7a   : > { %1939 = vmatmul.mubr.msk.bf16.vlgmr.msra.gmra.mrb[4].mxu0 %vm210_vm1, %v1706_v59  ;;  %1979 = vmatmul.mubr.msk.bf16.vlgmr.msra.gmra.mrb[4].mxu1 %vm210_vm1, %v1745_v60 }
 0x115   : > { %v491_v62 = vpop.f32.mrb[0].mxu0  ;;  %v834_v63 = vpop.f32.mrb[0].mxu1 }
 0x116   : > { %v1860_v0 = vpop.f32.mrb[1].mxu0  ;;  %v1900_v1 = vpop.f32.mrb[1].mxu1  ;;  %v847_v2 = vrot.slane %v834_v63, 2  ;;  %v499_v3 = vrot.slane %v491_v62, 1  ;;  %v842_v8 = vrot.slane %v834_v63, 1  ;;  %v504_v9 = vrot.slane %v491_v62, 2 }
 0x117   : > { %v494_v4 = vpop.f32.mrb[2].mxu0  ;;  %v837_v5 = vpop.f32.mrb[2].mxu1 }
 0x118   : > { %848 = vrot.lane.b32.xlu1 %v847_v2, %s2111_s13  ;;  %v1901_v6 = vpop.f32.mrb[3].mxu1  ;;  %500 = vrot.lane.b32.xlu0 %v499_v3, %s2112_s22  ;;  %v1861_v7 = vpop.f32.mrb[3].mxu0  ;;  %v1715_v2 = vld [vmem:[%s2396_s4 + $0x18] sm:$0x7] }
 0x11c   : > { %843 = vrot.lane.b32.xlu0 %v842_v8, %s2112_s22 }
 0x120   : > { %505 = vrot.lane.b32.xlu0 %v504_v9, %s2111_s13  ;;  %v1754_v9 = vld [vmem:[%s2396_s4 + $0x20] sm:$0x7] }
 0x14d   : > { %v1168_v10 = vpop.f32.mrb[4].mxu0  ;;  %v1502_v11 = vpop.f32.mrb[4].mxu1 }
 0x14e   : > { %v1176_v12 = vrot.slane %v1168_v10, 1  ;;  %v1181_v13 = vrot.slane %v1168_v10, 2  ;;  %v1940_v14 = vpop.f32.mrb[5].mxu0  ;;  %v1980_v15 = vpop.f32.mrb[5].mxu1  ;;  %v1510_v20 = vrot.slane %v1502_v11, 1  ;;  %v1515_v21 = vrot.slane %v1502_v11, 2 }
 0x14f   : > { %v1171_v16 = vpop.f32.mrb[6].mxu0  ;;  %v1505_v17 = vpop.f32.mrb[6].mxu1 }
 0x150   : > { %v1981_v18 = vpop.f32.mrb[7].mxu1  ;;  %1182 = vrot.lane.b32.xlu0 %v1181_v13, %s2111_s13  ;;  %1177 = vrot.lane.b32.xlu1 %v1176_v12, %s2112_s22  ;;  %v1941_v19 = vpop.f32.mrb[7].mxu0 }
 0x154   : > { %1511 = vrot.lane.b32.xlu1 %v1510_v20, %s2112_s22 }
 0x158   : > { %1516 = vrot.lane.b32.xlu1 %v1515_v21, %s2111_s13 }
 0x18a   : > { %v501_v22 = vpop.permute.xlu0 %500  ;;  %v849_v25 = vpop.permute.xlu1 %848 }
 0x18b   : > { %v503_v27 = vadd.f32 %v501_v22, %v491_v62 }
 0x18e   : > { %v844_v23 = vpop.permute.xlu0 %843 }
 0x18f   : > { %v846_v24 = vadd.f32 %v844_v23, %v834_v63 }
 0x191   : > { %v851_v28 = vadd.f32 %v849_v25, %v846_v24 }
 0x192   : > { %v506_v29 = vpop.permute.xlu0 %505 }
 0x193   : > { %v852_v30 = vadd.f32 %v1635_v26, %v851_v28  ;;  %v508_v31 = vadd.f32 %v506_v29, %v503_v27 }
 0x195   : > { %v853_v32 = vmax.f32 %v852_v30, 0.0  ;;  %v515_v33 = vadd.f32 %v1635_v26, %v508_v31 }
 0x197   : > { %v1759_v34 = vpack.c.bf16 %v853_v32, %v853_v32  ;;  %v516_v35 = vmax.f32 %v515_v33, 0.0 }
 0x199   : > { %v859_v36 = vshrl.u32 %v1759_v34, 16  ;;  %v1758_v37 = vpack.c.bf16 %v516_v35, %v516_v35  ;;  %v862_v39 = vshll.u32 %v1759_v34, 16 }
 0x19b   : > { %v861_v38 = vrot.slane %v859_v36, 7  ;;  %v522_v40 = vshrl.u32 %v1758_v37, 16  ;;  %v525_v45 = vshll.u32 %v1758_v37, 16 }
 0x19d   : > { %v864_v43 = vor.u32 %v862_v39, %v861_v38  ;;  %v524_v44 = vrot.slane %v522_v40, 7 }
 0x19f   : > { %v868_v47 = vsel %vm2413_vm5, %v864_v43, %v1676_v42  ;;  %v527_v48 = vor.u32 %v525_v45, %v524_v44 }
 0x1a0   : > { %1677 = vst [vmem:[%s2396_s4 + $0x10] sm:$0x7] %v868_v47 }
 0x1a1   : > { %v534_v49 = vsel %vm2413_vm5, %v527_v48, %v1637_v46 }
 0x1a2   : > { %1638 = vst [vmem:[%s2396_s4 + $0x8] sm:$0x7] %v534_v49 }
 0x1c2   : > { %v1178_v50 = vpop.permute.xlu1 %1177  ;;  %v1183_v52 = vpop.permute.xlu0 %1182 }
 0x1c3   : > { %v1180_v51 = vadd.f32 %v1178_v50, %v1168_v10 }
 0x1c5   : > { %v1185_v53 = vadd.f32 %v1183_v52, %v1180_v51 }
 0x1c6   : > { %v1512_v54 = vpop.permute.xlu1 %1511 }
 0x1c7   : > { %v1186_v55 = vadd.f32 %v1635_v26, %v1185_v53  ;;  %v1514_v57 = vadd.f32 %v1512_v54, %v1502_v11 }
 0x1c9   : > { %v1187_v56 = vmax.f32 %v1186_v55, 0.0 }
 0x1ca   : > { %v1517_v58 = vpop.permute.xlu1 %1516 }
 0x1cb   : > { %v1760_v59 = vpack.c.bf16 %v1187_v56, %v1187_v56  ;;  %v1519_v60 = vadd.f32 %v1517_v58, %v1514_v57 }
 0x1cd   : > { %v1193_v61 = vshrl.u32 %v1760_v59, 16  ;;  %v1520_v62 = vadd.f32 %v1635_v26, %v1519_v60  ;;  %v1196_v0 = vshll.u32 %v1760_v59, 16 }
 0x1cf   : > { %v1195_v63 = vrot.slane %v1193_v61, 7  ;;  %v1521_v1 = vmax.f32 %v1520_v62, 0.0 }
 0x1d1   : > { %v1198_v3 = vor.u32 %v1196_v0, %v1195_v63  ;;  %v1761_v4 = vpack.c.bf16 %v1521_v1, %v1521_v1 }
 0x1d3   : > { %v1202_v5 = vsel %vm2413_vm5, %v1198_v3, %v1715_v2  ;;  %v1527_v6 = vshrl.u32 %v1761_v4, 16  ;;  %v1530_v8 = vshll.u32 %v1761_v4, 16 }
 0x1d4   : > { %1716 = vst [vmem:[%s2396_s4 + $0x18] sm:$0x7] %v1202_v5 }
 0x1d5   : > { %v1529_v7 = vrot.slane %v1527_v6, 7 }
 0x1d7   : > { %v1532_v10 = vor.u32 %v1530_v8, %v1529_v7 }
 0x1d9   : > { %v1536_v11 = vsel %vm2413_vm5, %v1532_v10, %v1754_v9 }
 0x1da   : > { %1755 = vst [vmem:[%s2396_s4 + $0x20] sm:$0x7] %v1536_v11 }
 0x1db PF: > { %s13_s12 = sadd.s32 1, %s2106_s12  }
 0x1dc   : > { %p10_p4 = scmp.ge.s32.totalorder %s13_s12, 4  }
 0x1de   :  { %12 = sbr.rel (!%p10_p4) target bundleno = 1 (0x1), region = 80 }

// kernel: encoder_traj_forward.5
= control target key start
LH: loop header
LB: loop body
LE: loop exit
PB: predicated region body
PF: predicated region fallthrough
CT: control target
= control target key end

     0   :  { %s5293_s12 = smov 0   ;;  %s5999_s0 = inlined_call_operand.vmem [shape: bf16[2,11,2,16,12], index: 0, kind: input, shape index: {}]   ;;  %s6000_s1 = inlined_call_operand.vmem [shape: bf16[7,12,64], index: 1, kind: input, shape index: {}]   ;;  %s6001_s2 = inlined_call_operand.vmem [shape: f32[1,16], index: 2, kind: input, shape index: {}]   ;;  %s6002_s3 = inlined_call_operand.vmem [shape: bf16[2,12,16,16], index: 3, kind: output, shape index: {}]  }
   0x1 LB: > { %s4075_s13 = sadd.s32 4294967295, %s5265_s12   ;;  %p4079_p0 = scmp.ge.s32.totalorder %s5265_s12, 1  ;;  %s5265_s12 = sphi %s5293_s12, %s13_s12  }
   0x2   : > { %p137_p1 = scmp.lt.s32.totalorder %s5265_s12, 3 }
   0x4   : > { %p138_p2 = pnand %p4079_p0, %p137_p1 }
   0x5   : > { %vm222_vm0 = vcmask (!%p138_p2), 1045504   ;;  %v5267_v0 = vmov (!%p138_p2), 0.0   ;;  %v5147_v1 = vld [vmem:[%s6000_s1 + $0x8] sm:$0x3f] (!%p138_p2)   ;;  %p161_p3 = scmp.lt.s32.totalorder (!%p138_p2), %s4075_s13, 1  ;;  %vm5268_vm1 = vmmov (!%p138_p2), 0  }
   0x6   : > { %141 = sbr.rel (%p138_p2) target bundleno = 683 (0x2ab), region = 32  ;;  %4603 = vmatprep.subr.bf16.mxu0 (!%p138_p2), %v5267_v0  ;;  %4645 = vmatprep.subr.bf16.mxu1 (!%p138_p2), %v5267_v0  ;;  %v5148_v2 = vld [vmem:[%s6000_s1 + $0x8] sm:$0x3f] (!%p138_p2)   ;;  %v224_v3 = vsel (!%p138_p2), %vm222_vm0, %v5147_v1, 0  ;;  %v5150_v5 = vld [vmem:[%s6000_s1] sm:$0x3f] (!%p138_p2)  }
   0x7   : > { %4605 = vmatprep.mubr.msk.bf16.mxu0 (!%p138_p2), %vm5268_vm1, %v5267_v0  ;;  %4647 = vmatprep.mubr.msk.bf16.mxu1 (!%p138_p2), %vm5268_vm1, %v5267_v0  ;;  %v717_v4 = vsel (!%p138_p2), %vm222_vm0, %v5148_v2, 0  ;;  %v5152_v6 = vld [vmem:[%s6000_s1] sm:$0x3f] (!%p138_p2)   ;;  %vm218_vm2 = vcmask (!%p138_p2), 97280   ;;  %v281_v8 = vsel (!%p138_p2), %vm222_vm0, %v5150_v5, 0  ;;  %vm173_vm3 = vcmask (!%p138_p2), 125952  }
   0x8   : > { %4604 = vmatpush3.bf16.msra.mxu0 (!%p138_p2), %v224_v3  ;;  %4646 = vmatpush3.bf16.msra.mxu1 (!%p138_p2), %v717_v4  ;;  %v774_v10 = vsel (!%p138_p2), %vm222_vm0, %v5152_v6, 0  ;;  %v5154_v11 = vld [vmem:[%s6000_s1 + $0x10] sm:$0x3f] (!%p138_p2)   ;;  %v5158_v17 = vld [vmem:[%s6000_s1 + $0x18] sm:$0x3f] (!%p138_p2)   ;;  %vm651_vm4 = vcmask (!%p138_p2), 1046528  }
   0x9   : > { %4609 = vmatprep.subr.bf16.mxu0 (!%p138_p2), %v5267_v0  ;;  %4651 = vmatprep.subr.bf16.mxu1 (!%p138_p2), %v5267_v0  ;;  %v5156_v13 = vld [vmem:[%s6000_s1 + $0x10] sm:$0x3f] (!%p138_p2)   ;;  %v344_v14 = vsel (!%p138_p2), %vm222_vm0, %v5154_v11, 0  ;;  %v5160_v18 = vld [vmem:[%s6000_s1 + $0x18] sm:$0x3f] (!%p138_p2)   ;;  %v409_v21 = vsel (!%p138_p2), %vm222_vm0, %v5158_v17, 0 }
   0xa   : > { %v835_v16 = vsel (!%p138_p2), %vm222_vm0, %v5156_v13, 0  ;;  %v898_v22 = vsel (!%p138_p2), %vm222_vm0, %v5160_v18, 0  ;;  %v5162_v23 = vld [vmem:[%s6000_s1 + $0x20] sm:$0x3f] (!%p138_p2)   ;;  %v5166_v29 = vld [vmem:[%s6000_s1 + $0x28] sm:$0x3f] (!%p138_p2)  }
   0xb   : > { %v5164_v25 = vld [vmem:[%s6000_s1 + $0x20] sm:$0x3f] (!%p138_p2)   ;;  %v474_v26 = vsel (!%p138_p2), %vm222_vm0, %v5162_v23, 0  ;;  %v5168_v31 = vld [vmem:[%s6000_s1 + $0x28] sm:$0x3f] (!%p138_p2)   ;;  %v539_v32 = vsel (!%p138_p2), %vm222_vm0, %v5166_v29, 0 }
   0xc   : > { %v961_v28 = vsel (!%p138_p2), %vm222_vm0, %v5164_v25, 0  ;;  %v1025_v34 = vsel (!%p138_p2), %vm222_vm0, %v5168_v31, 0  ;;  %v5170_v35 = vld [vmem:[%s6000_s1 + $0x30] sm:$0x3f] (!%p138_p2)   ;;  %v5175_v41 = vld [vmem:[%s6000_s1 + $0x8] sm:$0x3f] (!%p138_p2)  }
   0xd   : > { %s6004_s13 = smov (!%p161_p3, %s4075_s13), 1  ;;  %v5172_v37 = vld [vmem:[%s6000_s1 + $0x30] sm:$0x3f]   ;;  %v604_v38 = vsel %vm222_vm0, %v5170_v35, 0  ;;  %v5176_v43 = vld [vmem:[%s6000_s1 + $0x8] sm:$0x3f]  }
   0xe   : > { %s5131_s20 = smul.u32 176, %s6004_s13  ;;  %v1089_v40 = vsel %vm222_vm0, %v5172_v37, 0  ;;  %v5178_v44 = vld [vmem:[%s6000_s1] sm:$0x3f]   ;;  %v1192_v46 = vsel %vm222_vm0, %v5175_v41, 0  ;;  %v1667_v47 = vsel %vm222_vm0, %v5176_v43, 0 }
   0xf   : > { %v1249_v48 = vsel %vm222_vm0, %v5178_v44, 0  ;;  %v5180_v49 = vld [vmem:[%s6000_s1] sm:$0x3f]   ;;  %v5182_v53 = vld [vmem:[%s6000_s1 + $0x10] sm:$0x3f]   ;;  %s5132_s30 = smul.u32 96, %s6004_s13 }
  0x10   : > { %s5329_s25 = scalar_lea.vmem %s5999_s0, %s5131_s20  ;;  %v1724_v52 = vsel %vm222_vm0, %v5180_v49, 0  ;;  %v1310_v54 = vsel %vm222_vm0, %v5182_v53, 0  ;;  %v5184_v55 = vld [vmem:[%s6000_s1 + $0x10] sm:$0x3f]   ;;  %v5186_v59 = vld [vmem:[%s6000_s1 + $0x18] sm:$0x3f]  }
  0x11   : > { %v5149_v7 = vld [vmem:[%s5329_s25 + $0x8] sm:$0xff]   ;;  %v5151_v9 = vld [vmem:[%s5329_s25 + $0x18] sm:$0xff]   ;;  %v5153_v12 = vld [vmem:[%s5329_s25] sm:$0xff]   ;;  %v1785_v58 = vsel %vm222_vm0, %v5184_v55, 0  ;;  %v1373_v63 = vsel %vm222_vm0, %v5186_v59, 0  ;;  %s5785_s6 = scalar_lea.vmem %s6002_s3, %s5132_s30  ;;  %vm666_vm5 = vcmask 1044480  }
  0x12   : > { %4606 = vmatmul.mubr.msk.bf16.vlgmr.msra.gmra.mrb[0].mxu0 %vm218_vm2, %v5149_v7  ;;  %4648 = vmatmul.mubr.msk.bf16.vlgmr.msra.gmra.mrb[0].mxu1 %vm218_vm2, %v5151_v9  ;;  %v5155_v15 = vld [vmem:[%s5329_s25 + $0x10] sm:$0xff]   ;;  %v5159_v20 = vld [vmem:[%s5329_s25 + $0x20] sm:$0xff]   ;;  %v5161_v24 = vld [vmem:[%s5329_s25 + $0x18] sm:$0xff]   ;;  %s5270_s13 = smov 96   ;;  %s5271_s7 = smov 112   ;;  %vm691_vm6 = vcmask 125953  }
  0x13   : > { %4610 = vmatpush3.bf16.msra.mxu0 %v281_v8  ;;  %4652 = vmatpush3.bf16.msra.mxu1 %v774_v10  ;;  %v5157_v19 = vld [vmem:[%s5329_s25 + $0x10] sm:$0xff]   ;;  %v5163_v27 = vld [vmem:[%s5329_s25 + $0x28] sm:$0xff]   ;;  %v5165_v30 = vld [vmem:[%s5329_s25 + $0x20] sm:$0xff]   ;;  %s5272_s8 = smov 80   ;;  %vm693_vm7 = vcmask 122880  }
  0x14   : > { %4611 = vmatprep.mubr.msk.bf16.mxu0 %vm5268_vm1, %v5267_v0  ;;  %4615 = vmatprep.subr.bf16.mxu0 %v5267_v0  ;;  %v5167_v33 = vld [vmem:[%s5329_s25 + $0x30] sm:$0xff]   ;;  %v5169_v36 = vld [vmem:[%s5329_s25 + $0x28] sm:$0xff]   ;;  %v5171_v39 = vld [vmem:[%s5329_s25 + $0x38] sm:$0xff]  }
  0x15   : > { %4653 = vmatprep.mubr.msk.bf16.mxu1 %vm5268_vm1, %v5267_v0  ;;  %4657 = vmatprep.subr.bf16.mxu1 %v5267_v0  ;;  %v5173_v42 = vld [vmem:[%s5329_s25 + $0x30] sm:$0xff]   ;;  %v5174_v45 = vld [vmem:[%s5329_s25 + $0x40] sm:$0xff]   ;;  %v5177_v50 = vld [vmem:[%s5329_s25 + $0x28] sm:$0xff]  }
  0x16   : > { %v5179_v51 = vld [vmem:[%s5329_s25 + $0x38] sm:$0xff]   ;;  %v5181_v56 = vld [vmem:[%s5329_s25 + $0x20] sm:$0xff]   ;;  %v5183_v57 = vld [vmem:[%s5329_s25 + $0x30] sm:$0xff]  }
  0x17   : > { %v5188_v60 = vld [vmem:[%s6000_s1 + $0x18] sm:$0x3f]   ;;  %v5185_v61 = vld [vmem:[%s5329_s25 + $0x30] sm:$0xff]   ;;  %v5187_v62 = vld [vmem:[%s5329_s25 + $0x40] sm:$0xff]  }
  0x18   : > { %v1848_v1 = vsel %vm222_vm0, %v5188_v60, 0  ;;  %v5190_v2 = vld [vmem:[%s6000_s1 + $0x20] sm:$0x3f]   ;;  %v5189_v4 = vld [vmem:[%s5329_s25 + $0x38] sm:$0xff]   ;;  %v5191_v5 = vld [vmem:[%s5329_s25 + $0x48] sm:$0xff]  }
  0x19   : > { %v5192_v3 = vld [vmem:[%s6000_s1 + $0x20] sm:$0x3f]   ;;  %v1436_v6 = vsel %vm222_vm0, %v5190_v2, 0  ;;  %v5194_v8 = vld [vmem:[%s6000_s1 + $0x28] sm:$0x3f]   ;;  %v5195_v11 = vld [vmem:[%s5329_s25 + $0x50] sm:$0xff]  }
  0x1a   : > { %v1911_v7 = vsel %vm222_vm0, %v5192_v3, 0  ;;  %v5196_v9 = vld [vmem:[%s6000_s1 + $0x28] sm:$0x3f]   ;;  %v5193_v10 = vld [vmem:[%s5329_s25 + $0x40] sm:$0xff]   ;;  %v5199_v17 = vld [vmem:[%s5329_s25 + $0x58] sm:$0xff]  }
  0x1b   : > { %v1975_v13 = vsel %vm222_vm0, %v5196_v9, 0  ;;  %v5202_v23 = vld [vmem:[%s5329_s25 + $0x60] sm:$0xff]   ;;  %v5207_v29 = vld [vmem:[%s5329_s25 + $0x58] sm:$0xff]   ;;  %v5211_v35 = vld [vmem:[%s5329_s25 + $0x50] sm:$0xff]  }
  0x1c   : > { %v5215_v41 = vld [vmem:[%s5329_s25 + $0x60] sm:$0xff]   ;;  %v5223_v53 = vld [vmem:[%s5329_s25 + $0x70] sm:$0xff]   ;;  %v5227_v59 = vld [vmem:[%s5329_s25 + $0x78] sm:$0xff]  }
  0x1d   : > { %v5218_v44 = vld [vmem:[%s6000_s1 + $0x20] sm:$0x3f]  }
  0x1e   : > { %4612 = vmatmul.mubr.msk.bf16.vlgmr.msra.gmra.mrb[0].mxu0 %vm218_vm2, %v5153_v12  ;;  %4654 = vmatmul.mubr.msk.bf16.vlgmr.msra.gmra.mrb[0].mxu1 %vm218_vm2, %v5155_v15  ;;  %v1500_v12 = vsel %vm222_vm0, %v5194_v8, 0  ;;  %v5200_v15 = vld [vmem:[%s6000_s1 + $0x30] sm:$0x3f]   ;;  %v5230_v2 = vld [vmem:[%s5329_s25 + $0x80] sm:$0xff]   ;;  %v5235_v8 = vld [vmem:[%s5329_s25 + $0x78] sm:$0xff]  }
  0x1f   : > { %4616 = vmatpush3.bf16.msra.mxu0 %v344_v14  ;;  %4658 = vmatpush3.bf16.msra.mxu1 %v835_v16  ;;  %v5198_v14 = vld [vmem:[%s6000_s1 + $0x30] sm:$0x3f]   ;;  %v5197_v16 = vld [vmem:[%s5329_s25 + $0x48] sm:$0xff]  }
  0x20   : > { %4617 = vmatprep.mubr.msk.bf16.mxu0 %vm5268_vm1, %v5267_v0  ;;  %4621 = vmatprep.subr.bf16.mxu0 %v5267_v0  ;;  %v1564_v18 = vsel %vm222_vm0, %v5198_v14, 0  ;;  %v5239_v14 = vld [vmem:[%s5329_s25 + $0x70] sm:$0xff]  }
  0x21   : > { %4659 = vmatprep.mubr.msk.bf16.mxu1 %vm5268_vm1, %v5267_v0  ;;  %4663 = vmatprep.subr.bf16.mxu1 %v5267_v0 }
  0x2a   : > { %4618 = vmatmul.mubr.msk.bf16.vlgmr.msra.gmra.mrb[0].mxu0 %vm218_vm2, %v5157_v19  ;;  %4660 = vmatmul.mubr.msk.bf16.vlgmr.msra.gmra.mrb[0].mxu1 %vm218_vm2, %v5159_v20  ;;  %v2039_v19 = vsel %vm222_vm0, %v5200_v15, 0  ;;  %v5203_v20 = vld [vmem:[%s6000_s1 + $0x8] sm:$0x3f]  }
  0x2b   : > { %4622 = vmatpush3.bf16.msra.mxu0 %v409_v21  ;;  %4664 = vmatpush3.bf16.msra.mxu1 %v898_v22  ;;  %v5204_v21 = vld [vmem:[%s6000_s1 + $0x8] sm:$0x3f]   ;;  %v5201_v22 = vld [vmem:[%s5329_s25 + $0x50] sm:$0xff]  }
  0x2c   : > { %4623 = vmatprep.mubr.msk.bf16.mxu0 %vm5268_vm1, %v5267_v0  ;;  %4627 = vmatprep.subr.bf16.mxu0 %v5267_v0  ;;  %v2617_v25 = vsel %vm222_vm0, %v5204_v21, 0 }
  0x2d   : > { %4665 = vmatprep.mubr.msk.bf16.mxu1 %vm5268_vm1, %v5267_v0  ;;  %4669 = vmatprep.subr.bf16.mxu1 %v5267_v0 }
  0x36   : > { %4624 = vmatmul.mubr.msk.bf16.vlgmr.msra.gmra.mrb[0].mxu0 %vm218_vm2, %v5161_v24  ;;  %4666 = vmatmul.mubr.msk.bf16.vlgmr.msra.gmra.mrb[0].mxu1 %vm218_vm2, %v5163_v27  ;;  %v2142_v24 = vsel %vm222_vm0, %v5203_v20, 0  ;;  %v5208_v27 = vld [vmem:[%s6000_s1] sm:$0x3f]  }
  0x37   : > { %4628 = vmatpush3.bf16.msra.mxu0 %v474_v26  ;;  %4670 = vmatpush3.bf16.msra.mxu1 %v961_v28  ;;  %v5206_v26 = vld [vmem:[%s6000_s1] sm:$0x3f]   ;;  %v5205_v28 = vld [vmem:[%s5329_s25 + $0x48] sm:$0xff]   ;;  %v2674_v31 = vsel %vm222_vm0, %v5208_v27, 0 }
  0x38   : > { %4629 = vmatprep.mubr.msk.bf16.mxu0 %vm5268_vm1, %v5267_v0  ;;  %4633 = vmatprep.subr.bf16.mxu0 %v5267_v0  ;;  %v5243_v20 = vld [vmem:[%s5329_s25 + $0x80] sm:$0xff]  }
  0x39   : > { %4671 = vmatprep.mubr.msk.bf16.mxu1 %vm5268_vm1, %v5267_v0  ;;  %4675 = vmatprep.subr.bf16.mxu1 %v5267_v0 }
  0x42   : > { %4630 = vmatmul.mubr.msk.bf16.vlgmr.msra.gmra.mrb[0].mxu0 %vm218_vm2, %v5165_v30  ;;  %4672 = vmatmul.mubr.msk.bf16.vlgmr.msra.gmra.mrb[0].mxu1 %vm218_vm2, %v5167_v33  ;;  %v2199_v30 = vsel %vm222_vm0, %v5206_v26, 0  ;;  %v5212_v33 = vld [vmem:[%s6000_s1 + $0x10] sm:$0x3f]   ;;  %v5247_v26 = vld [vmem:[%s5329_s25 + $0x88] sm:$0xff]  }
  0x43   : > { %4634 = vmatpush3.bf16.msra.mxu0 %v539_v32  ;;  %4676 = vmatpush3.bf16.msra.mxu1 %v1025_v34  ;;  %v5210_v32 = vld [vmem:[%s6000_s1 + $0x10] sm:$0x3f]   ;;  %v5209_v34 = vld [vmem:[%s5329_s25 + $0x40] sm:$0xff]   ;;  %v2735_v37 = vsel %vm222_vm0, %v5212_v33, 0 }
  0x44   : > { %4635 = vmatprep.mubr.msk.bf16.mxu0 %vm5268_vm1, %v5267_v0  ;;  %4639 = vmatprep.subr.bf16.mxu0 %v5267_v0  ;;  %v5251_v33 = vld [vmem:[%s5329_s25 + $0x90] sm:$0xff]  }
  0x45   : > { %4677 = vmatprep.mubr.msk.bf16.mxu1 %vm5268_vm1, %v5267_v0  ;;  %4681 = vmatprep.subr.bf16.mxu1 %v5267_v0 }
  0x4e   : > { %4636 = vmatmul.mubr.msk.bf16.vlgmr.msra.gmra.mrb[0].mxu0 %vm218_vm2, %v5169_v36  ;;  %4678 = vmatmul.mubr.msk.bf16.vlgmr.msra.gmra.mrb[0].mxu1 %vm218_vm2, %v5171_v39  ;;  %v2260_v36 = vsel %vm222_vm0, %v5210_v32, 0  ;;  %v5216_v39 = vld [vmem:[%s6000_s1 + $0x18] sm:$0x3f]   ;;  %v5249_v32 = vld [vmem:[%s5329_s25 + $0x80] sm:$0xff]  }
  0x4f   : > { %4640 = vmatpush3.bf16.msra.mxu0 %v604_v38  ;;  %4682 = vmatpush3.bf16.msra.mxu1 %v1089_v40  ;;  %v5214_v38 = vld [vmem:[%s6000_s1 + $0x18] sm:$0x3f]   ;;  %v5213_v40 = vld [vmem:[%s5329_s25 + $0x50] sm:$0xff]   ;;  %v2798_v43 = vsel %vm222_vm0, %v5216_v39, 0 }
  0x50   : > { %4641 = vmatprep.mubr.msk.bf16.mxu0 %vm5268_vm1, %v5267_v0  ;;  %4683 = vmatprep.mubr.msk.bf16.mxu1 %vm5268_vm1, %v5267_v0 }
  0x51   : > { %4687 = vmatprep.subr.bf16.mxu0 %v5267_v0  ;;  %4729 = vmatprep.subr.bf16.mxu1 %v5267_v0 }
  0x5a   : > { %4642 = vmatmul.mubr.msk.bf16.vlgmr.msra.gmra.mrb[0].mxu0 %vm218_vm2, %v5173_v42  ;;  %4684 = vmatmul.mubr.msk.bf16.vlgmr.msra.gmra.mrb[0].mxu1 %vm218_vm2, %v5174_v45  ;;  %v2323_v42 = vsel %vm222_vm0, %v5214_v38, 0  ;;  %v5220_v45 = vld [vmem:[%s6000_s1 + $0x20] sm:$0x3f]  }
  0x5b   : > { %4688 = vmatpush3.bf16.msra.mxu0 %v1192_v46  ;;  %4730 = vmatpush3.bf16.msra.mxu1 %v1667_v47  ;;  %v5217_v46 = vld [vmem:[%s5329_s25 + $0x58] sm:$0xff]   ;;  %v5219_v47 = vld [vmem:[%s5329_s25 + $0x68] sm:$0xff]   ;;  %v2861_v49 = vsel %vm222_vm0, %v5220_v45, 0 }
  0x5c   : > { %4689 = vmatprep.mubr.msk.bf16.mxu0 %vm5268_vm1, %v5267_v0  ;;  %4693 = vmatprep.subr.bf16.mxu0 %v5267_v0 }
  0x5d   : > { %4731 = vmatprep.mubr.msk.bf16.mxu1 %vm5268_vm1, %v5267_v0  ;;  %4735 = vmatprep.subr.bf16.mxu1 %v5267_v0 }
  0x62   : > { %4690 = vmatmul.mubr.msk.bf16.vlgmr.msra.gmra.mrb[4].mxu0 %vm218_vm2, %v5177_v50  ;;  %4732 = vmatmul.mubr.msk.bf16.vlgmr.msra.gmra.mrb[4].mxu1 %vm218_vm2, %v5179_v51  ;;  %v5222_v50 = vld [vmem:[%s6000_s1 + $0x28] sm:$0x3f]  }
  0x63   : > { %4694 = vmatpush3.bf16.msra.mxu0 %v1249_v48  ;;  %4736 = vmatpush3.bf16.msra.mxu1 %v1724_v52  ;;  %v2386_v48 = vsel %vm222_vm0, %v5218_v44, 0  ;;  %v5224_v51 = vld [vmem:[%s6000_s1 + $0x28] sm:$0x3f]   ;;  %v5221_v52 = vld [vmem:[%s5329_s25 + $0x60] sm:$0xff]  }
  0x64   : > { %4695 = vmatprep.mubr.msk.bf16.mxu0 %vm5268_vm1, %v5267_v0  ;;  %4699 = vmatprep.subr.bf16.mxu0 %v5267_v0  ;;  %v2925_v55 = vsel %vm222_vm0, %v5224_v51, 0 }
  0x65   : > { %4737 = vmatprep.mubr.msk.bf16.mxu1 %vm5268_vm1, %v5267_v0  ;;  %4741 = vmatprep.subr.bf16.mxu1 %v5267_v0 }
  0x6e   : > { %4696 = vmatmul.mubr.msk.bf16.vlgmr.msra.gmra.mrb[4].mxu0 %vm218_vm2, %v5181_v56  ;;  %4738 = vmatmul.mubr.msk.bf16.vlgmr.msra.gmra.mrb[4].mxu1 %vm218_vm2, %v5183_v57  ;;  %v5226_v56 = vld [vmem:[%s6000_s1 + $0x30] sm:$0x3f]  }
  0x6f   : > { %4700 = vmatpush3.bf16.msra.mxu0 %v1310_v54  ;;  %4742 = vmatpush3.bf16.msra.mxu1 %v1785_v58  ;;  %v2450_v54 = vsel %vm222_vm0, %v5222_v50, 0  ;;  %v5228_v57 = vld [vmem:[%s6000_s1 + $0x30] sm:$0x3f]   ;;  %v5225_v58 = vld [vmem:[%s5329_s25 + $0x68] sm:$0xff]   ;;  %v2514_v60 = vsel %vm222_vm0, %v5226_v56, 0 }
  0x70   : > { %4701 = vmatprep.mubr.msk.bf16.mxu0 %vm5268_vm1, %v5267_v0  ;;  %4705 = vmatprep.subr.bf16.mxu0 %v5267_v0 }
  0x71   : > { %4743 = vmatprep.mubr.msk.bf16.mxu1 %vm5268_vm1, %v5267_v0  ;;  %4747 = vmatprep.subr.bf16.mxu1 %v5267_v0 }
  0x7a   : > { %4702 = vmatmul.mubr.msk.bf16.vlgmr.msra.gmra.mrb[4].mxu0 %vm218_vm2, %v5185_v61  ;;  %4744 = vmatmul.mubr.msk.bf16.vlgmr.msra.gmra.mrb[4].mxu1 %vm218_vm2, %v5187_v62  ;;  %v2989_v61 = vsel %vm222_vm0, %v5228_v57, 0  ;;  %v5231_v62 = vld [vmem:[%s6000_s1 + $0x8] sm:$0x3f]  }
  0x7b   : > { %4706 = vmatpush3.bf16.msra.mxu0 %v1373_v63  ;;  %4748 = vmatpush3.bf16.msra.mxu1 %v1848_v1  ;;  %v5232_v63 = vld [vmem:[%s6000_s1 + $0x8] sm:$0x3f]   ;;  %v5229_v1 = vld [vmem:[%s5329_s25 + $0x70] sm:$0xff]   ;;  %v3092_v3 = vsel %vm222_vm0, %v5231_v62, 0 }
  0x7c   : > { %4707 = vmatprep.mubr.msk.bf16.mxu0 %vm5268_vm1, %v5267_v0  ;;  %4711 = vmatprep.subr.bf16.mxu0 %v5267_v0  ;;  %v5254_v62 = vld [vmem:[%s6000_s1 + $0x30] sm:$0x3f]  }
  0x7d   : > { %4749 = vmatprep.mubr.msk.bf16.mxu1 %vm5268_vm1, %v5267_v0  ;;  %4753 = vmatprep.subr.bf16.mxu1 %v5267_v0 }
  0x86   : > { %4708 = vmatmul.mubr.msk.bf16.vlgmr.msra.gmra.mrb[4].mxu0 %vm218_vm2, %v5189_v4  ;;  %4750 = vmatmul.mubr.msk.bf16.vlgmr.msra.gmra.mrb[4].mxu1 %vm218_vm2, %v5191_v5  ;;  %v3567_v4 = vsel %vm222_vm0, %v5232_v63, 0  ;;  %v5234_v5 = vld [vmem:[%s6000_s1] sm:$0x3f]   ;;  %v5256_v63 = vld [vmem:[%s6000_s1 + $0x30] sm:$0x3f]  }
  0x87   : > { %4712 = vmatpush3.bf16.msra.mxu0 %v1436_v6  ;;  %4754 = vmatpush3.bf16.msra.mxu1 %v1911_v7  ;;  %v5236_v6 = vld [vmem:[%s6000_s1] sm:$0x3f]   ;;  %v5233_v7 = vld [vmem:[%s5329_s25 + $0x68] sm:$0xff]   ;;  %v3149_v9 = vsel %vm222_vm0, %v5234_v5, 0  ;;  %v5257_v5 = vld [vmem:[%s5329_s25 + $0x90] sm:$0xff]  }
  0x88   : > { %4713 = vmatprep.mubr.msk.bf16.mxu0 %vm5268_vm1, %v5267_v0  ;;  %4717 = vmatprep.subr.bf16.mxu0 %v5267_v0 }
  0x89   : > { %4755 = vmatprep.mubr.msk.bf16.mxu1 %vm5268_vm1, %v5267_v0  ;;  %4759 = vmatprep.subr.bf16.mxu1 %v5267_v0 }
  0x92   : > { %4714 = vmatmul.mubr.msk.bf16.vlgmr.msra.gmra.mrb[4].mxu0 %vm218_vm2, %v5193_v10  ;;  %4756 = vmatmul.mubr.msk.bf16.vlgmr.msra.gmra.mrb[4].mxu1 %vm218_vm2, %v5195_v11  ;;  %v3624_v10 = vsel %vm222_vm0, %v5236_v6, 0  ;;  %v5238_v11 = vld [vmem:[%s6000_s1 + $0x10] sm:$0x3f]   ;;  %v5258_v6 = vld [vmem:[%s5329_s25 + $0xa0] sm:$0xff]  }
  0x93   : > { %4718 = vmatpush3.bf16.msra.mxu0 %v1500_v12  ;;  %4760 = vmatpush3.bf16.msra.mxu1 %v1975_v13  ;;  %v5240_v12 = vld [vmem:[%s6000_s1 + $0x10] sm:$0x3f]   ;;  %v5237_v13 = vld [vmem:[%s5329_s25 + $0x60] sm:$0xff]   ;;  %v3210_v15 = vsel %vm222_vm0, %v5238_v11, 0 }
  0x94   : > { %4719 = vmatprep.mubr.msk.bf16.mxu0 %vm5268_vm1, %v5267_v0  ;;  %4723 = vmatprep.subr.bf16.mxu0 %v5267_v0 }
  0x95   : > { %4761 = vmatprep.mubr.msk.bf16.mxu1 %vm5268_vm1, %v5267_v0  ;;  %4765 = vmatprep.subr.bf16.mxu1 %v5267_v0 }
  0x9e   : > { %4720 = vmatmul.mubr.msk.bf16.vlgmr.msra.gmra.mrb[4].mxu0 %vm218_vm2, %v5197_v16  ;;  %4762 = vmatmul.mubr.msk.bf16.vlgmr.msra.gmra.mrb[4].mxu1 %vm218_vm2, %v5199_v17  ;;  %v3685_v16 = vsel %vm222_vm0, %v5240_v12, 0  ;;  %v5242_v17 = vld [vmem:[%s6000_s1 + $0x18] sm:$0x3f]  }
  0x9f   : > { %4724 = vmatpush3.bf16.msra.mxu0 %v1564_v18  ;;  %4766 = vmatpush3.bf16.msra.mxu1 %v2039_v19  ;;  %v5244_v18 = vld [vmem:[%s6000_s1 + $0x18] sm:$0x3f]   ;;  %v5241_v19 = vld [vmem:[%s5329_s25 + $0x70] sm:$0xff]   ;;  %v3273_v21 = vsel %vm222_vm0, %v5242_v17, 0 }
  0xa0   : > { %4725 = vmatprep.mubr.msk.bf16.mxu0 %vm5268_vm1, %v5267_v0  ;;  %4767 = vmatprep.mubr.msk.bf16.mxu1 %vm5268_vm1, %v5267_v0 }
  0xa1   : > { %4771 = vmatprep.subr.bf16.mxu0 %v5267_v0  ;;  %4813 = vmatprep.subr.bf16.mxu1 %v5267_v0 }
  0xaa   : > { %4726 = vmatmul.mubr.msk.bf16.vlgmr.msra.gmra.mrb[4].mxu0 %vm218_vm2, %v5201_v22  ;;  %4768 = vmatmul.mubr.msk.bf16.vlgmr.msra.gmra.mrb[4].mxu1 %vm218_vm2, %v5202_v23  ;;  %v3748_v22 = vsel %vm222_vm0, %v5244_v18, 0  ;;  %v5246_v23 = vld [vmem:[%s6000_s1 + $0x20] sm:$0x3f]  }
  0xab   : > { %4772 = vmatpush3.bf16.msra.mxu0 %v2142_v24  ;;  %4814 = vmatpush3.bf16.msra.mxu1 %v2617_v25  ;;  %v5248_v24 = vld [vmem:[%s6000_s1 + $0x20] sm:$0x3f]   ;;  %v5245_v25 = vld [vmem:[%s5329_s25 + $0x78] sm:$0xff]   ;;  %v3336_v27 = vsel %vm222_vm0, %v5246_v23, 0 }
  0xac   : > { %4773 = vmatprep.mubr.msk.bf16.mxu0 %vm5268_vm1, %v5267_v0  ;;  %4777 = vmatprep.subr.bf16.mxu0 %v5267_v0 }
  0xad   : > { %4815 = vmatprep.mubr.msk.bf16.mxu1 %vm5268_vm1, %v5267_v0  ;;  %4819 = vmatprep.subr.bf16.mxu1 %v5267_v0 }
  0xb2   : > { %4774 = vmatmul.mubr.msk.bf16.vlgmr.msra.gmra.mrb[8].mxu0 %vm218_vm2, %v5205_v28  ;;  %4816 = vmatmul.mubr.msk.bf16.vlgmr.msra.gmra.mrb[8].mxu1 %vm218_vm2, %v5207_v29  ;;  %v3811_v28 = vsel %vm222_vm0, %v5248_v24, 0  ;;  %v5250_v29 = vld [vmem:[%s6000_s1 + $0x28] sm:$0x3f]  }
  0xb3   : > { %4778 = vmatpush3.bf16.msra.mxu0 %v2199_v30  ;;  %4820 = vmatpush3.bf16.msra.mxu1 %v2674_v31  ;;  %v5252_v30 = vld [vmem:[%s6000_s1 + $0x28] sm:$0x3f]  }
  0xb4   : > { %4779 = vmatprep.mubr.msk.bf16.mxu0 %vm5268_vm1, %v5267_v0  ;;  %4783 = vmatprep.subr.bf16.mxu0 %v5267_v0  ;;  %v3875_v38 = vsel %vm222_vm0, %v5252_v30, 0 }
  0xb5   : > { %4821 = vmatprep.mubr.msk.bf16.mxu1 %vm5268_vm1, %v5267_v0  ;;  %4825 = vmatprep.subr.bf16.mxu1 %v5267_v0 }
  0xbe   : > { %4780 = vmatmul.mubr.msk.bf16.vlgmr.msra.gmra.mrb[8].mxu0 %vm218_vm2, %v5209_v34  ;;  %4822 = vmatmul.mubr.msk.bf16.vlgmr.msra.gmra.mrb[8].mxu1 %vm218_vm2, %v5211_v35  ;;  %v5269_v34 = vmov 0  }
  0xbf   : > { %4784 = vmatpush3.bf16.msra.mxu0 %v2260_v36  ;;  %4826 = vmatpush3.bf16.msra.mxu1 %v2735_v37  ;;  %174 = vst.msk [vmem:[%s5785_s6] sm:$0xf] %vm173_vm3, %v5269_v34  ;;  %175 = vst.msk [vmem:[%s5785_s6 + $0x4] sm:$0xf] %vm173_vm3, %v5269_v34  ;;  %v3400_v37 = vsel %vm222_vm0, %v5250_v29, 0 }
  0xc0   : > { %4785 = vmatprep.mubr.msk.bf16.mxu0 %vm5268_vm1, %v5267_v0  ;;  %4789 = vmatprep.subr.bf16.mxu0 %v5267_v0  ;;  %176 = vst.msk [vmem:[%s5785_s6 + $0x8] sm:$0xf] %vm173_vm3, %v5269_v34  ;;  %177 = vst.msk [vmem:[%s5785_s6 + $0xc] sm:$0xf] %vm173_vm3, %v5269_v34 }
  0xc1   : > { %4827 = vmatprep.mubr.msk.bf16.mxu1 %vm5268_vm1, %v5267_v0  ;;  %4831 = vmatprep.subr.bf16.mxu1 %v5267_v0  ;;  %180 = vst.msk [vmem:[%s5785_s6 + $0x18] sm:$0xf] %vm173_vm3, %v5269_v34  ;;  %181 = vst.msk [vmem:[%s5785_s6 + $0x1c] sm:$0xf] %vm173_vm3, %v5269_v34 }
  0xc2   : > { %194 = vst.msk [vmem:[%s5785_s6 + $0x50] sm:$0xf] %vm173_vm3, %v5269_v34  ;;  %195 = vst.msk [vmem:[%s5785_s6 + $0x54] sm:$0xf] %vm173_vm3, %v5269_v34 }
  0xc3   : > { %196 = vst.msk [vmem:[%s5785_s6 + $0x58] sm:$0xf] %vm173_vm3, %v5269_v34  ;;  %197 = vst.msk [vmem:[%s5785_s6 + $0x5c] sm:$0xf] %vm173_vm3, %v5269_v34 }
  0xc4   : > { %178 = vst.msk [vmem:[%s5785_s6 + $0x10] sm:$0xf] %vm173_vm3, %v5269_v34  ;;  %179 = vst.msk [vmem:[%s5785_s6 + $0x14] sm:$0xf] %vm173_vm3, %v5269_v34 }
  0xc5   : > { %182 = vst.msk [vmem:[%s5785_s6 + $0x20] sm:$0xf] %vm173_vm3, %v5269_v34  ;;  %183 = vst.msk [vmem:[%s5785_s6 + $0x24] sm:$0xf] %vm173_vm3, %v5269_v34 }
  0xc6   : > { %184 = vst.msk [vmem:[%s5785_s6 + $0x28] sm:$0xf] %vm173_vm3, %v5269_v34  ;;  %185 = vst.msk [vmem:[%s5785_s6 + $0x2c] sm:$0xf] %vm173_vm3, %v5269_v34 }
  0xc7   : > { %186 = vst.msk [vmem:[%s5785_s6 + $0x30] sm:$0xf] %vm173_vm3, %v5269_v34  ;;  %187 = vst.msk [vmem:[%s5785_s6 + $0x34] sm:$0xf] %vm173_vm3, %v5269_v34 }
  0xc8   : > { %188 = vst.msk [vmem:[%s5785_s6 + $0x38] sm:$0xf] %vm173_vm3, %v5269_v34  ;;  %189 = vst.msk [vmem:[%s5785_s6 + $0x3c] sm:$0xf] %vm173_vm3, %v5269_v34 }
  0xc9   : > { %190 = vst.msk [vmem:[%s5785_s6 + $0x40] sm:$0xf] %vm173_vm3, %v5269_v34  ;;  %191 = vst.msk [vmem:[%s5785_s6 + $0x44] sm:$0xf] %vm173_vm3, %v5269_v34 }
  0xca   : > { %4786 = vmatmul.mubr.msk.bf16.vlgmr.msra.gmra.mrb[8].mxu0 %vm218_vm2, %v5213_v40  ;;  %4828 = vmatmul.mubr.msk.bf16.vlgmr.msra.gmra.mrb[8].mxu1 %vm218_vm2, %v5215_v41  ;;  %192 = vst.msk [vmem:[%s5785_s6 + $0x48] sm:$0xf] %vm173_vm3, %v5269_v34  ;;  %193 = vst.msk [vmem:[%s5785_s6 + $0x4c] sm:$0xf] %vm173_vm3, %v5269_v34 }
  0xcb   : > { %4790 = vmatpush3.bf16.msra.mxu0 %v2323_v42  ;;  %4832 = vmatpush3.bf16.msra.mxu1 %v2798_v43 }
  0xcc   : > { %4791 = vmatprep.mubr.msk.bf16.mxu0 %vm5268_vm1, %v5267_v0  ;;  %4795 = vmatprep.subr.bf16.mxu0 %v5267_v0 }
  0xcd   : > { %4833 = vmatprep.mubr.msk.bf16.mxu1 %vm5268_vm1, %v5267_v0  ;;  %4837 = vmatprep.subr.bf16.mxu1 %v5267_v0 }
  0xd6   : > { %4792 = vmatmul.mubr.msk.bf16.vlgmr.msra.gmra.mrb[8].mxu0 %vm218_vm2, %v5217_v46  ;;  %4834 = vmatmul.mubr.msk.bf16.vlgmr.msra.gmra.mrb[8].mxu1 %vm218_vm2, %v5219_v47 }
  0xd7   : > { %4796 = vmatpush3.bf16.msra.mxu0 %v2386_v48  ;;  %4838 = vmatpush3.bf16.msra.mxu1 %v2861_v49 }
  0xd8   : > { %4797 = vmatprep.mubr.msk.bf16.mxu0 %vm5268_vm1, %v5267_v0  ;;  %4801 = vmatprep.subr.bf16.mxu0 %v5267_v0 }
  0xd9   : > { %4839 = vmatprep.mubr.msk.bf16.mxu1 %vm5268_vm1, %v5267_v0  ;;  %4843 = vmatprep.subr.bf16.mxu1 %v5267_v0 }
  0xe2   : > { %4798 = vmatmul.mubr.msk.bf16.vlgmr.msra.gmra.mrb[8].mxu0 %vm218_vm2, %v5221_v52  ;;  %4840 = vmatmul.mubr.msk.bf16.vlgmr.msra.gmra.mrb[8].mxu1 %vm218_vm2, %v5223_v53 }
  0xe3   : > { %4802 = vmatpush3.bf16.msra.mxu0 %v2450_v54  ;;  %4844 = vmatpush3.bf16.msra.mxu1 %v2925_v55 }
  0xe4   : > { %4803 = vmatprep.mubr.msk.bf16.mxu0 %vm5268_vm1, %v5267_v0  ;;  %4807 = vmatprep.subr.bf16.mxu0 %v5267_v0 }
  0xe5   : > { %4845 = vmatprep.mubr.msk.bf16.mxu1 %vm5268_vm1, %v5267_v0  ;;  %4849 = vmatprep.subr.bf16.mxu1 %v5267_v0 }
  0xee   : > { %4804 = vmatmul.mubr.msk.bf16.vlgmr.msra.gmra.mrb[8].mxu0 %vm218_vm2, %v5225_v58  ;;  %4846 = vmatmul.mubr.msk.bf16.vlgmr.msra.gmra.mrb[8].mxu1 %vm218_vm2, %v5227_v59 }
  0xef   : > { %4808 = vmatpush3.bf16.msra.mxu0 %v2514_v60  ;;  %4850 = vmatpush3.bf16.msra.mxu1 %v2989_v61 }
  0xf0   : > { %4809 = vmatprep.mubr.msk.bf16.mxu0 %vm5268_vm1, %v5267_v0  ;;  %4851 = vmatprep.mubr.msk.bf16.mxu1 %vm5268_vm1, %v5267_v0 }
  0xf1   : > { %4855 = vmatprep.subr.bf16.mxu0 %v5267_v0  ;;  %4897 = vmatprep.subr.bf16.mxu1 %v5267_v0 }
  0xfa   : > { %4810 = vmatmul.mubr.msk.bf16.vlgmr.msra.gmra.mrb[8].mxu0 %vm218_vm2, %v5229_v1  ;;  %4852 = vmatmul.mubr.msk.bf16.vlgmr.msra.gmra.mrb[8].mxu1 %vm218_vm2, %v5230_v2  ;;  %v5253_v1 = vld [vmem:[%s5329_s25 + $0x88] sm:$0xff]   ;;  %v5255_v2 = vld [vmem:[%s5329_s25 + $0x98] sm:$0xff]  }
  0xfb   : > { %4856 = vmatpush3.bf16.msra.mxu0 %v3092_v3  ;;  %4898 = vmatpush3.bf16.msra.mxu1 %v3567_v4  ;;  %v3464_v3 = vsel %vm222_vm0, %v5254_v62, 0  ;;  %v3939_v4 = vsel %vm222_vm0, %v5256_v63, 0 }
  0xfc   : > { %4857 = vmatprep.mubr.msk.bf16.mxu0 %vm5268_vm1, %v5267_v0  ;;  %4861 = vmatprep.subr.bf16.mxu0 %v5267_v0 }
  0xfd   : > { %4899 = vmatprep.mubr.msk.bf16.mxu1 %vm5268_vm1, %v5267_v0  ;;  %4903 = vmatprep.subr.bf16.mxu1 %v5267_v0 }
 0x102   : > { %4858 = vmatmul.mubr.msk.bf16.vlgmr.msra.gmra.mrb[12].mxu0 %vm218_vm2, %v5233_v7  ;;  %4900 = vmatmul.mubr.msk.bf16.vlgmr.msra.gmra.mrb[12].mxu1 %vm218_vm2, %v5235_v8 }
 0x103   : > { %4862 = vmatpush3.bf16.msra.mxu0 %v3149_v9  ;;  %4904 = vmatpush3.bf16.msra.mxu1 %v3624_v10 }
 0x104   : > { %4863 = vmatprep.mubr.msk.bf16.mxu0 %vm5268_vm1, %v5267_v0  ;;  %4867 = vmatprep.subr.bf16.mxu0 %v5267_v0 }
 0x105   : > { %4905 = vmatprep.mubr.msk.bf16.mxu1 %vm5268_vm1, %v5267_v0  ;;  %4909 = vmatprep.subr.bf16.mxu1 %v5267_v0 }
 0x10e   : > { %4864 = vmatmul.mubr.msk.bf16.vlgmr.msra.gmra.mrb[12].mxu0 %vm218_vm2, %v5237_v13  ;;  %4906 = vmatmul.mubr.msk.bf16.vlgmr.msra.gmra.mrb[12].mxu1 %vm218_vm2, %v5239_v14 }
 0x10f   : > { %4868 = vmatpush3.bf16.msra.mxu0 %v3210_v15  ;;  %4910 = vmatpush3.bf16.msra.mxu1 %v3685_v16 }
 0x110   : > { %4869 = vmatprep.mubr.msk.bf16.mxu0 %vm5268_vm1, %v5267_v0  ;;  %4873 = vmatprep.subr.bf16.mxu0 %v5267_v0 }
 0x111   : > { %4911 = vmatprep.mubr.msk.bf16.mxu1 %vm5268_vm1, %v5267_v0  ;;  %4915 = vmatprep.subr.bf16.mxu1 %v5267_v0 }
 0x11a   : > { %4870 = vmatmul.mubr.msk.bf16.vlgmr.msra.gmra.mrb[12].mxu0 %vm218_vm2, %v5241_v19  ;;  %4912 = vmatmul.mubr.msk.bf16.vlgmr.msra.gmra.mrb[12].mxu1 %vm218_vm2, %v5243_v20 }
 0x11b   : > { %4874 = vmatpush3.bf16.msra.mxu0 %v3273_v21  ;;  %4916 = vmatpush3.bf16.msra.mxu1 %v3748_v22 }
 0x11c   : > { %4875 = vmatprep.mubr.msk.bf16.mxu0 %vm5268_vm1, %v5267_v0  ;;  %4879 = vmatprep.subr.bf16.mxu0 %v5267_v0 }
 0x11d   : > { %4917 = vmatprep.mubr.msk.bf16.mxu1 %vm5268_vm1, %v5267_v0  ;;  %4921 = vmatprep.subr.bf16.mxu1 %v5267_v0 }
 0x126   : > { %4876 = vmatmul.mubr.msk.bf16.vlgmr.msra.gmra.mrb[12].mxu0 %vm218_vm2, %v5245_v25  ;;  %4918 = vmatmul.mubr.msk.bf16.vlgmr.msra.gmra.mrb[12].mxu1 %vm218_vm2, %v5247_v26 }
 0x127   : > { %4880 = vmatpush3.bf16.msra.mxu0 %v3336_v27  ;;  %4922 = vmatpush3.bf16.msra.mxu1 %v3811_v28 }
 0x128   : > { %4881 = vmatprep.mubr.msk.bf16.mxu0 %vm5268_vm1, %v5267_v0  ;;  %4885 = vmatprep.subr.bf16.mxu0 %v5267_v0 }
 0x129   : > { %4923 = vmatprep.mubr.msk.bf16.mxu1 %vm5268_vm1, %v5267_v0  ;;  %4927 = vmatprep.subr.bf16.mxu1 %v5267_v0 }
 0x12d   : > { %v5787_v31 = vpop.f32.mrb[0].mxu0  ;;  %v5839_v35 = vpop.f32.mrb[0].mxu1 }
 0x12e   : > { %v4643_v36 = vpop.f32.mrb[1].mxu0  ;;  %v659_v39 = vrot.slane %v5787_v31, 2  ;;  %v667_v40 = vrot.slane %v5787_v31, 3  ;;  %v1136_v41 = vrot.slane %v5839_v35, 1  ;;  %v4685_v42 = vpop.f32.mrb[1].mxu1  ;;  %v652_v44 = vrot.slane %v5787_v31, 1 }
 0x12f   : > { %v643_v43 = vpop.f32.mrb[2].mxu0  ;;  %v1150_v45 = vrot.slane %v5839_v35, 3  ;;  %v1128_v49 = vpop.f32.mrb[2].mxu1  ;;  %v1143_v55 = vrot.slane %v5839_v35, 2 }
 0x130   : > { %v653_v46 = vrot.slane %v643_v43, 1  ;;  %v660_v47 = vrot.slane %v643_v43, 2  ;;  %v668_v48 = vrot.slane %v643_v43, 3  ;;  %v4644_v50 = vpop.f32.mrb[3].mxu0  ;;  %v1137_v51 = vrot.slane %v1128_v49, 1  ;;  %v4686_v54 = vpop.f32.mrb[3].mxu1 }
 0x131   : > { %v1144_v52 = vrot.slane %v1128_v49, 2  ;;  %v1151_v53 = vrot.slane %v1128_v49, 3 }
 0x132   : > { %4882 = vmatmul.mubr.msk.bf16.vlgmr.msra.gmra.mrb[12].mxu0 %vm218_vm2, %v5249_v32  ;;  %v654_v56 = vsel %vm651_vm4, %v652_v44, %v653_v46  ;;  %v661_v57 = vsel %vm222_vm0, %v659_v39, %v660_v47  ;;  %v669_v58 = vsel %vm666_vm5, %v667_v40, %v668_v48  ;;  %4924 = vmatmul.mubr.msk.bf16.vlgmr.msra.gmra.mrb[12].mxu1 %vm218_vm2, %v5251_v33  ;;  %v5915_v40 = vld [vmem:[%s6001_s2] ss:$0 sm:$0xff] }
 0x133   : > { %4886 = vmatpush3.bf16.msra.mxu0 %v3400_v37  ;;  %v1145_v59 = vsel %vm222_vm0, %v1143_v55, %v1144_v52  ;;  %v1152_v60 = vsel %vm666_vm5, %v1150_v45, %v1151_v53  ;;  %v1138_v61 = vsel %vm651_vm4, %v1136_v41, %v1137_v51  ;;  %4928 = vmatpush3.bf16.msra.mxu1 %v3875_v38 }
 0x134   : > { %1146 = vrot.lane.b32.xlu1 %v1145_v59, %s5270_s13  ;;  %655 = vrot.lane.b32.xlu0 %v654_v56, %s5271_s7 }
 0x135   : > { %4887 = vmatprep.mubr.msk.bf16.mxu0 %vm5268_vm1, %v5267_v0  ;;  %4891 = vmatprep.subr.bf16.mxu0 %v5267_v0 }
 0x136   : > { %4929 = vmatprep.mubr.msk.bf16.mxu1 %vm5268_vm1, %v5267_v0  ;;  %4933 = vmatprep.subr.bf16.mxu1 %v5267_v0 }
 0x138   : > { %1153 = vrot.lane.b32.xlu1 %v1152_v60, %s5272_s8  ;;  %1139 = vrot.lane.b32.xlu0 %v1138_v61, %s5271_s7 }
 0x13c   : > { %662 = vrot.lane.b32.xlu0 %v661_v57, %s5270_s13 }
 0x13e   : > { %4888 = vmatmul.mubr.msk.bf16.vlgmr.msra.gmra.mrb[12].mxu0 %vm218_vm2, %v5253_v1  ;;  %4930 = vmatmul.mubr.msk.bf16.vlgmr.msra.gmra.mrb[12].mxu1 %vm218_vm2, %v5255_v2 }
 0x13f   : > { %4892 = vmatpush3.bf16.msra.mxu0 %v3464_v3  ;;  %4934 = vmatpush3.bf16.msra.mxu1 %v3939_v4 }
 0x140   : > { %4893 = vmatprep.mubr.msk.bf16.mxu0 %vm5268_vm1, %v5267_v0  ;;  %670 = vrot.lane.b32.xlu0 %v669_v58, %s5272_s8 }
 0x141   : > { %4935 = vmatprep.mubr.msk.bf16.mxu1 %vm5268_vm1, %v5267_v0 }
 0x14a   : > { %4894 = vmatmul.mubr.msk.bf16.vlgmr.msra.gmra.mrb[12].mxu0 %vm218_vm2, %v5257_v5  ;;  %4936 = vmatmul.mubr.msk.bf16.vlgmr.msra.gmra.mrb[12].mxu1 %vm218_vm2, %v5258_v6 }
 0x17d   : > { %v5889_v7 = vpop.f32.mrb[4].mxu0  ;;  %v5891_v8 = vpop.f32.mrb[4].mxu1 }
 0x17e   : > { %v4727_v9 = vpop.f32.mrb[5].mxu0  ;;  %v1611_v10 = vrot.slane %v5889_v7, 1  ;;  %v1618_v11 = vrot.slane %v5889_v7, 2  ;;  %v1625_v12 = vrot.slane %v5889_v7, 3  ;;  %v2086_v13 = vrot.slane %v5891_v8, 1  ;;  %v4769_v0 = vpop.f32.mrb[5].mxu1 }
 0x17f   : > { %v1603_v14 = vpop.f32.mrb[6].mxu0  ;;  %v2093_v15 = vrot.slane %v5891_v8, 2  ;;  %v2078_v19 = vpop.f32.mrb[6].mxu1  ;;  %v2100_v21 = vrot.slane %v5891_v8, 3 }
 0x180   : > { %v1612_v16 = vrot.slane %v1603_v14, 1  ;;  %v1619_v17 = vrot.slane %v1603_v14, 2  ;;  %v1626_v18 = vrot.slane %v1603_v14, 3  ;;  %v4728_v20 = vpop.f32.mrb[7].mxu0  ;;  %v2087_v22 = vrot.slane %v2078_v19, 1  ;;  %v4770_v25 = vpop.f32.mrb[7].mxu1 }
 0x181   : > { %v2094_v23 = vrot.slane %v2078_v19, 2  ;;  %v2101_v24 = vrot.slane %v2078_v19, 3 }
 0x182   : > { %v1620_v26 = vsel %vm222_vm0, %v1618_v11, %v1619_v17  ;;  %v1613_v27 = vsel %vm651_vm4, %v1611_v10, %v1612_v16  ;;  %v1627_v28 = vsel %vm666_vm5, %v1625_v12, %v1626_v18  ;;  %v2088_v29 = vsel %vm651_vm4, %v2086_v13, %v2087_v22 }
 0x183   : > { %1621 = vrot.lane.b32.xlu0 %v1620_v26, %s5270_s13  ;;  %1614 = vrot.lane.b32.xlu1 %v1613_v27, %s5271_s7  ;;  %v2095_v30 = vsel %vm222_vm0, %v2093_v15, %v2094_v23  ;;  %v2102_v32 = vsel %vm666_vm5, %v2100_v21, %v2101_v24 }
 0x187   : > { %1628 = vrot.lane.b32.xlu0 %v1627_v28, %s5272_s8  ;;  %2089 = vrot.lane.b32.xlu1 %v2088_v29, %s5271_s7 }
 0x18b   : > { %2096 = vrot.lane.b32.xlu1 %v2095_v30, %s5270_s13 }
 0x18f   : > { %2103 = vrot.lane.b32.xlu1 %v2102_v32, %s5272_s8 }
 0x1a6   : > { %v656_v33 = vpop.permute.xlu0 %655  ;;  %v1147_v34 = vpop.permute.xlu1 %1146 }
 0x1a7   : > { %v658_v42 = vadd.f32 %v656_v33, %v5787_v31 }
 0x1aa   : > { %v1140_v36 = vpop.permute.xlu0 %1139  ;;  %v1154_v39 = vpop.permute.xlu1 %1153 }
 0x1ab   : > { %v1142_v37 = vadd.f32 %v1140_v36, %v5839_v35 }
 0x1ad   : > { %v1149_v38 = vadd.f32 %v1147_v34, %v1142_v37 }
 0x1ae   : > { %v663_v41 = vpop.permute.xlu0 %662 }
 0x1af   : > { %v1156_v43 = vadd.f32 %v1154_v39, %v1149_v38  ;;  %v665_v45 = vadd.f32 %v663_v41, %v658_v42 }
 0x1b1   : > { %v1157_v44 = vadd.f32 %v5915_v40, %v1156_v43 }
 0x1b2   : > { %v671_v46 = vpop.permute.xlu0 %670 }
 0x1b3   : > { %v1158_v35 = vmax.f32 %v1157_v44, 0.0  ;;  %v673_v47 = vadd.f32 %v671_v46, %v665_v45 }
 0x1b5   : > { %v4484_v48 = vpack.c.bf16 %v1158_v35, %v1158_v35  ;;  %v680_v49 = vadd.f32 %v5915_v40, %v673_v47 }
 0x1b7   : > { %v1163_v50 = vrot.slane %v4484_v48, 7  ;;  %v681_v51 = vmax.f32 %v680_v49, 0.0 }
 0x1b9   : > { %v1164_v52 = vrot.slane %v1163_v50, 4  ;;  %4179 = vst.msk [vmem:[%s5785_s6 + $0x18] sm:$0xe] %vm691_vm6, %v1163_v50  ;;  %v4483_v31 = vpack.c.bf16 %v681_v51, %v681_v51 }
 0x1bb   : > { %4180 = vst.msk [vmem:[%s5785_s6 + $0x1c] sm:$0x1] %vm693_vm7, %v1164_v52  ;;  %v686_v53 = vrot.slane %v4483_v31, 7 }
 0x1bd   : > { %v687_v54 = vrot.slane %v686_v53, 4  ;;  %4129 = vst.msk [vmem:[%s5785_s6 + $0x10] sm:$0xe] %vm691_vm6, %v686_v53 }
 0x1bf   : > { %4130 = vst.msk [vmem:[%s5785_s6 + $0x14] sm:$0x1] %vm693_vm7, %v687_v54 }
 0x1cd   : > { %v5928_v55 = vpop.f32.mrb[8].mxu0  ;;  %v5930_v56 = vpop.f32.mrb[8].mxu1 }
 0x1ce   : > { %v4811_v57 = vpop.f32.mrb[9].mxu0  ;;  %v2561_v58 = vrot.slane %v5928_v55, 1  ;;  %v2568_v59 = vrot.slane %v5928_v55, 2  ;;  %v2575_v60 = vrot.slane %v5928_v55, 3  ;;  %v3036_v61 = vrot.slane %v5930_v56, 1  ;;  %v4853_v62 = vpop.f32.mrb[9].mxu1 }
 0x1cf   : > { %v2553_v63 = vpop.f32.mrb[10].mxu0  ;;  %v3043_v1 = vrot.slane %v5930_v56, 2  ;;  %v3028_v5 = vpop.f32.mrb[10].mxu1  ;;  %v3050_v9 = vrot.slane %v5930_v56, 3 }
 0x1d0   : > { %v2562_v2 = vrot.slane %v2553_v63, 1  ;;  %v2569_v3 = vrot.slane %v2553_v63, 2  ;;  %v2576_v4 = vrot.slane %v2553_v63, 3  ;;  %v4812_v6 = vpop.f32.mrb[11].mxu0  ;;  %v3037_v10 = vrot.slane %v3028_v5, 1  ;;  %v4854_v13 = vpop.f32.mrb[11].mxu1 }
 0x1d1   : > { %v3044_v11 = vrot.slane %v3028_v5, 2  ;;  %v3051_v12 = vrot.slane %v3028_v5, 3 }
 0x1d2   : > { %v2563_v0 = vsel %vm651_vm4, %v2561_v58, %v2562_v2  ;;  %v2570_v14 = vsel %vm222_vm0, %v2568_v59, %v2569_v3  ;;  %v2577_v15 = vsel %vm666_vm5, %v2575_v60, %v2576_v4  ;;  %v3038_v16 = vsel %vm651_vm4, %v3036_v61, %v3037_v10 }
 0x1d3   : > { %2564 = vrot.lane.b32.xlu0 %v2563_v0, %s5271_s7  ;;  %v3045_v17 = vsel %vm222_vm0, %v3043_v1, %v3044_v11  ;;  %v3052_v18 = vsel %vm666_vm5, %v3050_v9, %v3051_v12  ;;  %3039 = vrot.lane.b32.xlu1 %v3038_v16, %s5271_s7 }
 0x1d7   : > { %2571 = vrot.lane.b32.xlu0 %v2570_v14, %s5270_s13  ;;  %3046 = vrot.lane.b32.xlu1 %v3045_v17, %s5270_s13 }
 0x1db   : > { %2578 = vrot.lane.b32.xlu0 %v2577_v15, %s5272_s8  ;;  %3053 = vrot.lane.b32.xlu1 %v3052_v18, %s5272_s8 }
 0x1f5   : > { %v1622_v19 = vpop.permute.xlu0 %1621  ;;  %v1615_v20 = vpop.permute.xlu1 %1614 }
 0x1f6   : > { %v1617_v21 = vadd.f32 %v1615_v20, %v5889_v7 }
 0x1f8   : > { %v1624_v22 = vadd.f32 %v1622_v19, %v1617_v21 }
 0x1f9   : > { %v1629_v23 = vpop.permute.xlu0 %1628  ;;  %v2090_v24 = vpop.permute.xlu1 %2089 }
 0x1fa   : > { %v1631_v25 = vadd.f32 %v1629_v23, %v1624_v22  ;;  %v2092_v29 = vadd.f32 %v2090_v24, %v5891_v8 }
 0x1fc   : > { %v1632_v26 = vadd.f32 %v5915_v40, %v1631_v25 }
 0x1fd   : > { %v2097_v27 = vpop.permute.xlu1 %2096 }
 0x1fe   : > { %v1633_v28 = vmax.f32 %v1632_v26, 0.0  ;;  %v2099_v32 = vadd.f32 %v2097_v27, %v2092_v29 }
 0x200   : > { %v4485_v30 = vpack.c.bf16 %v1633_v28, %v1633_v28 }
 0x201   : > { %v2104_v33 = vpop.permute.xlu1 %2103 }
 0x202   : > { %v1638_v34 = vrot.slane %v4485_v30, 7  ;;  %v2106_v36 = vadd.f32 %v2104_v33, %v2099_v32 }
 0x204   : > { %v1639_v37 = vrot.slane %v1638_v34, 4  ;;  %4229 = vst.msk [vmem:[%s5785_s6 + $0x20] sm:$0xe] %vm691_vm6, %v1638_v34  ;;  %v2107_v7 = vadd.f32 %v5915_v40, %v2106_v36 }
 0x206   : > { %4230 = vst.msk [vmem:[%s5785_s6 + $0x24] sm:$0x1] %vm693_vm7, %v1639_v37  ;;  %v2108_v38 = vmax.f32 %v2107_v7, 0.0 }
 0x208   : > { %v4486_v39 = vpack.c.bf16 %v2108_v38, %v2108_v38 }
 0x20a   : > { %v2113_v41 = vrot.slane %v4486_v39, 7 }
 0x20c   : > { %v2114_v42 = vrot.slane %v2113_v41, 4  ;;  %4279 = vst.msk [vmem:[%s5785_s6 + $0x28] sm:$0xe] %vm691_vm6, %v2113_v41 }
 0x20e   : > { %4280 = vst.msk [vmem:[%s5785_s6 + $0x2c] sm:$0x1] %vm693_vm7, %v2114_v42 }
 0x21d   : > { %v3500_v8 = vpop.f32.mrb[12].mxu0  ;;  %v3975_v43 = vpop.f32.mrb[12].mxu1 }
 0x21e   : > { %v4895_v44 = vpop.f32.mrb[13].mxu0  ;;  %v3511_v45 = vrot.slane %v3500_v8, 1  ;;  %v3518_v46 = vrot.slane %v3500_v8, 2  ;;  %v3525_v35 = vrot.slane %v3500_v8, 3  ;;  %v3986_v47 = vrot.slane %v3975_v43, 1  ;;  %v4937_v48 = vpop.f32.mrb[13].mxu1 }
 0x21f   : > { %v3503_v49 = vpop.f32.mrb[14].mxu0  ;;  %v3993_v50 = vrot.slane %v3975_v43, 2  ;;  %v3978_v53 = vpop.f32.mrb[14].mxu1  ;;  %v4000_v57 = vrot.slane %v3975_v43, 3 }
 0x220   : > { %v3512_v51 = vrot.slane %v3503_v49, 1  ;;  %v3519_v52 = vrot.slane %v3503_v49, 2  ;;  %v3526_v31 = vrot.slane %v3503_v49, 3  ;;  %v4896_v54 = vpop.f32.mrb[15].mxu0  ;;  %v3987_v58 = vrot.slane %v3978_v53, 1  ;;  %v4938_v61 = vpop.f32.mrb[15].mxu1 }
 0x221   : > { %v3994_v59 = vrot.slane %v3978_v53, 2  ;;  %v4001_v60 = vrot.slane %v3978_v53, 3 }
 0x222   : > { %v3513_v62 = vsel %vm651_vm4, %v3511_v45, %v3512_v51  ;;  %v3520_v63 = vsel %vm222_vm0, %v3518_v46, %v3519_v52  ;;  %v3527_v1 = vsel %vm666_vm5, %v3525_v35, %v3526_v31  ;;  %v3988_v2 = vsel %vm651_vm4, %v3986_v47, %v3987_v58 }
 0x223   : > { %3514 = vrot.lane.b32.xlu0 %v3513_v62, %s5271_s7  ;;  %v3995_v3 = vsel %vm222_vm0, %v3993_v50, %v3994_v59  ;;  %v4002_v4 = vsel %vm666_vm5, %v4000_v57, %v4001_v60  ;;  %3989 = vrot.lane.b32.xlu1 %v3988_v2, %s5271_s7 }
 0x227   : > { %3521 = vrot.lane.b32.xlu0 %v3520_v63, %s5270_s13  ;;  %3996 = vrot.lane.b32.xlu1 %v3995_v3, %s5270_s13 }
 0x22b   : > { %3528 = vrot.lane.b32.xlu0 %v3527_v1, %s5272_s8  ;;  %4003 = vrot.lane.b32.xlu1 %v4002_v4, %s5272_s8 }
 0x245   : > { %v2565_v5 = vpop.permute.xlu0 %2564  ;;  %v3040_v6 = vpop.permute.xlu1 %3039 }
 0x246   : > { %v2567_v10 = vadd.f32 %v2565_v5, %v5928_v55  ;;  %v3042_v12 = vadd.f32 %v3040_v6, %v5930_v56 }
 0x249   : > { %v2572_v9 = vpop.permute.xlu0 %2571  ;;  %v3047_v11 = vpop.permute.xlu1 %3046 }
 0x24a   : > { %v2574_v13 = vadd.f32 %v2572_v9, %v2567_v10  ;;  %v3049_v0 = vadd.f32 %v3047_v11, %v3042_v12 }
 0x24d   : > { %v2579_v14 = vpop.permute.xlu0 %2578  ;;  %v3054_v15 = vpop.permute.xlu1 %3053 }
 0x24e   : > { %v2581_v16 = vadd.f32 %v2579_v14, %v2574_v13  ;;  %v3056_v17 = vadd.f32 %v3054_v15, %v3049_v0 }
 0x250   : > { %v2582_v18 = vadd.f32 %v5915_v40, %v2581_v16  ;;  %v3057_v19 = vadd.f32 %v5915_v40, %v3056_v17 }
 0x252   : > { %v2583_v20 = vmax.f32 %v2582_v18, 0.0  ;;  %v3058_v21 = vmax.f32 %v3057_v19, 0.0 }
 0x254   : > { %v4487_v55 = vpack.c.bf16 %v2583_v20, %v2583_v20  ;;  %v4488_v22 = vpack.c.bf16 %v3058_v21, %v3058_v21 }
 0x256   : > { %v2588_v23 = vrot.slane %v4487_v55, 7  ;;  %v3063_v56 = vrot.slane %v4488_v22, 7 }
 0x258   : > { %v2589_v24 = vrot.slane %v2588_v23, 4  ;;  %4329 = vst.msk [vmem:[%s5785_s6 + $0x30] sm:$0xe] %vm691_vm6, %v2588_v23  ;;  %v3064_v25 = vrot.slane %v3063_v56, 4  ;;  %4379 = vst.msk [vmem:[%s5785_s6 + $0x38] sm:$0xe] %vm691_vm6, %v3063_v56 }
 0x25a   : > { %4330 = vst.msk [vmem:[%s5785_s6 + $0x34] sm:$0x1] %vm693_vm7, %v2589_v24  ;;  %4380 = vst.msk [vmem:[%s5785_s6 + $0x3c] sm:$0x1] %vm693_vm7, %v3064_v25 }
 0x295   : > { %v3515_v26 = vpop.permute.xlu0 %3514  ;;  %v3990_v27 = vpop.permute.xlu1 %3989 }
 0x296   : > { %v3517_v29 = vadd.f32 %v3515_v26, %v3500_v8  ;;  %v3992_v32 = vadd.f32 %v3990_v27, %v3975_v43 }
 0x299   : > { %v3522_v28 = vpop.permute.xlu0 %3521  ;;  %v3997_v30 = vpop.permute.xlu1 %3996 }
 0x29a   : > { %v3524_v33 = vadd.f32 %v3522_v28, %v3517_v29  ;;  %v3999_v34 = vadd.f32 %v3997_v30, %v3992_v32 }
 0x29d   : > { %v3529_v36 = vpop.permute.xlu0 %3528  ;;  %v4004_v37 = vpop.permute.xlu1 %4003 }
 0x29e   : > { %v3531_v7 = vadd.f32 %v3529_v36, %v3524_v33  ;;  %v4006_v38 = vadd.f32 %v4004_v37, %v3999_v34 }
 0x2a0   : > { %v3532_v39 = vadd.f32 %v5915_v40, %v3531_v7  ;;  %v4007_v41 = vadd.f32 %v5915_v40, %v4006_v38 }
 0x2a2   : > { %v3533_v42 = vmax.f32 %v3532_v39, 0.0  ;;  %v4008_v44 = vmax.f32 %v4007_v41, 0.0 }
 0x2a4   : > { %v4489_v45 = vpack.c.bf16 %v3533_v42, %v3533_v42  ;;  %v4490_v8 = vpack.c.bf16 %v4008_v44, %v4008_v44 }
 0x2a6   : > { %v3538_v46 = vrot.slane %v4489_v45, 7  ;;  %v4013_v43 = vrot.slane %v4490_v8, 7 }
 0x2a8   : > { %v3539_v35 = vrot.slane %v3538_v46, 4  ;;  %4429 = vst.msk [vmem:[%s5785_s6 + $0x40] sm:$0xe] %vm691_vm6, %v3538_v46  ;;  %v4014_v47 = vrot.slane %v4013_v43, 4  ;;  %4479 = vst.msk [vmem:[%s5785_s6 + $0x48] sm:$0xe] %vm691_vm6, %v4013_v43 }
 0x2aa   : > { %4430 = vst.msk [vmem:[%s5785_s6 + $0x44] sm:$0x1] %vm693_vm7, %v3539_v35  ;;  %4480 = vst.msk [vmem:[%s5785_s6 + $0x4c] sm:$0x1] %vm693_vm7, %v4014_v47 }
 0x2ab PF: > { %s13_s12 = sadd.s32 1, %s5265_s12  }
 0x2ac   : > { %p10_p4 = scmp.ge.s32.totalorder %s13_s12, 4  }
 0x2ae   :  { %12 = sbr.rel (!%p10_p4) target bundleno = 1 (0x1), region = 96 }

// kernel: encoder_traj_forward.9
= control target key start
LH: loop header
LB: loop body
LE: loop exit
PB: predicated region body
PF: predicated region fallthrough
CT: control target
= control target key end

     0   :  { %14 = vsyncpa [#allocation3], 0  ;;  %s2054_s0 = inlined_call_operand.vmem [shape: bf16[2,2,2,8,256], index: 0, kind: input, shape index: {}]   ;;  %s2055_s1 = inlined_call_operand.vmem [shape: bf16[128,256], index: 1, kind: input, shape index: {}]   ;;  %s2056_s2 = inlined_call_operand.vmem [shape: bf16[256,256], index: 2, kind: input, shape index: {}]   ;;  %s2057_s3 = inlined_call_operand.vmem [shape: bf16[256,256], index: 3, kind: input, shape index: {}]   ;;  %s2058_s4 = inlined_call_operand.vmem [shape: f32[1,256], index: 4, kind: input, shape index: {}]   ;;  %s2059_s5 = inlined_call_operand.vmem [shape: f32[1,256], index: 5, kind: input, shape index: {}]   ;;  %s2060_s6 = inlined_call_operand.vmem [shape: f32[1,256], index: 6, kind: input, shape index: {}]   ;;  %s2061_s7 = inlined_call_operand.vmem [shape: bf16[256,6], index: 7, kind: input, shape index: {}]   ;;  %s2062_s8 = inlined_call_operand.vmem [shape: f32[1,6], index: 8, kind: input, shape index: {}]   ;;  %s2063_s9 = inlined_call_operand.hbm [shape: f32[2,1,6], index: 9, kind: output, shape index: {}]  }
   0x1   :  { %16 = vsyncpa [#allocation3 + $0x1], 0  ;;  %s1644_s30 = smov 0   ;;  %s1646_s10 = smov 0  }
   0x2   :  { %s1648_s11 = smov 0   ;;  %s1650_s12 = smov 0  }
   0x3 LB: > { %s1665_s13 = sadd.s32 4294967295, %s1590_s12   ;;  %s1223_s14 = sadd.s32 4294967294, %s1590_s12   ;;  %s1590_s12 = sphi %s1650_s12, %s2069_s12   ;;  %s1586_s11 = sphi %s1648_s11, %s2068_s11   ;;  %s1582_s10 = sphi %s1646_s10, %s2067_s10   ;;  %s1578_s30 = sphi %s1644_s30, %s2066_s30  }
   0x4   : > { %s1669_s15 = sadd.s32 1, %s1590_s12   ;;  %s223_s16 = sadd.s32 1, %s1586_s11 }
   0x5   : > { %s220_s17 = ssub.s32 %s1590_s12, %s1669_s15  ;;  %p233_p0 = scmp.ne.s32.totalorder %s1586_s11, %s1582_s10 }
   0x6   : > { %p221_p1 = scmp.eq.s32.totalorder %s220_s17, 0  ;;  %p234_p2 = scmp.eq.s32.totalorder %s1665_s13, 1 }
   0x7   : > { %p239_p3 = scmp.ne.s32.totalorder %s1582_s10, %s1578_s30  ;;  %p240_p4 = scmp.eq.s32.totalorder %s1223_s14, 1 }
   0x8   : > { %s1680_s18 = scalar_select %p221_p1, %s1586_s11, %s223_s16  }
   0x9   : > { %p1682_p5 = por %p234_p2, %p233_p0  ;;  %p1686_p6 = por %p240_p4, %p239_p3 }
   0xa   : > { %p1226_p7 = scmp.ge.s32.totalorder %s1590_s12, 1  ;;  %p290_p8 = scmp.lt.s32.totalorder %s1590_s12, 3 }
   0xc   : > { %p291_p9 = pnand %p1226_p7, %p290_p8 }
   0xd   : > { %v1392_v0 = vld [vmem:[%s2055_s1 + $0x4] ss:$8 sps:$4 sm:$0xff] (!%p291_p9)   ;;  %v1394_v1 = vld [vmem:[%s2055_s1] ss:$8 sps:$4 sm:$0xff] (!%p291_p9)   ;;  %v1592_v2 = vmov (!%p291_p9), 0   ;;  %p325_p10 = scmp.lt.s32.totalorder (!%p291_p9), %s1665_s13, 1 }
   0xe   : > { %294 = sbr.rel (%p291_p9) target bundleno = 937 (0x3a9), region = 56  ;;  %473 = vmatprep.mubr.bf16.mxu0 (!%p291_p9), %v1592_v2  ;;  %441 = vmatprep.subr.bf16.mxu0 (!%p291_p9), %v1392_v0  ;;  %v1395_v3 = vld [vmem:[%s2055_s1 + $0x14] ss:$8 sps:$4 sm:$0xff] (!%p291_p9)   ;;  %v1397_v4 = vld [vmem:[%s2055_s1 + $0x10] ss:$8 sps:$4 sm:$0xff] (!%p291_p9)   ;;  %s323_s22 = sand.u32 (!%p291_p9), 1, %s1582_s10  }
   0xf   : > { %442 = vmatpush1.bf16.msra.mxu0 (!%p291_p9), %v1394_v1  ;;  %v1398_v5 = vld [vmem:[%s2055_s1 + $0x24] ss:$8 sps:$4 sm:$0xff] (!%p291_p9)   ;;  %v1400_v6 = vld [vmem:[%s2055_s1 + $0x20] ss:$8 sps:$4 sm:$0xff] (!%p291_p9)   ;;  %v1401_v7 = vld [vmem:[%s2055_s1 + $0x34] ss:$8 sps:$4 sm:$0xff] (!%p291_p9)  }
  0x10   : > { %443 = vmatprep.subr.bf16.mxu0 (!%p291_p9), %v1395_v3  ;;  %v1403_v8 = vld [vmem:[%s2055_s1 + $0x30] ss:$8 sps:$4 sm:$0xff] (!%p291_p9)   ;;  %v1404_v9 = vld [vmem:[%s2055_s1 + $0x44] ss:$8 sps:$4 sm:$0xff] (!%p291_p9)   ;;  %v1418_v11 = vld [vmem:[%s2056_s2] ss:$8 sps:$4 sm:$0xff] (!%p291_p9)  }
  0x11   : > { %v1416_v10 = vld [vmem:[%s2056_s2 + $0x4] ss:$8 sps:$4 sm:$0xff] (!%p291_p9)   ;;  %v1419_v12 = vld [vmem:[%s2056_s2 + $0x14] ss:$8 sps:$4 sm:$0xff] (!%p291_p9)   ;;  %v1406_v13 = vld [vmem:[%s2055_s1 + $0x40] ss:$8 sps:$4 sm:$0xff] (!%p291_p9)  }
  0x12   : > { %690 = vmatprep.subr.bf16.mxu1 (!%p291_p9), %v1416_v10  ;;  %v1421_v14 = vld [vmem:[%s2056_s2 + $0x10] ss:$8 sps:$4 sm:$0xff] (!%p291_p9)   ;;  %v1422_v15 = vld [vmem:[%s2056_s2 + $0x24] ss:$8 sps:$4 sm:$0xff] (!%p291_p9)   ;;  %v1407_v16 = vld [vmem:[%s2055_s1 + $0x54] ss:$8 sps:$4 sm:$0xff] (!%p291_p9)  }
  0x13   : > { %444 = vmatpush1.bf16.msra.mxu0 (!%p291_p9), %v1397_v4  ;;  %691 = vmatpush1.bf16.msra.mxu1 (!%p291_p9), %v1418_v11  ;;  %v1409_v17 = vld [vmem:[%s2055_s1 + $0x50] ss:$8 sps:$4 sm:$0xff] (!%p291_p9)   ;;  %v1424_v18 = vld [vmem:[%s2056_s2 + $0x20] ss:$8 sps:$4 sm:$0xff] (!%p291_p9)   ;;  %v1425_v19 = vld [vmem:[%s2056_s2 + $0x34] ss:$8 sps:$4 sm:$0xff] (!%p291_p9)  }
  0x14   : > { %445 = vmatprep.subr.bf16.mxu0 (!%p291_p9), %v1398_v5  ;;  %692 = vmatprep.subr.bf16.mxu1 (!%p291_p9), %v1419_v12  ;;  %v1410_v20 = vld [vmem:[%s2055_s1 + $0x64] ss:$8 sps:$4 sm:$0xff] (!%p291_p9)   ;;  %v1412_v21 = vld [vmem:[%s2055_s1 + $0x60] ss:$8 sps:$4 sm:$0xff] (!%p291_p9)   ;;  %v1427_v22 = vld [vmem:[%s2056_s2 + $0x30] ss:$8 sps:$4 sm:$0xff] (!%p291_p9)  }
  0x15   : > { %s326_s21 = scalar_select %p325_p10, %s1665_s13, 1  ;;  %v1428_v23 = vld [vmem:[%s2056_s2 + $0x44] ss:$8 sps:$4 sm:$0xff]   ;;  %v1413_v24 = vld [vmem:[%s2055_s1 + $0x74] ss:$8 sps:$4 sm:$0xff]   ;;  %vm1153_vm0 = vcmask 40960  }
  0x16   : > { %v1415_v25 = vld [vmem:[%s2055_s1 + $0x70] ss:$8 sps:$4 sm:$0xff]   ;;  %v1430_v26 = vld [vmem:[%s2056_s2 + $0x40] ss:$8 sps:$4 sm:$0xff]   ;;  %v1431_v27 = vld [vmem:[%s2056_s2 + $0x54] ss:$8 sps:$4 sm:$0xff]  }
  0x17   : > { %446 = vmatpush1.bf16.msra.mxu0 %v1400_v6  ;;  %693 = vmatpush1.bf16.msra.mxu1 %v1421_v14  ;;  %s1329_s14 = sshll.u32 %s326_s21, 5  ;;  %v1433_v29 = vld [vmem:[%s2056_s2 + $0x50] ss:$8 sps:$4 sm:$0xff]   ;;  %v1434_v30 = vld [vmem:[%s2056_s2 + $0x64] ss:$8 sps:$4 sm:$0xff]   ;;  %v431_v14 = vlaneseq  ;;  %s1326_s25 = sshll.u32 %s1665_s13, 4 }
  0x18   : > { %447 = vmatprep.subr.bf16.mxu0 %v1401_v7  ;;  %694 = vmatprep.subr.bf16.mxu1 %v1422_v15  ;;  %s329_s28 = scalar_lea.vmem %s2054_s0, %s1329_s14  ;;  %v1436_v31 = vld [vmem:[%s2056_s2 + $0x60] ss:$8 sps:$4 sm:$0xff]   ;;  %v1437_v32 = vld [vmem:[%s2056_s2 + $0x74] ss:$8 sps:$4 sm:$0xff]   ;;  %v1439_v33 = vld [vmem:[%s2056_s2 + $0x70] ss:$8 sps:$4 sm:$0xff]  }
  0x19   : > { %v1229_v28 = vld [vmem:[%s329_s28 + $0xc] sm:$0x1]  ;;  %v1442_v35 = vld [vmem:[%s2056_s2 + $0x80] ss:$8 sps:$4 sm:$0xff]   ;;  %v1443_v36 = vld [vmem:[%s2056_s2 + $0x94] ss:$8 sps:$4 sm:$0xff]   ;;  %s2012_s28 = scalar_lea.hbm %s2063_s9, %s1326_s25 }
  0x1a   : > { %v1440_v34 = vld [vmem:[%s2056_s2 + $0x84] ss:$8 sps:$4 sm:$0xff]   ;;  %v1445_v37 = vld [vmem:[%s2056_s2 + $0x90] ss:$8 sps:$4 sm:$0xff]   ;;  %v1448_v39 = vld [vmem:[%s2056_s2 + $0xa0] ss:$8 sps:$4 sm:$0xff]  }
  0x1b   : > { %448 = vmatpush1.bf16.msra.mxu0 %v1403_v8  ;;  %695 = vmatpush1.bf16.msra.mxu1 %v1424_v18  ;;  %v1446_v38 = vld [vmem:[%s2056_s2 + $0xa4] ss:$8 sps:$4 sm:$0xff]   ;;  %v1449_v40 = vld [vmem:[%s2056_s2 + $0xb4] ss:$8 sps:$4 sm:$0xff]   ;;  %v1451_v41 = vld [vmem:[%s2056_s2 + $0xb0] ss:$8 sps:$4 sm:$0xff]  }
  0x1c   : > { %449 = vmatprep.subr.bf16.mxu0 %v1404_v9  ;;  %696 = vmatprep.subr.bf16.mxu1 %v1425_v19  ;;  %v1452_v42 = vld [vmem:[%s2056_s2 + $0xc4] ss:$8 sps:$4 sm:$0xff]   ;;  %v1454_v43 = vld [vmem:[%s2056_s2 + $0xc0] ss:$8 sps:$4 sm:$0xff]   ;;  %v1455_v44 = vld [vmem:[%s2056_s2 + $0xd4] ss:$8 sps:$4 sm:$0xff]  }
  0x1d   : > { %v1457_v45 = vld [vmem:[%s2056_s2 + $0xd0] ss:$8 sps:$4 sm:$0xff]   ;;  %v1458_v46 = vld [vmem:[%s2056_s2 + $0xe4] ss:$8 sps:$4 sm:$0xff]   ;;  %v1460_v47 = vld [vmem:[%s2056_s2 + $0xe0] ss:$8 sps:$4 sm:$0xff]  }
  0x1e   : > { %v1461_v48 = vld [vmem:[%s2056_s2 + $0xf4] ss:$8 sps:$4 sm:$0xff]   ;;  %v1463_v49 = vld [vmem:[%s2056_s2 + $0xf0] ss:$8 sps:$4 sm:$0xff]   ;;  %v1464_v50 = vld [vmem:[%s2057_s3] ss:$8 sps:$4 sm:$0xff]  }
  0x1f   : > { %450 = vmatpush1.bf16.msra.mxu0 %v1406_v13  ;;  %697 = vmatpush1.bf16.msra.mxu1 %v1427_v22  ;;  %v1466_v51 = vld [vmem:[%s2057_s3 + $0x4] ss:$8 sps:$4 sm:$0xff]   ;;  %v1469_v52 = vld [vmem:[%s2057_s3 + $0x14] ss:$8 sps:$4 sm:$0xff]   ;;  %v1467_v53 = vld [vmem:[%s2057_s3 + $0x10] ss:$8 sps:$4 sm:$0xff]  }
  0x20   : > { %451 = vmatprep.subr.bf16.mxu0 %v1407_v16  ;;  %698 = vmatprep.subr.bf16.mxu1 %v1428_v23  ;;  %v1472_v54 = vld [vmem:[%s2057_s3 + $0x24] ss:$8 sps:$4 sm:$0xff]   ;;  %v1470_v55 = vld [vmem:[%s2057_s3 + $0x20] ss:$8 sps:$4 sm:$0xff]   ;;  %v1475_v56 = vld [vmem:[%s2057_s3 + $0x34] ss:$8 sps:$4 sm:$0xff]  }
  0x21   : > { %v1473_v57 = vld [vmem:[%s2057_s3 + $0x30] ss:$8 sps:$4 sm:$0xff]   ;;  %v1478_v58 = vld [vmem:[%s2057_s3 + $0x44] ss:$8 sps:$4 sm:$0xff]   ;;  %v1476_v59 = vld [vmem:[%s2057_s3 + $0x40] ss:$8 sps:$4 sm:$0xff]  }
  0x22   : > { %v1481_v60 = vld [vmem:[%s2057_s3 + $0x54] ss:$8 sps:$4 sm:$0xff]   ;;  %v1479_v61 = vld [vmem:[%s2057_s3 + $0x50] ss:$8 sps:$4 sm:$0xff]   ;;  %v1484_v62 = vld [vmem:[%s2057_s3 + $0x64] ss:$8 sps:$4 sm:$0xff]  }
  0x23   : > { %452 = vmatpush1.bf16.msra.mxu0 %v1409_v17  ;;  %699 = vmatpush1.bf16.msra.mxu1 %v1430_v26  ;;  %v1482_v63 = vld [vmem:[%s2057_s3 + $0x60] ss:$8 sps:$4 sm:$0xff]   ;;  %v1487_v0 = vld [vmem:[%s2057_s3 + $0x74] ss:$8 sps:$4 sm:$0xff]   ;;  %v1485_v1 = vld [vmem:[%s2057_s3 + $0x70] ss:$8 sps:$4 sm:$0xff]  }
  0x24   : > { %453 = vmatprep.subr.bf16.mxu0 %v1410_v20  ;;  %700 = vmatprep.subr.bf16.mxu1 %v1431_v27  ;;  %v1490_v2 = vld [vmem:[%s2057_s3 + $0x84] ss:$8 sps:$4 sm:$0xff]   ;;  %v1488_v3 = vld [vmem:[%s2057_s3 + $0x80] ss:$8 sps:$4 sm:$0xff]   ;;  %v1493_v4 = vld [vmem:[%s2057_s3 + $0x94] ss:$8 sps:$4 sm:$0xff]  }
  0x25   : > { %v1491_v5 = vld [vmem:[%s2057_s3 + $0x90] ss:$8 sps:$4 sm:$0xff]   ;;  %v1496_v6 = vld [vmem:[%s2057_s3 + $0xa4] ss:$8 sps:$4 sm:$0xff]   ;;  %v1494_v7 = vld [vmem:[%s2057_s3 + $0xa0] ss:$8 sps:$4 sm:$0xff]  }
  0x26   : > { %v1499_v8 = vld [vmem:[%s2057_s3 + $0xb4] ss:$8 sps:$4 sm:$0xff]   ;;  %v1497_v9 = vld [vmem:[%s2057_s3 + $0xb0] ss:$8 sps:$4 sm:$0xff]   ;;  %v1502_v10 = vld [vmem:[%s2057_s3 + $0xc4] ss:$8 sps:$4 sm:$0xff]  }
  0x27   : > { %454 = vmatpush1.bf16.msra.mxu0 %v1412_v21  ;;  %701 = vmatpush1.bf16.msra.mxu1 %v1433_v29  ;;  %v1500_v11 = vld [vmem:[%s2057_s3 + $0xc0] ss:$8 sps:$4 sm:$0xff]   ;;  %v1505_v12 = vld [vmem:[%s2057_s3 + $0xd4] ss:$8 sps:$4 sm:$0xff]   ;;  %v1503_v13 = vld [vmem:[%s2057_s3 + $0xd0] ss:$8 sps:$4 sm:$0xff]  }
  0x28   : > { %455 = vmatprep.subr.bf16.mxu0 %v1413_v24  ;;  %702 = vmatprep.subr.bf16.mxu1 %v1434_v30  ;;  %v432_v15 = vshrl.u32 %v431_v14, 7  ;;  %v349_v17 = vld [vmem:[%s2058_s4] sm:$0x3]  ;;  %s324_s14 = scalar_lea.vmem [#allocation2], %s323_s22  ;;  %s1156_s29 = scalar_lea.sflag [#allocation3], %s323_s22 }
  0x29   : > { %v1016_v14 = vld [vmem:[%s2062_s8] sm:$0x1]  ;;  %s1168_s26 = sshll.u32 %s324_s14, 4  ;;  %s1593_s16 = smov [#allocation2]   ;;  %s2014_s26 = int_to_ptr.vmem [resolvable:$true] %s1168_s26 }
  0x2a   : > { %v1925_v16 = vsub.s32 0, %v432_v15  ;;  %v1930_v18 = vsub.s32 1, %v432_v15  ;;  %s1528_s13 = scalar_lea.vmem %s2014_s26, 16  ;;  %s1532_s17 = sshll.u32 %s1593_s16, 4  ;;  %s1533_s17 = int_to_ptr.vmem [resolvable:$false] %s1532_s17 }
  0x2b   : > { %456 = vmatpush1.bf16.msra.mxu0 %v1415_v25  ;;  %703 = vmatpush1.bf16.msra.mxu1 %v1436_v31  ;;  %v1508_v31 = vld [vmem:[%s2057_s3 + $0xe4] ss:$8 sps:$4 sm:$0xff]   ;;  %p1529_p11 = scmp.ne.s32.totalorder %s2014_s26, %s1528_s13  ;;  %s1534_s23 = scalar_lea.vmem %s1533_s17, 32 }
  0x2c   : > { %704 = vmatprep.subr.bf16.mxu1 %v1437_v32  ;;  %939 = vmatprep.subr.bf16.mxu0 %v1466_v51  ;;  %v434_v19 = vrot.slane %v349_v17, %v1925_v16  ;;  %v438_v20 = vrot.slane %v349_v17, %v1930_v18  ;;  %v1506_v32 = vld [vmem:[%s2057_s3 + $0xe0] ss:$8 sps:$4 sm:$0xff]   ;;  %p1535_p0 = scmp.lt.s32.totalorder %s2014_s26, %s1533_s17  ;;  %p1536_p1 = scmp.lt.s32.totalorder %s1534_s23, %s1528_s13 }
  0x2d   : > { %p1530_p12 = pnand %p1529_p11, %p1682_p5 }
  0x2e   : > { %474 = vmatmul.mubr.bf16.vlgmr.msra.gmra.mrb[0].mxu0 %v1229_v28  ;;  %p1537_p2 = por %p1536_p1, %p1535_p0 }
  0x2f   : > { %705 = vmatpush1.bf16.msra.mxu1 %v1439_v33  ;;  %940 = vmatpush1.bf16.msra.mxu0 %v1464_v50  ;;  %v1511_v33 = vld [vmem:[%s2057_s3 + $0xf4] ss:$8 sps:$4 sm:$0xff]   ;;  %p1531_p13 = pneg %p1530_p12 }
  0x30   : > { %706 = vmatprep.subr.bf16.mxu1 %v1440_v34  ;;  %941 = vmatprep.subr.bf16.mxu0 %v1469_v52  ;;  %v1509_v34 = vld [vmem:[%s2057_s3 + $0xf0] ss:$8 sps:$4 sm:$0xff]  }
  0x31   : > { %p1538_p3 = pnand %p1537_p2, %p1531_p13 }
  0x33   : > { %707 = vmatpush1.bf16.msra.mxu1 %v1442_v35  ;;  %942 = vmatpush1.bf16.msra.mxu0 %v1467_v53  ;;  %v1512_v35 = vld [vmem:[%s2061_s7 + $0x40] sm:$0xff]  }
  0x34   : > { %708 = vmatprep.subr.bf16.mxu1 %v1443_v36  ;;  %943 = vmatprep.subr.bf16.mxu0 %v1472_v54  ;;  %v1513_v36 = vld [vmem:[%s2061_s7] sm:$0xff]  }
  0x37   : > { %709 = vmatpush1.bf16.msra.mxu1 %v1445_v37  ;;  %944 = vmatpush1.bf16.msra.mxu0 %v1470_v55  ;;  %v1514_v37 = vld [vmem:[%s2061_s7 + $0x48] sm:$0xff]  }
  0x38   : > { %710 = vmatprep.subr.bf16.mxu1 %v1446_v38  ;;  %945 = vmatprep.subr.bf16.mxu0 %v1475_v56  ;;  %v1515_v38 = vld [vmem:[%s2061_s7 + $0x8] sm:$0xff]  }
  0x3b   : > { %711 = vmatpush1.bf16.msra.mxu1 %v1448_v39  ;;  %946 = vmatpush1.bf16.msra.mxu0 %v1473_v57  ;;  %v1516_v39 = vld [vmem:[%s2061_s7 + $0x50] sm:$0xff]  }
  0x3c   : > { %712 = vmatprep.subr.bf16.mxu1 %v1449_v40  ;;  %947 = vmatprep.subr.bf16.mxu0 %v1478_v58  ;;  %v1517_v40 = vld [vmem:[%s2061_s7 + $0x10] sm:$0xff]  }
  0x3f   : > { %713 = vmatpush1.bf16.msra.mxu1 %v1451_v41  ;;  %948 = vmatpush1.bf16.msra.mxu0 %v1476_v59  ;;  %v1518_v41 = vld [vmem:[%s2061_s7 + $0x58] sm:$0xff]  }
  0x40   : > { %714 = vmatprep.subr.bf16.mxu1 %v1452_v42  ;;  %949 = vmatprep.subr.bf16.mxu0 %v1481_v60  ;;  %v1519_v42 = vld [vmem:[%s2061_s7 + $0x18] sm:$0xff]   ;;  %v1524_v60 = vld [vmem:[%s2061_s7 + $0x70] sm:$0xff]  }
  0x43   : > { %715 = vmatpush1.bf16.msra.mxu1 %v1454_v43  ;;  %950 = vmatpush1.bf16.msra.mxu0 %v1479_v61  ;;  %v1520_v43 = vld [vmem:[%s2061_s7 + $0x60] sm:$0xff]   ;;  %v1525_v61 = vld [vmem:[%s2061_s7 + $0x30] sm:$0xff]  }
  0x44   : > { %716 = vmatprep.subr.bf16.mxu1 %v1455_v44  ;;  %951 = vmatprep.subr.bf16.mxu0 %v1484_v62  ;;  %v1521_v44 = vld [vmem:[%s2061_s7 + $0x20] sm:$0xff]   ;;  %v1526_v62 = vld [vmem:[%s2061_s7 + $0x78] sm:$0xff]  }
  0x47   : > { %717 = vmatpush1.bf16.msra.mxu1 %v1457_v45  ;;  %952 = vmatpush1.bf16.msra.mxu0 %v1482_v63  ;;  %v1522_v45 = vld [vmem:[%s2061_s7 + $0x68] sm:$0xff]   ;;  %v1527_v63 = vld [vmem:[%s2061_s7 + $0x38] sm:$0xff]  }
  0x48   : > { %718 = vmatprep.subr.bf16.mxu1 %v1458_v46  ;;  %953 = vmatprep.subr.bf16.mxu0 %v1487_v0  ;;  %v1523_v46 = vld [vmem:[%s2061_s7 + $0x28] sm:$0xff]   ;;  %v767_v0 = vld [vmem:[%s2060_s6] sm:$0x3] }
  0x4b   : > { %719 = vmatpush1.bf16.msra.mxu1 %v1460_v47  ;;  %954 = vmatpush1.bf16.msra.mxu0 %v1485_v1  ;;  %v518_v47 = vld [vmem:[%s2059_s5] sm:$0x3]  ;;  %v932_v1 = vrot.slane %v767_v0, %v1925_v16 }
  0x4c   : > { %720 = vmatprep.subr.bf16.mxu1 %v1461_v48  ;;  %955 = vmatprep.subr.bf16.mxu0 %v1490_v2  ;;  %v683_v48 = vrot.slane %v518_v47, %v1925_v16  ;;  %v936_v2 = vrot.slane %v767_v0, %v1930_v18 }
  0x4f   : > { %721 = vmatpush1.bf16.msra.mxu1 %v1463_v49  ;;  %956 = vmatpush1.bf16.msra.mxu0 %v1488_v3  ;;  %v687_v49 = vrot.slane %v518_v47, %v1930_v18 }
  0x50   : > { %957 = vmatprep.subr.bf16.mxu0 %v1493_v4  ;;  %1330 = vmatprep.subr.bf16.mxu1 %v1512_v35 }
  0x53   : > { %958 = vmatpush1.bf16.msra.mxu0 %v1491_v5 }
  0x54   : > { %959 = vmatprep.subr.bf16.mxu0 %v1496_v6 }
  0x57   : > { %960 = vmatpush1.bf16.msra.mxu0 %v1494_v7 }
  0x58   : > { %961 = vmatprep.subr.bf16.mxu0 %v1499_v8 }
  0x5b   : > { %962 = vmatpush1.bf16.msra.mxu0 %v1497_v9 }
  0x5c   : > { %963 = vmatprep.subr.bf16.mxu0 %v1502_v10 }
  0x5f   : > { %964 = vmatpush1.bf16.msra.mxu0 %v1500_v11 }
  0x60   : > { %965 = vmatprep.subr.bf16.mxu0 %v1505_v12 }
  0x63   : > { %966 = vmatpush1.bf16.msra.mxu0 %v1503_v13 }
  0x64   : > { %967 = vmatprep.subr.bf16.mxu0 %v1508_v31 }
  0x67   : > { %968 = vmatpush1.bf16.msra.mxu0 %v1506_v32 }
  0x68   : > { %969 = vmatprep.subr.bf16.mxu0 %v1511_v33 }
  0x6b   : > { %970 = vmatpush1.bf16.msra.mxu0 %v1509_v34 }
 0x101   : > { %v475_v21 = vpop.f32.mrb[0].mxu0 }
 0x102   : > { %v476_v22 = vadd.f32 %v475_v21, %v434_v19  ;;  %v477_v23 = vpop.f32.mrb[1].mxu0 }
 0x103   : > { %v478_v24 = vadd.f32 %v477_v23, %v438_v20  ;;  %v479_v25 = vpop.f32.mrb[2].mxu0 }
 0x104   : > { %v482_v26 = vmax.f32 %v476_v22, 0.0  ;;  %v480_v27 = vpop.f32.mrb[3].mxu0 }
 0x105   : > { %v483_v28 = vmax.f32 %v478_v24, 0.0 }
 0x106   : > { %v484_v30 = vpack.c.bf16 %v482_v26, %v482_v26 }
 0x107   : > { %v485_v29 = vpack.c.bf16 %v483_v28, %v483_v28 }
 0x109   : > { %722 = vmatprep.mubr.bf16.mxu1 %v485_v29 }
 0x10a   : > { %723 = vmatmul.mubr.bf16.vlgmr.msra.gmra.mrb[0].mxu1 %v484_v30 }
 0x10b   : > { %1331 = vmatpush3.bf16.msra.mxu1 %v1513_v36 }
 0x10c   : > { %1332 = vmatprep.subr.bf16.mxu1 %v1514_v37 }
 0x10f   : > { %1333 = vmatpush3.bf16.msra.mxu1 %v1515_v38 }
 0x110   : > { %1334 = vmatprep.subr.bf16.mxu1 %v1516_v39 }
 0x113   : > { %1335 = vmatpush3.bf16.msra.mxu1 %v1517_v40 }
 0x114   : > { %1336 = vmatprep.subr.bf16.mxu1 %v1518_v41 }
 0x117   : > { %1337 = vmatpush3.bf16.msra.mxu1 %v1519_v42 }
 0x118   : > { %1338 = vmatprep.subr.bf16.mxu1 %v1520_v43 }
 0x11b   : > { %1339 = vmatpush3.bf16.msra.mxu1 %v1521_v44 }
 0x11c   : > { %1340 = vmatprep.subr.bf16.mxu1 %v1522_v45 }
 0x11f   : > { %1341 = vmatpush3.bf16.msra.mxu1 %v1523_v46 }
 0x120   : > { %1342 = vmatprep.subr.bf16.mxu1 %v1524_v60 }
 0x123   : > { %1343 = vmatpush3.bf16.msra.mxu1 %v1525_v61 }
 0x124   : > { %1344 = vmatprep.subr.bf16.mxu1 %v1526_v62 }
 0x127   : > { %1345 = vmatpush3.bf16.msra.mxu1 %v1527_v63 }
 0x1dd   : > { %v724_v50 = vpop.f32.mrb[0].mxu1 }
 0x1de   : > { %v725_v51 = vadd.f32 %v724_v50, %v683_v48  ;;  %v726_v52 = vpop.f32.mrb[1].mxu1 }
 0x1df   : > { %v727_v53 = vadd.f32 %v726_v52, %v687_v49  ;;  %v728_v54 = vpop.f32.mrb[2].mxu1 }
 0x1e0   : > { %v731_v55 = vmax.f32 %v725_v51, 0.0  ;;  %v729_v56 = vpop.f32.mrb[3].mxu1 }
 0x1e1   : > { %v732_v57 = vmax.f32 %v727_v53, 0.0 }
 0x1e2   : > { %v733_v59 = vpack.c.bf16 %v731_v55, %v731_v55 }
 0x1e3   : > { %v734_v58 = vpack.c.bf16 %v732_v57, %v732_v57 }
 0x1e5   : > { %971 = vmatprep.mubr.bf16.mxu0 %v734_v58 }
 0x1e6   : > { %972 = vmatmul.mubr.bf16.vlgmr.msra.gmra.mrb[4].mxu0 %v733_v59 }
 0x2b9   : > { %v973_v3 = vpop.f32.mrb[4].mxu0 }
 0x2ba   : > { %v974_v4 = vadd.f32 %v973_v3, %v932_v1  ;;  %v975_v5 = vpop.f32.mrb[5].mxu0 }
 0x2bb   : > { %v976_v6 = vadd.f32 %v975_v5, %v936_v2  ;;  %v977_v7 = vpop.f32.mrb[6].mxu0 }
 0x2bc   : > { %v980_v8 = vmax.f32 %v974_v4, 0.0  ;;  %v978_v9 = vpop.f32.mrb[7].mxu0 }
 0x2bd   : > { %v981_v10 = vmax.f32 %v976_v6, 0.0 }
 0x2be   : > { %v982_v12 = vpack.c.bf16 %v980_v8, %v980_v8 }
 0x2bf   : > { %v983_v11 = vpack.c.bf16 %v981_v10, %v981_v10 }
 0x2c1   : > { %1145 = vmatprep.mubr.bf16.mxu1 %v983_v11 }
 0x2c2   : > { %1146 = vmatmul.mubr.bf16.vlgmr.msra.gmra.mrb[4].mxu1 %v982_v12 }
 0x395   : > { %v1346_v13 = vpop.f32.mrb[4].mxu1 }
 0x396   : > { %v1347_v15 = vpop.f32.mrb[5].mxu1 }
 0x397   : > { %v1348_v16 = vadd.f32 %v1347_v15, %v1346_v13  ;;  %v1349_v17 = vpop.f32.mrb[6].mxu1 }
 0x398   : > { %v1350_v18 = vpop.f32.mrb[7].mxu1 }
 0x399   : > { %v1148_v19 = vadd.f32 %v1348_v16, %v1016_v14 }
 0x39b   : > { %1154 = vst.msk [vmem:[%s324_s14] sm:$0x1] %vm1153_vm0, %v1148_v19 }
 0x39c   : > { %1541 = shalt.err (!%p1538_p3)
}
 0x39d   : > { %s1542_s22 = scalar_lea.hbm %s2012_s28, 16  ;;  %s1546_s14 = scalar_lea.hbm %s2063_s9, 32 }
 0x39e   : > { %p1543_p4 = scmp.ne.s32.totalorder %s2012_s28, %s1542_s22  ;;  %p1547_p9 = scmp.lt.u32.totalorder %s2012_s28, %s2063_s9 }
 0x39f   : > { %p1548_p10 = scmp.lt.u32.totalorder %s1546_s14, %s1542_s22  ;;  %p1550_p12 = scmp.lt.u32.totalorder %s1542_s22, %s2012_s28 }
 0x3a0   : > { %p1544_p7 = pnand %p1543_p4, %p1682_p5 }
 0x3a1   : > { %p1549_p11 = por %p1548_p10, %p1547_p9 }
 0x3a2   : > { %p1545_p8 = pneg %p1544_p7 }
 0x3a3   : > { %p1551_p13 = por %p1550_p12, %p1549_p11 }
 0x3a5   : > { %p1552_p0 = pnand %p1551_p13, %p1545_p8 }
 0x3a7   : > { %1555 = shalt.err (!%p1552_p0)
}
 0x3a8   : > { %1352 = dma.vmem_to_hbm [thread:$0]  (%p1682_p5), %s2014_s26, 16, %s2012_s28, %s1156_s29  }
 0x3a9 PF: > { %p1358_p1 = scmp.ge.s32.totalorder %s1590_s12, 2  ;;  %s1180_s13 = sand.u32 1, %s1578_s30  }
 0x3aa   : > { %s1181_s16 = scalar_lea.sflag [#allocation3], %s1180_s13 }
 0x3ab   : > { %p1355_p2 = pnand %p1358_p1, %p1686_p6 }
 0x3ad   : > { %1573 = dma.done.wait (!%p1355_p2), %s1181_s16, 16  }
 0x3ae   : > { %1575 = vsyncadd (!%p1355_p2), %s1181_s16, 4294967280  ;;  %p19_p3 = scmp.ge.s32.totalorder %s1669_s15, 4   ;;  %s2066_s30 = smov %s1582_s10 }
 0x3af   : > { %s2067_s10 = smov %s1586_s11  ;;  %s2068_s11 = smov %s1680_s18 }
 0x3b0   : > { %s2069_s12 = smov %s1669_s15  ;;  %21 = sbr.rel (!%p19_p3) target bundleno = 3 (0x3), region = 92 }
 0x3b7   :  { %1185 = vsyncpa [#allocation3], 1 }
 0x3b8   :  { %1187 = vsyncpa [#allocation3 + $0x1], 1 }

</bundles_post_ra>
